<compile_context>
chip_gen: v5e
topology: v5e:2x2
jax: 0.10.0
libtpu: 0.0.40
codegen_flags: <defaults>
</compile_context>

<pallas_src>
import functools

import jax
import jax.numpy as jnp
from jax.experimental import pallas as pl
from jax.experimental.pallas import tpu as pltpu


# ----------------------------------------------------------------------------
# Fused Pallas kernel: one batch element per grid step.
# ----------------------------------------------------------------------------
def _attention_kernel(x_ref, wq_ref, wkv_ref, wproj_ref, bproj_ref,
                      wdw_ref, bdw_ref, o_ref, xp_s, *, H, W, C, num_heads):
    # x_ref    : (1, N, C)        f32   tokens (N = H*W)
    # wq_ref   : (C, C)           bf16  q weight, (in, out), scale pre-folded
    # wkv_ref  : (C, 2C)          bf16  kv weight, (in, out)  [k | v]
    # wproj_ref: (C, C)           bf16  1x1 proj weight, (in, out)
    # bproj_ref: (1, C)           f32   proj bias
    # wdw_ref  : (9, C)           f32   depthwise 3x3 weights, tap-major
    # bdw_ref  : (1, C)           f32   depthwise bias
    # o_ref    : (1, N, C)        f32
    # xp_s     : (H+2, W+2, C)    f32   VMEM scratch: zero-padded image of x
    N = H * W
    hd = C // num_heads

    x = x_ref[0]                                   # (N, C) f32
    xb = x.astype(jnp.bfloat16)

    # ---- q / kv linear projections (MXU, bf16 in, f32 acc) -------------------
    # Attention scale is already folded into wq (wrapper), so q is pre-scaled.
    q = jnp.dot(xb, wq_ref[...], preferred_element_type=jnp.float32)    # (N, C)
    kv = jnp.dot(xb, wkv_ref[...], preferred_element_type=jnp.float32)  # (N, 2C)
    qb = q.astype(jnp.bfloat16)                    # single cast (not per head)
    kvb = kv.astype(jnp.bfloat16)                  # single cast (not per head)

    # ---- depthwise 3x3 conv branch (VPU, f32, 'same' padding, bias) ----------
    # Build the zero-padded image once in VMEM scratch (no duplicated HBM input).
    xp_s[...] = jnp.zeros((H + 2, W + 2, C), dtype=jnp.float32)
    xp_s[1:H + 1, 1:W + 1, :] = x.reshape(H, W, C)
    wdw = wdw_ref[...]                             # (9, C)
    acc = None
    for t in range(9):
        dy, dx = divmod(t, 3)
        tap = xp_s[dy:dy + H, dx:dx + W, :] * wdw[t].reshape(1, 1, C)
        acc = tap if acc is None else acc + tap    # (H, W, C)

    # Output accumulator: conv branch + depthwise bias + proj bias, lane-dense.
    out = acc.reshape(N, C) + (bdw_ref[...] + bproj_ref[...])            # (N, C)

    # ---- multi-head self attention with proj fused into the accumulator ------
    for h in range(num_heads):
        lo = h * hd
        qh = qb[:, lo:lo + hd]                     # (N, hd) bf16
        kh = kvb[:, lo:lo + hd]                    # (N, hd) bf16
        vh = kvb[:, C + lo:C + lo + hd]            # (N, hd) bf16
        s = jnp.einsum('qd,kd->qk', qh, kh,
                       preferred_element_type=jnp.float32)               # (N, N)
        s = s - jnp.max(s, axis=-1, keepdims=True)
        p = jnp.exp(s)
        l = jnp.sum(p, axis=-1, keepdims=True)
        p = p * pl.reciprocal(l, approx=False)     # exact softmax denominator
        oh = jnp.dot(p.astype(jnp.bfloat16), vh,
                     preferred_element_type=jnp.float32)                 # (N, hd)
        # Fused per-head output projection -> lane-dense (N, C) accumulate.
        out = out + jnp.dot(oh.astype(jnp.bfloat16),
                            wproj_ref[lo:lo + hd, :],
                            preferred_element_type=jnp.float32)          # (N, C)

    o_ref[0] = out


# ----------------------------------------------------------------------------
# Wrapper
# ----------------------------------------------------------------------------
def attention_forward(x, params, *, H, W, num_heads):
    B, N, C = x.shape
    assert N == H * W and C % num_heads == 0
    hd = C // num_heads
    scale = float(hd) ** -0.5

    # Fold the attention scale into wq (zero in-kernel cost; exact for
    # power-of-two scales like hd=16 -> 0.25).
    wq_scaled = (params["wq"].astype(jnp.float32) * scale).astype(jnp.bfloat16)

    kern = functools.partial(_attention_kernel, H=H, W=W, C=C,
                             num_heads=num_heads)
    return pl.pallas_call(
        kern,
        out_shape=jax.ShapeDtypeStruct((B, N, C), jnp.float32),
        grid=(B,),
        in_specs=[
            pl.BlockSpec((1, N, C), lambda b: (b, 0, 0)),
            pl.BlockSpec((C, C), lambda b: (0, 0)),
            pl.BlockSpec((C, 2 * C), lambda b: (0, 0)),
            pl.BlockSpec((C, C), lambda b: (0, 0)),
            pl.BlockSpec((1, C), lambda b: (0, 0)),
            pl.BlockSpec((9, C), lambda b: (0, 0)),
            pl.BlockSpec((1, C), lambda b: (0, 0)),
        ],
        out_specs=pl.BlockSpec((1, N, C), lambda b: (b, 0, 0)),
        scratch_shapes=[pltpu.VMEM((H + 2, W + 2, C), jnp.float32)],
        compiler_params=pltpu.CompilerParams(
            dimension_semantics=("parallel",)),
    )(x, wq_scaled, params["wkv"], params["wproj"], params["bproj"],
      params["wdw"], params["bdw"])


# ----------------------------------------------------------------------------
# Pure-JAX reference (same math, f32) for a correctness check.
# ----------------------------------------------------------------------------
def attention_reference(x, params, *, H, W, num_heads):
    B, N, C = x.shape
    hd = C // num_heads
    scale = float(hd) ** -0.5
    wq = params["wq"].astype(jnp.float32)
    wkv = params["wkv"].astype(jnp.float32)
    wproj = params["wproj"].astype(jnp.float32)

    q = x @ wq
    kv = x @ wkv
    k, v = kv[..., :C], kv[..., C:]

    qh = q.reshape(B, N, num_heads, hd).transpose(0, 2, 1, 3)
    kh = k.reshape(B, N, num_heads, hd).transpose(0, 2, 1, 3)
    vh = v.reshape(B, N, num_heads, hd).transpose(0, 2, 1, 3)
    s = jnp.einsum('bhqd,bhkd->bhqk', qh, kh) * scale
    p = jax.nn.softmax(s, axis=-1)
    o = jnp.einsum('bhqk,bhkd->bhqd', p, vh).transpose(0, 2, 1, 3).reshape(B, N, C)
    proj = o @ wproj + params["bproj"]

    xim = x.reshape(B, H, W, C)
    xp = jnp.pad(xim, ((0, 0), (1, 1), (1, 1), (0, 0)))
    conv = jnp.zeros((B, H, W, C), jnp.float32)
    for t in range(9):
        dy, dx = divmod(t, 3)
        conv = conv + xp[:, dy:dy + H, dx:dx + W, :] * params["wdw"][t]
    conv = conv + params["bdw"]
    return proj + conv.reshape(B, N, C)


# ----------------------------------------------------------------------------
if __name__ == "__main__":
    key = jax.random.PRNGKey(0)
    B, H, W = 2, 8, 8
    C, num_heads = 128, 8
    N = H * W

    ks = jax.random.split(key, 7)
    x = jax.random.normal(ks[0], (B, N, C), dtype=jnp.float32)

    params = dict(
        # Linear weights stored (in, out) == torch weight transposed; bf16 for the MXU.
        wq=(jax.random.normal(ks[1], (C, C), jnp.float32) * 0.02).astype(jnp.bfloat16),
        wkv=(jax.random.normal(ks[2], (C, 2 * C), jnp.float32) * 0.02).astype(jnp.bfloat16),
        wproj=(jax.random.normal(ks[3], (C, C), jnp.float32)
               * (2.0 / C) ** 0.5).astype(jnp.bfloat16),
        bproj=jax.random.normal(ks[4], (1, C), jnp.float32) * 0.02,
        # Depthwise 3x3 weights, tap-major (9, C): wdw[t, c] == torch_w[c, 0, t//3, t%3].
        wdw=jax.random.normal(ks[5], (9, C), jnp.float32) * (2.0 / 9.0) ** 0.5,
        bdw=jax.random.normal(ks[6], (1, C), jnp.float32) * 0.02,
    )

    fwd = jax.jit(functools.partial(attention_forward, H=H, W=W, num_heads=num_heads))
    out = jax.block_until_ready(fwd(x, params))

    ref = attention_reference(x, params, H=H, W=W, num_heads=num_heads)
    err = float(jnp.max(jnp.abs(out - ref)))

    assert out.shape == (B, N, C)
    assert bool(jnp.all(jnp.isfinite(out)))
    assert err < 5e-2, f"max abs diff vs pure-JAX reference: {err}"
    print("KERNEL_OK")
</pallas_src>

<mosaic_0001>
module attributes {stable_mosaic.version = 11 : i64} {
  func.func @_attention_kernel(%arg0: i32, %arg1: memref<1x64x128xf32, #tpu.memory_space<vmem>>, %arg2: memref<128x128xbf16, #tpu.memory_space<vmem>>, %arg3: memref<128x256xbf16, #tpu.memory_space<vmem>>, %arg4: memref<128x128xbf16, #tpu.memory_space<vmem>>, %arg5: memref<1x128xf32, #tpu.memory_space<vmem>>, %arg6: memref<9x128xf32, #tpu.memory_space<vmem>>, %arg7: memref<1x128xf32, #tpu.memory_space<vmem>>, %arg8: memref<1x64x128xf32, #tpu.memory_space<vmem>>, %arg9: memref<10x10x128xf32, #tpu.memory_space<vmem>>) attributes {dimension_semantics = [#tpu.dimension_semantics<parallel>], iteration_bounds = array<i64: 2>, scalar_prefetch = 0 : i64, scratch_operands = 1 : i64, tpu.core_type = #tpu.core_type<tc>, window_params = [{transform_indices = @transform_0, window_bounds = array<i64: 1, 64, 128>}, {pipeline_mode = #tpu.pipeline_mode<synchronous>, transform_indices = @transform_1, window_bounds = array<i64: 128, 128>}, {pipeline_mode = #tpu.pipeline_mode<synchronous>, transform_indices = @transform_2, window_bounds = array<i64: 128, 256>}, {pipeline_mode = #tpu.pipeline_mode<synchronous>, transform_indices = @transform_3, window_bounds = array<i64: 128, 128>}, {pipeline_mode = #tpu.pipeline_mode<synchronous>, transform_indices = @transform_4, window_bounds = array<i64: 1, 128>}, {pipeline_mode = #tpu.pipeline_mode<synchronous>, transform_indices = @transform_5, window_bounds = array<i64: 9, 128>}, {pipeline_mode = #tpu.pipeline_mode<synchronous>, transform_indices = @transform_6, window_bounds = array<i64: 1, 128>}, {transform_indices = @transform_7, window_bounds = array<i64: 1, 64, 128>}]} {
    %c0 = arith.constant 0 : index
    %c0_0 = arith.constant 0 : index
    %c0_1 = arith.constant 0 : index
    %0 = vector.load %arg1[%c0, %c0_0, %c0_1] : memref<1x64x128xf32, #tpu.memory_space<vmem>>, vector<1x64x128xf32>
    %1 = vector.shape_cast %0 : vector<1x64x128xf32> to vector<64x128xf32>
    %2 = arith.truncf %1 : vector<64x128xf32> to vector<64x128xbf16>
    %c0_2 = arith.constant 0 : index
    %c0_3 = arith.constant 0 : index
    %3 = vector.load %arg2[%c0_2, %c0_3] : memref<128x128xbf16, #tpu.memory_space<vmem>>, vector<128x128xbf16>
    %cst = arith.constant dense<0.000000e+00> : vector<64x128xf32>
    %4 = tpu.matmul %2, %3, %cst {dimension_numbers = #tpu.dot_dimension_numbers<[1], [0], [0], [1], [0, 0, 1, 1], [], []>} : vector<64x128xbf16>, vector<128x128xbf16>, vector<64x128xf32> -> vector<64x128xf32>
    %c0_4 = arith.constant 0 : index
    %c0_5 = arith.constant 0 : index
    %5 = vector.load %arg3[%c0_4, %c0_5] : memref<128x256xbf16, #tpu.memory_space<vmem>>, vector<128x256xbf16>
    %cst_6 = arith.constant dense<0.000000e+00> : vector<64x256xf32>
    %6 = tpu.matmul %2, %5, %cst_6 {dimension_numbers = #tpu.dot_dimension_numbers<[1], [0], [0], [1], [0, 0, 1, 1], [], []>} : vector<64x128xbf16>, vector<128x256xbf16>, vector<64x256xf32> -> vector<64x256xf32>
    %7 = arith.truncf %4 : vector<64x128xf32> to vector<64x128xbf16>
    %8 = arith.truncf %6 : vector<64x256xf32> to vector<64x256xbf16>
    %cst_7 = arith.constant 0.000000e+00 : f32
    %9 = vector.broadcast %cst_7 : f32 to vector<10x10x128xf32>
    %c0_8 = arith.constant 0 : index
    %c0_9 = arith.constant 0 : index
    %c0_10 = arith.constant 0 : index
    %10 = vector.load %arg9[%c0_8, %c0_9, %c0_10] : memref<10x10x128xf32, #tpu.memory_space<vmem>>, vector<10x10x128xf32>
    tpu.vector_store %arg9[%c0_8, %c0_9, %c0_10], %9 {strides = array<i32>} : memref<10x10x128xf32, #tpu.memory_space<vmem>>, vector<10x10x128xf32>,
    %11 = vector.shape_cast %1 : vector<64x128xf32> to vector<8x8x128xf32>
    %c1 = arith.constant 1 : index
    %c1_11 = arith.constant 1 : index
    %c0_12 = arith.constant 0 : index
    %12 = vector.load %arg9[%c1, %c1_11, %c0_12] : memref<10x10x128xf32, #tpu.memory_space<vmem>>, vector<8x8x128xf32>
    tpu.vector_store %arg9[%c1, %c1_11, %c0_12], %11 {strides = array<i32>} : memref<10x10x128xf32, #tpu.memory_space<vmem>>, vector<8x8x128xf32>,
    %c0_13 = arith.constant 0 : index
    %c0_14 = arith.constant 0 : index
    %13 = vector.load %arg6[%c0_13, %c0_14] : memref<9x128xf32, #tpu.memory_space<vmem>>, vector<9x128xf32>
    %c0_15 = arith.constant 0 : index
    %c0_16 = arith.constant 0 : index
    %c0_17 = arith.constant 0 : index
    %14 = vector.load %arg9[%c0_15, %c0_16, %c0_17] : memref<10x10x128xf32, #tpu.memory_space<vmem>>, vector<8x8x128xf32>
    %15 = vector.extract_strided_slice %13 {offsets = [0, 0], sizes = [1, 128], strides = [1, 1]} : vector<9x128xf32> to vector<1x128xf32>
    %16 = vector.shape_cast %15 : vector<1x128xf32> to vector<128xf32>
    %17 = vector.shape_cast %16 : vector<128xf32> to vector<1x1x128xf32>
    %18 = vector.broadcast %17 : vector<1x1x128xf32> to vector<8x8x128xf32>
    %19 = arith.mulf %14, %18 : vector<8x8x128xf32>
    %c0_18 = arith.constant 0 : index
    %c1_19 = arith.constant 1 : index
    %c0_20 = arith.constant 0 : index
    %20 = vector.load %arg9[%c0_18, %c1_19, %c0_20] : memref<10x10x128xf32, #tpu.memory_space<vmem>>, vector<8x8x128xf32>
    %21 = vector.extract_strided_slice %13 {offsets = [1, 0], sizes = [1, 128], strides = [1, 1]} : vector<9x128xf32> to vector<1x128xf32>
    %22 = vector.shape_cast %21 : vector<1x128xf32> to vector<128xf32>
    %23 = vector.shape_cast %22 : vector<128xf32> to vector<1x1x128xf32>
    %24 = vector.broadcast %23 : vector<1x1x128xf32> to vector<8x8x128xf32>
    %25 = arith.mulf %20, %24 : vector<8x8x128xf32>
    %26 = arith.addf %19, %25 : vector<8x8x128xf32>
    %c0_21 = arith.constant 0 : index
    %c2 = arith.constant 2 : index
    %c0_22 = arith.constant 0 : index
    %27 = vector.load %arg9[%c0_21, %c2, %c0_22] : memref<10x10x128xf32, #tpu.memory_space<vmem>>, vector<8x8x128xf32>
    %28 = vector.extract_strided_slice %13 {offsets = [2, 0], sizes = [1, 128], strides = [1, 1]} : vector<9x128xf32> to vector<1x128xf32>
    %29 = vector.shape_cast %28 : vector<1x128xf32> to vector<128xf32>
    %30 = vector.shape_cast %29 : vector<128xf32> to vector<1x1x128xf32>
    %31 = vector.broadcast %30 : vector<1x1x128xf32> to vector<8x8x128xf32>
    %32 = arith.mulf %27, %31 : vector<8x8x128xf32>
    %33 = arith.addf %26, %32 : vector<8x8x128xf32>
    %c1_23 = arith.constant 1 : index
    %c0_24 = arith.constant 0 : index
    %c0_25 = arith.constant 0 : index
    %34 = vector.load %arg9[%c1_23, %c0_24, %c0_25] : memref<10x10x128xf32, #tpu.memory_space<vmem>>, vector<8x8x128xf32>
    %35 = vector.extract_strided_slice %13 {offsets = [3, 0], sizes = [1, 128], strides = [1, 1]} : vector<9x128xf32> to vector<1x128xf32>
    %36 = vector.shape_cast %35 : vector<1x128xf32> to vector<128xf32>
    %37 = vector.shape_cast %36 : vector<128xf32> to vector<1x1x128xf32>
    %38 = vector.broadcast %37 : vector<1x1x128xf32> to vector<8x8x128xf32>
    %39 = arith.mulf %34, %38 : vector<8x8x128xf32>
    %40 = arith.addf %33, %39 : vector<8x8x128xf32>
    %c1_26 = arith.constant 1 : index
    %c1_27 = arith.constant 1 : index
    %c0_28 = arith.constant 0 : index
    %41 = vector.load %arg9[%c1_26, %c1_27, %c0_28] : memref<10x10x128xf32, #tpu.memory_space<vmem>>, vector<8x8x128xf32>
    %42 = vector.extract_strided_slice %13 {offsets = [4, 0], sizes = [1, 128], strides = [1, 1]} : vector<9x128xf32> to vector<1x128xf32>
    %43 = vector.shape_cast %42 : vector<1x128xf32> to vector<128xf32>
    %44 = vector.shape_cast %43 : vector<128xf32> to vector<1x1x128xf32>
    %45 = vector.broadcast %44 : vector<1x1x128xf32> to vector<8x8x128xf32>
    %46 = arith.mulf %41, %45 : vector<8x8x128xf32>
    %47 = arith.addf %40, %46 : vector<8x8x128xf32>
    %c1_29 = arith.constant 1 : index
    %c2_30 = arith.constant 2 : index
    %c0_31 = arith.constant 0 : index
    %48 = vector.load %arg9[%c1_29, %c2_30, %c0_31] : memref<10x10x128xf32, #tpu.memory_space<vmem>>, vector<8x8x128xf32>
    %49 = vector.extract_strided_slice %13 {offsets = [5, 0], sizes = [1, 128], strides = [1, 1]} : vector<9x128xf32> to vector<1x128xf32>
    %50 = vector.shape_cast %49 : vector<1x128xf32> to vector<128xf32>
    %51 = vector.shape_cast %50 : vector<128xf32> to vector<1x1x128xf32>
    %52 = vector.broadcast %51 : vector<1x1x128xf32> to vector<8x8x128xf32>
    %53 = arith.mulf %48, %52 : vector<8x8x128xf32>
    %54 = arith.addf %47, %53 : vector<8x8x128xf32>
    %c2_32 = arith.constant 2 : index
    %c0_33 = arith.constant 0 : index
    %c0_34 = arith.constant 0 : index
    %55 = vector.load %arg9[%c2_32, %c0_33, %c0_34] : memref<10x10x128xf32, #tpu.memory_space<vmem>>, vector<8x8x128xf32>
    %56 = vector.extract_strided_slice %13 {offsets = [6, 0], sizes = [1, 128], strides = [1, 1]} : vector<9x128xf32> to vector<1x128xf32>
    %57 = vector.shape_cast %56 : vector<1x128xf32> to vector<128xf32>
    %58 = vector.shape_cast %57 : vector<128xf32> to vector<1x1x128xf32>
    %59 = vector.broadcast %58 : vector<1x1x128xf32> to vector<8x8x128xf32>
    %60 = arith.mulf %55, %59 : vector<8x8x128xf32>
    %61 = arith.addf %54, %60 : vector<8x8x128xf32>
    %c2_35 = arith.constant 2 : index
    %c1_36 = arith.constant 1 : index
    %c0_37 = arith.constant 0 : index
    %62 = vector.load %arg9[%c2_35, %c1_36, %c0_37] : memref<10x10x128xf32, #tpu.memory_space<vmem>>, vector<8x8x128xf32>
    %63 = vector.extract_strided_slice %13 {offsets = [7, 0], sizes = [1, 128], strides = [1, 1]} : vector<9x128xf32> to vector<1x128xf32>
    %64 = vector.shape_cast %63 : vector<1x128xf32> to vector<128xf32>
    %65 = vector.shape_cast %64 : vector<128xf32> to vector<1x1x128xf32>
    %66 = vector.broadcast %65 : vector<1x1x128xf32> to vector<8x8x128xf32>
    %67 = arith.mulf %62, %66 : vector<8x8x128xf32>
    %68 = arith.addf %61, %67 : vector<8x8x128xf32>
    %c2_38 = arith.constant 2 : index
    %c2_39 = arith.constant 2 : index
    %c0_40 = arith.constant 0 : index
    %69 = vector.load %arg9[%c2_38, %c2_39, %c0_40] : memref<10x10x128xf32, #tpu.memory_space<vmem>>, vector<8x8x128xf32>
    %70 = vector.extract_strided_slice %13 {offsets = [8, 0], sizes = [1, 128], strides = [1, 1]} : vector<9x128xf32> to vector<1x128xf32>
    %71 = vector.shape_cast %70 : vector<1x128xf32> to vector<128xf32>
    %72 = vector.shape_cast %71 : vector<128xf32> to vector<1x1x128xf32>
    %73 = vector.broadcast %72 : vector<1x1x128xf32> to vector<8x8x128xf32>
    %74 = arith.mulf %69, %73 : vector<8x8x128xf32>
    %75 = arith.addf %68, %74 : vector<8x8x128xf32>
    %76 = vector.shape_cast %75 : vector<8x8x128xf32> to vector<64x128xf32>
    %c0_41 = arith.constant 0 : index
    %c0_42 = arith.constant 0 : index
    %77 = vector.load %arg7[%c0_41, %c0_42] : memref<1x128xf32, #tpu.memory_space<vmem>>, vector<1x128xf32>
    %c0_43 = arith.constant 0 : index
    %c0_44 = arith.constant 0 : index
    %78 = vector.load %arg5[%c0_43, %c0_44] : memref<1x128xf32, #tpu.memory_space<vmem>>, vector<1x128xf32>
    %79 = arith.addf %77, %78 : vector<1x128xf32>
    %80 = vector.broadcast %79 : vector<1x128xf32> to vector<64x128xf32>
    %81 = arith.addf %76, %80 : vector<64x128xf32>
    %82 = vector.extract_strided_slice %7 {offsets = [0, 0], sizes = [64, 16], strides = [1, 1]} : vector<64x128xbf16> to vector<64x16xbf16>
    %83 = vector.extract_strided_slice %8 {offsets = [0, 0], sizes = [64, 16], strides = [1, 1]} : vector<64x256xbf16> to vector<64x16xbf16>
    %84 = vector.extract_strided_slice %8 {offsets = [0, 128], sizes = [64, 16], strides = [1, 1]} : vector<64x256xbf16> to vector<64x16xbf16>
    "tpu.trace_start"() <{level = 10 : i32, message = "qd,kd->qk"}> : () -> ()
    %cst_45 = arith.constant dense<0.000000e+00> : vector<64x64xf32>
    %85 = tpu.matmul %82, %83, %cst_45 {dimension_numbers = #tpu.dot_dimension_numbers<[1], [1], [0], [0], [0, 0, 1, 0], [], []>} : vector<64x16xbf16>, vector<64x16xbf16>, vector<64x64xf32> -> vector<64x64xf32>
    "tpu.trace_stop"() : () -> ()
    %cst_46 = arith.constant dense<0xFF800000> : vector<64xf32>
    %86 = vector.multi_reduction <maximumf>, %85, %cst_46 [1] : vector<64x64xf32> to vector<64xf32>
    %87 = vector.shape_cast %86 : vector<64xf32> to vector<64x1xf32>
    %88 = vector.broadcast %87 : vector<64x1xf32> to vector<64x64xf32>
    %89 = arith.subf %85, %88 : vector<64x64xf32>
    %90 = math.exp %89 : vector<64x64xf32>
    %cst_47 = arith.constant dense<0.000000e+00> : vector<64xf32>
    %91 = vector.multi_reduction <add>, %90, %cst_47 [1] : vector<64x64xf32> to vector<64xf32>
    %92 = vector.shape_cast %91 : vector<64xf32> to vector<64x1xf32>
    %93 = tpu.reciprocal %92 : vector<64x1xf32> -> vector<64x1xf32>
    %94 = vector.broadcast %93 : vector<64x1xf32> to vector<64x64xf32>
    %95 = arith.mulf %90, %94 : vector<64x64xf32>
    %96 = arith.truncf %95 : vector<64x64xf32> to vector<64x64xbf16>
    %cst_48 = arith.constant dense<0.000000e+00> : vector<64x16xf32>
    %97 = tpu.matmul %96, %84, %cst_48 {dimension_numbers = #tpu.dot_dimension_numbers<[1], [0], [0], [1], [0, 0, 1, 1], [], []>} : vector<64x64xbf16>, vector<64x16xbf16>, vector<64x16xf32> -> vector<64x16xf32>
    %98 = arith.truncf %97 : vector<64x16xf32> to vector<64x16xbf16>
    %c0_49 = arith.constant 0 : index
    %c0_50 = arith.constant 0 : index
    %99 = vector.load %arg4[%c0_49, %c0_50] : memref<128x128xbf16, #tpu.memory_space<vmem>>, vector<16x128xbf16>
    %cst_51 = arith.constant dense<0.000000e+00> : vector<64x128xf32>
    %100 = tpu.matmul %98, %99, %cst_51 {dimension_numbers = #tpu.dot_dimension_numbers<[1], [0], [0], [1], [0, 0, 1, 1], [], []>} : vector<64x16xbf16>, vector<16x128xbf16>, vector<64x128xf32> -> vector<64x128xf32>
    %101 = arith.addf %81, %100 : vector<64x128xf32>
    %102 = vector.extract_strided_slice %7 {offsets = [0, 16], sizes = [64, 16], strides = [1, 1]} : vector<64x128xbf16> to vector<64x16xbf16>
    %103 = vector.extract_strided_slice %8 {offsets = [0, 16], sizes = [64, 16], strides = [1, 1]} : vector<64x256xbf16> to vector<64x16xbf16>
    %104 = vector.extract_strided_slice %8 {offsets = [0, 144], sizes = [64, 16], strides = [1, 1]} : vector<64x256xbf16> to vector<64x16xbf16>
    "tpu.trace_start"() <{level = 10 : i32, message = "qd,kd->qk"}> : () -> ()
    %cst_52 = arith.constant dense<0.000000e+00> : vector<64x64xf32>
    %105 = tpu.matmul %102, %103, %cst_52 {dimension_numbers = #tpu.dot_dimension_numbers<[1], [1], [0], [0], [0, 0, 1, 0], [], []>} : vector<64x16xbf16>, vector<64x16xbf16>, vector<64x64xf32> -> vector<64x64xf32>
    "tpu.trace_stop"() : () -> ()
    %cst_53 = arith.constant dense<0xFF800000> : vector<64xf32>
    %106 = vector.multi_reduction <maximumf>, %105, %cst_53 [1] : vector<64x64xf32> to vector<64xf32>
    %107 = vector.shape_cast %106 : vector<64xf32> to vector<64x1xf32>
    %108 = vector.broadcast %107 : vector<64x1xf32> to vector<64x64xf32>
    %109 = arith.subf %105, %108 : vector<64x64xf32>
    %110 = math.exp %109 : vector<64x64xf32>
    %cst_54 = arith.constant dense<0.000000e+00> : vector<64xf32>
    %111 = vector.multi_reduction <add>, %110, %cst_54 [1] : vector<64x64xf32> to vector<64xf32>
    %112 = vector.shape_cast %111 : vector<64xf32> to vector<64x1xf32>
    %113 = tpu.reciprocal %112 : vector<64x1xf32> -> vector<64x1xf32>
    %114 = vector.broadcast %113 : vector<64x1xf32> to vector<64x64xf32>
    %115 = arith.mulf %110, %114 : vector<64x64xf32>
    %116 = arith.truncf %115 : vector<64x64xf32> to vector<64x64xbf16>
    %cst_55 = arith.constant dense<0.000000e+00> : vector<64x16xf32>
    %117 = tpu.matmul %116, %104, %cst_55 {dimension_numbers = #tpu.dot_dimension_numbers<[1], [0], [0], [1], [0, 0, 1, 1], [], []>} : vector<64x64xbf16>, vector<64x16xbf16>, vector<64x16xf32> -> vector<64x16xf32>
    %118 = arith.truncf %117 : vector<64x16xf32> to vector<64x16xbf16>
    %c16 = arith.constant 16 : index
    %c0_56 = arith.constant 0 : index
    %119 = vector.load %arg4[%c16, %c0_56] : memref<128x128xbf16, #tpu.memory_space<vmem>>, vector<16x128xbf16>
    %cst_57 = arith.constant dense<0.000000e+00> : vector<64x128xf32>
    %120 = tpu.matmul %118, %119, %cst_57 {dimension_numbers = #tpu.dot_dimension_numbers<[1], [0], [0], [1], [0, 0, 1, 1], [], []>} : vector<64x16xbf16>, vector<16x128xbf16>, vector<64x128xf32> -> vector<64x128xf32>
    %121 = arith.addf %101, %120 : vector<64x128xf32>
    %122 = vector.extract_strided_slice %7 {offsets = [0, 32], sizes = [64, 16], strides = [1, 1]} : vector<64x128xbf16> to vector<64x16xbf16>
    %123 = vector.extract_strided_slice %8 {offsets = [0, 32], sizes = [64, 16], strides = [1, 1]} : vector<64x256xbf16> to vector<64x16xbf16>
    %124 = vector.extract_strided_slice %8 {offsets = [0, 160], sizes = [64, 16], strides = [1, 1]} : vector<64x256xbf16> to vector<64x16xbf16>
    "tpu.trace_start"() <{level = 10 : i32, message = "qd,kd->qk"}> : () -> ()
    %cst_58 = arith.constant dense<0.000000e+00> : vector<64x64xf32>
    %125 = tpu.matmul %122, %123, %cst_58 {dimension_numbers = #tpu.dot_dimension_numbers<[1], [1], [0], [0], [0, 0, 1, 0], [], []>} : vector<64x16xbf16>, vector<64x16xbf16>, vector<64x64xf32> -> vector<64x64xf32>
    "tpu.trace_stop"() : () -> ()
    %cst_59 = arith.constant dense<0xFF800000> : vector<64xf32>
    %126 = vector.multi_reduction <maximumf>, %125, %cst_59 [1] : vector<64x64xf32> to vector<64xf32>
    %127 = vector.shape_cast %126 : vector<64xf32> to vector<64x1xf32>
    %128 = vector.broadcast %127 : vector<64x1xf32> to vector<64x64xf32>
    %129 = arith.subf %125, %128 : vector<64x64xf32>
    %130 = math.exp %129 : vector<64x64xf32>
    %cst_60 = arith.constant dense<0.000000e+00> : vector<64xf32>
    %131 = vector.multi_reduction <add>, %130, %cst_60 [1] : vector<64x64xf32> to vector<64xf32>
    %132 = vector.shape_cast %131 : vector<64xf32> to vector<64x1xf32>
    %133 = tpu.reciprocal %132 : vector<64x1xf32> -> vector<64x1xf32>
    %134 = vector.broadcast %133 : vector<64x1xf32> to vector<64x64xf32>
    %135 = arith.mulf %130, %134 : vector<64x64xf32>
    %136 = arith.truncf %135 : vector<64x64xf32> to vector<64x64xbf16>
    %cst_61 = arith.constant dense<0.000000e+00> : vector<64x16xf32>
    %137 = tpu.matmul %136, %124, %cst_61 {dimension_numbers = #tpu.dot_dimension_numbers<[1], [0], [0], [1], [0, 0, 1, 1], [], []>} : vector<64x64xbf16>, vector<64x16xbf16>, vector<64x16xf32> -> vector<64x16xf32>
    %138 = arith.truncf %137 : vector<64x16xf32> to vector<64x16xbf16>
    %c32 = arith.constant 32 : index
    %c0_62 = arith.constant 0 : index
    %139 = vector.load %arg4[%c32, %c0_62] : memref<128x128xbf16, #tpu.memory_space<vmem>>, vector<16x128xbf16>
    %cst_63 = arith.constant dense<0.000000e+00> : vector<64x128xf32>
    %140 = tpu.matmul %138, %139, %cst_63 {dimension_numbers = #tpu.dot_dimension_numbers<[1], [0], [0], [1], [0, 0, 1, 1], [], []>} : vector<64x16xbf16>, vector<16x128xbf16>, vector<64x128xf32> -> vector<64x128xf32>
    %141 = arith.addf %121, %140 : vector<64x128xf32>
    %142 = vector.extract_strided_slice %7 {offsets = [0, 48], sizes = [64, 16], strides = [1, 1]} : vector<64x128xbf16> to vector<64x16xbf16>
    %143 = vector.extract_strided_slice %8 {offsets = [0, 48], sizes = [64, 16], strides = [1, 1]} : vector<64x256xbf16> to vector<64x16xbf16>
    %144 = vector.extract_strided_slice %8 {offsets = [0, 176], sizes = [64, 16], strides = [1, 1]} : vector<64x256xbf16> to vector<64x16xbf16>
    "tpu.trace_start"() <{level = 10 : i32, message = "qd,kd->qk"}> : () -> ()
    %cst_64 = arith.constant dense<0.000000e+00> : vector<64x64xf32>
    %145 = tpu.matmul %142, %143, %cst_64 {dimension_numbers = #tpu.dot_dimension_numbers<[1], [1], [0], [0], [0, 0, 1, 0], [], []>} : vector<64x16xbf16>, vector<64x16xbf16>, vector<64x64xf32> -> vector<64x64xf32>
    "tpu.trace_stop"() : () -> ()
    %cst_65 = arith.constant dense<0xFF800000> : vector<64xf32>
    %146 = vector.multi_reduction <maximumf>, %145, %cst_65 [1] : vector<64x64xf32> to vector<64xf32>
    %147 = vector.shape_cast %146 : vector<64xf32> to vector<64x1xf32>
    %148 = vector.broadcast %147 : vector<64x1xf32> to vector<64x64xf32>
    %149 = arith.subf %145, %148 : vector<64x64xf32>
    %150 = math.exp %149 : vector<64x64xf32>
    %cst_66 = arith.constant dense<0.000000e+00> : vector<64xf32>
    %151 = vector.multi_reduction <add>, %150, %cst_66 [1] : vector<64x64xf32> to vector<64xf32>
    %152 = vector.shape_cast %151 : vector<64xf32> to vector<64x1xf32>
    %153 = tpu.reciprocal %152 : vector<64x1xf32> -> vector<64x1xf32>
    %154 = vector.broadcast %153 : vector<64x1xf32> to vector<64x64xf32>
    %155 = arith.mulf %150, %154 : vector<64x64xf32>
    %156 = arith.truncf %155 : vector<64x64xf32> to vector<64x64xbf16>
    %cst_67 = arith.constant dense<0.000000e+00> : vector<64x16xf32>
    %157 = tpu.matmul %156, %144, %cst_67 {dimension_numbers = #tpu.dot_dimension_numbers<[1], [0], [0], [1], [0, 0, 1, 1], [], []>} : vector<64x64xbf16>, vector<64x16xbf16>, vector<64x16xf32> -> vector<64x16xf32>
    %158 = arith.truncf %157 : vector<64x16xf32> to vector<64x16xbf16>
    %c48 = arith.constant 48 : index
    %c0_68 = arith.constant 0 : index
    %159 = vector.load %arg4[%c48, %c0_68] : memref<128x128xbf16, #tpu.memory_space<vmem>>, vector<16x128xbf16>
    %cst_69 = arith.constant dense<0.000000e+00> : vector<64x128xf32>
    %160 = tpu.matmul %158, %159, %cst_69 {dimension_numbers = #tpu.dot_dimension_numbers<[1], [0], [0], [1], [0, 0, 1, 1], [], []>} : vector<64x16xbf16>, vector<16x128xbf16>, vector<64x128xf32> -> vector<64x128xf32>
    %161 = arith.addf %141, %160 : vector<64x128xf32>
    %162 = vector.extract_strided_slice %7 {offsets = [0, 64], sizes = [64, 16], strides = [1, 1]} : vector<64x128xbf16> to vector<64x16xbf16>
    %163 = vector.extract_strided_slice %8 {offsets = [0, 64], sizes = [64, 16], strides = [1, 1]} : vector<64x256xbf16> to vector<64x16xbf16>
    %164 = vector.extract_strided_slice %8 {offsets = [0, 192], sizes = [64, 16], strides = [1, 1]} : vector<64x256xbf16> to vector<64x16xbf16>
    "tpu.trace_start"() <{level = 10 : i32, message = "qd,kd->qk"}> : () -> ()
    %cst_70 = arith.constant dense<0.000000e+00> : vector<64x64xf32>
    %165 = tpu.matmul %162, %163, %cst_70 {dimension_numbers = #tpu.dot_dimension_numbers<[1], [1], [0], [0], [0, 0, 1, 0], [], []>} : vector<64x16xbf16>, vector<64x16xbf16>, vector<64x64xf32> -> vector<64x64xf32>
    "tpu.trace_stop"() : () -> ()
    %cst_71 = arith.constant dense<0xFF800000> : vector<64xf32>
    %166 = vector.multi_reduction <maximumf>, %165, %cst_71 [1] : vector<64x64xf32> to vector<64xf32>
    %167 = vector.shape_cast %166 : vector<64xf32> to vector<64x1xf32>
    %168 = vector.broadcast %167 : vector<64x1xf32> to vector<64x64xf32>
    %169 = arith.subf %165, %168 : vector<64x64xf32>
    %170 = math.exp %169 : vector<64x64xf32>
    %cst_72 = arith.constant dense<0.000000e+00> : vector<64xf32>
    %171 = vector.multi_reduction <add>, %170, %cst_72 [1] : vector<64x64xf32> to vector<64xf32>
    %172 = vector.shape_cast %171 : vector<64xf32> to vector<64x1xf32>
    %173 = tpu.reciprocal %172 : vector<64x1xf32> -> vector<64x1xf32>
    %174 = vector.broadcast %173 : vector<64x1xf32> to vector<64x64xf32>
    %175 = arith.mulf %170, %174 : vector<64x64xf32>
    %176 = arith.truncf %175 : vector<64x64xf32> to vector<64x64xbf16>
    %cst_73 = arith.constant dense<0.000000e+00> : vector<64x16xf32>
    %177 = tpu.matmul %176, %164, %cst_73 {dimension_numbers = #tpu.dot_dimension_numbers<[1], [0], [0], [1], [0, 0, 1, 1], [], []>} : vector<64x64xbf16>, vector<64x16xbf16>, vector<64x16xf32> -> vector<64x16xf32>
    %178 = arith.truncf %177 : vector<64x16xf32> to vector<64x16xbf16>
    %c64 = arith.constant 64 : index
    %c0_74 = arith.constant 0 : index
    %179 = vector.load %arg4[%c64, %c0_74] : memref<128x128xbf16, #tpu.memory_space<vmem>>, vector<16x128xbf16>
    %cst_75 = arith.constant dense<0.000000e+00> : vector<64x128xf32>
    %180 = tpu.matmul %178, %179, %cst_75 {dimension_numbers = #tpu.dot_dimension_numbers<[1], [0], [0], [1], [0, 0, 1, 1], [], []>} : vector<64x16xbf16>, vector<16x128xbf16>, vector<64x128xf32> -> vector<64x128xf32>
    %181 = arith.addf %161, %180 : vector<64x128xf32>
    %182 = vector.extract_strided_slice %7 {offsets = [0, 80], sizes = [64, 16], strides = [1, 1]} : vector<64x128xbf16> to vector<64x16xbf16>
    %183 = vector.extract_strided_slice %8 {offsets = [0, 80], sizes = [64, 16], strides = [1, 1]} : vector<64x256xbf16> to vector<64x16xbf16>
    %184 = vector.extract_strided_slice %8 {offsets = [0, 208], sizes = [64, 16], strides = [1, 1]} : vector<64x256xbf16> to vector<64x16xbf16>
    "tpu.trace_start"() <{level = 10 : i32, message = "qd,kd->qk"}> : () -> ()
    %cst_76 = arith.constant dense<0.000000e+00> : vector<64x64xf32>
    %185 = tpu.matmul %182, %183, %cst_76 {dimension_numbers = #tpu.dot_dimension_numbers<[1], [1], [0], [0], [0, 0, 1, 0], [], []>} : vector<64x16xbf16>, vector<64x16xbf16>, vector<64x64xf32> -> vector<64x64xf32>
    "tpu.trace_stop"() : () -> ()
    %cst_77 = arith.constant dense<0xFF800000> : vector<64xf32>
    %186 = vector.multi_reduction <maximumf>, %185, %cst_77 [1] : vector<64x64xf32> to vector<64xf32>
    %187 = vector.shape_cast %186 : vector<64xf32> to vector<64x1xf32>
    %188 = vector.broadcast %187 : vector<64x1xf32> to vector<64x64xf32>
    %189 = arith.subf %185, %188 : vector<64x64xf32>
    %190 = math.exp %189 : vector<64x64xf32>
    %cst_78 = arith.constant dense<0.000000e+00> : vector<64xf32>
    %191 = vector.multi_reduction <add>, %190, %cst_78 [1] : vector<64x64xf32> to vector<64xf32>
    %192 = vector.shape_cast %191 : vector<64xf32> to vector<64x1xf32>
    %193 = tpu.reciprocal %192 : vector<64x1xf32> -> vector<64x1xf32>
    %194 = vector.broadcast %193 : vector<64x1xf32> to vector<64x64xf32>
    %195 = arith.mulf %190, %194 : vector<64x64xf32>
    %196 = arith.truncf %195 : vector<64x64xf32> to vector<64x64xbf16>
    %cst_79 = arith.constant dense<0.000000e+00> : vector<64x16xf32>
    %197 = tpu.matmul %196, %184, %cst_79 {dimension_numbers = #tpu.dot_dimension_numbers<[1], [0], [0], [1], [0, 0, 1, 1], [], []>} : vector<64x64xbf16>, vector<64x16xbf16>, vector<64x16xf32> -> vector<64x16xf32>
    %198 = arith.truncf %197 : vector<64x16xf32> to vector<64x16xbf16>
    %c80 = arith.constant 80 : index
    %c0_80 = arith.constant 0 : index
    %199 = vector.load %arg4[%c80, %c0_80] : memref<128x128xbf16, #tpu.memory_space<vmem>>, vector<16x128xbf16>
    %cst_81 = arith.constant dense<0.000000e+00> : vector<64x128xf32>
    %200 = tpu.matmul %198, %199, %cst_81 {dimension_numbers = #tpu.dot_dimension_numbers<[1], [0], [0], [1], [0, 0, 1, 1], [], []>} : vector<64x16xbf16>, vector<16x128xbf16>, vector<64x128xf32> -> vector<64x128xf32>
    %201 = arith.addf %181, %200 : vector<64x128xf32>
    %202 = vector.extract_strided_slice %7 {offsets = [0, 96], sizes = [64, 16], strides = [1, 1]} : vector<64x128xbf16> to vector<64x16xbf16>
    %203 = vector.extract_strided_slice %8 {offsets = [0, 96], sizes = [64, 16], strides = [1, 1]} : vector<64x256xbf16> to vector<64x16xbf16>
    %204 = vector.extract_strided_slice %8 {offsets = [0, 224], sizes = [64, 16], strides = [1, 1]} : vector<64x256xbf16> to vector<64x16xbf16>
    "tpu.trace_start"() <{level = 10 : i32, message = "qd,kd->qk"}> : () -> ()
    %cst_82 = arith.constant dense<0.000000e+00> : vector<64x64xf32>
    %205 = tpu.matmul %202, %203, %cst_82 {dimension_numbers = #tpu.dot_dimension_numbers<[1], [1], [0], [0], [0, 0, 1, 0], [], []>} : vector<64x16xbf16>, vector<64x16xbf16>, vector<64x64xf32> -> vector<64x64xf32>
    "tpu.trace_stop"() : () -> ()
    %cst_83 = arith.constant dense<0xFF800000> : vector<64xf32>
    %206 = vector.multi_reduction <maximumf>, %205, %cst_83 [1] : vector<64x64xf32> to vector<64xf32>
    %207 = vector.shape_cast %206 : vector<64xf32> to vector<64x1xf32>
    %208 = vector.broadcast %207 : vector<64x1xf32> to vector<64x64xf32>
    %209 = arith.subf %205, %208 : vector<64x64xf32>
    %210 = math.exp %209 : vector<64x64xf32>
    %cst_84 = arith.constant dense<0.000000e+00> : vector<64xf32>
    %211 = vector.multi_reduction <add>, %210, %cst_84 [1] : vector<64x64xf32> to vector<64xf32>
    %212 = vector.shape_cast %211 : vector<64xf32> to vector<64x1xf32>
    %213 = tpu.reciprocal %212 : vector<64x1xf32> -> vector<64x1xf32>
    %214 = vector.broadcast %213 : vector<64x1xf32> to vector<64x64xf32>
    %215 = arith.mulf %210, %214 : vector<64x64xf32>
    %216 = arith.truncf %215 : vector<64x64xf32> to vector<64x64xbf16>
    %cst_85 = arith.constant dense<0.000000e+00> : vector<64x16xf32>
    %217 = tpu.matmul %216, %204, %cst_85 {dimension_numbers = #tpu.dot_dimension_numbers<[1], [0], [0], [1], [0, 0, 1, 1], [], []>} : vector<64x64xbf16>, vector<64x16xbf16>, vector<64x16xf32> -> vector<64x16xf32>
    %218 = arith.truncf %217 : vector<64x16xf32> to vector<64x16xbf16>
    %c96 = arith.constant 96 : index
    %c0_86 = arith.constant 0 : index
    %219 = vector.load %arg4[%c96, %c0_86] : memref<128x128xbf16, #tpu.memory_space<vmem>>, vector<16x128xbf16>
    %cst_87 = arith.constant dense<0.000000e+00> : vector<64x128xf32>
    %220 = tpu.matmul %218, %219, %cst_87 {dimension_numbers = #tpu.dot_dimension_numbers<[1], [0], [0], [1], [0, 0, 1, 1], [], []>} : vector<64x16xbf16>, vector<16x128xbf16>, vector<64x128xf32> -> vector<64x128xf32>
    %221 = arith.addf %201, %220 : vector<64x128xf32>
    %222 = vector.extract_strided_slice %7 {offsets = [0, 112], sizes = [64, 16], strides = [1, 1]} : vector<64x128xbf16> to vector<64x16xbf16>
    %223 = vector.extract_strided_slice %8 {offsets = [0, 112], sizes = [64, 16], strides = [1, 1]} : vector<64x256xbf16> to vector<64x16xbf16>
    %224 = vector.extract_strided_slice %8 {offsets = [0, 240], sizes = [64, 16], strides = [1, 1]} : vector<64x256xbf16> to vector<64x16xbf16>
    "tpu.trace_start"() <{level = 10 : i32, message = "qd,kd->qk"}> : () -> ()
    %cst_88 = arith.constant dense<0.000000e+00> : vector<64x64xf32>
    %225 = tpu.matmul %222, %223, %cst_88 {dimension_numbers = #tpu.dot_dimension_numbers<[1], [1], [0], [0], [0, 0, 1, 0], [], []>} : vector<64x16xbf16>, vector<64x16xbf16>, vector<64x64xf32> -> vector<64x64xf32>
    "tpu.trace_stop"() : () -> ()
    %cst_89 = arith.constant dense<0xFF800000> : vector<64xf32>
    %226 = vector.multi_reduction <maximumf>, %225, %cst_89 [1] : vector<64x64xf32> to vector<64xf32>
    %227 = vector.shape_cast %226 : vector<64xf32> to vector<64x1xf32>
    %228 = vector.broadcast %227 : vector<64x1xf32> to vector<64x64xf32>
    %229 = arith.subf %225, %228 : vector<64x64xf32>
    %230 = math.exp %229 : vector<64x64xf32>
    %cst_90 = arith.constant dense<0.000000e+00> : vector<64xf32>
    %231 = vector.multi_reduction <add>, %230, %cst_90 [1] : vector<64x64xf32> to vector<64xf32>
    %232 = vector.shape_cast %231 : vector<64xf32> to vector<64x1xf32>
    %233 = tpu.reciprocal %232 : vector<64x1xf32> -> vector<64x1xf32>
    %234 = vector.broadcast %233 : vector<64x1xf32> to vector<64x64xf32>
    %235 = arith.mulf %230, %234 : vector<64x64xf32>
    %236 = arith.truncf %235 : vector<64x64xf32> to vector<64x64xbf16>
    %cst_91 = arith.constant dense<0.000000e+00> : vector<64x16xf32>
    %237 = tpu.matmul %236, %224, %cst_91 {dimension_numbers = #tpu.dot_dimension_numbers<[1], [0], [0], [1], [0, 0, 1, 1], [], []>} : vector<64x64xbf16>, vector<64x16xbf16>, vector<64x16xf32> -> vector<64x16xf32>
    %238 = arith.truncf %237 : vector<64x16xf32> to vector<64x16xbf16>
    %c112 = arith.constant 112 : index
    %c0_92 = arith.constant 0 : index
    %239 = vector.load %arg4[%c112, %c0_92] : memref<128x128xbf16, #tpu.memory_space<vmem>>, vector<16x128xbf16>
    %cst_93 = arith.constant dense<0.000000e+00> : vector<64x128xf32>
    %240 = tpu.matmul %238, %239, %cst_93 {dimension_numbers = #tpu.dot_dimension_numbers<[1], [0], [0], [1], [0, 0, 1, 1], [], []>} : vector<64x16xbf16>, vector<16x128xbf16>, vector<64x128xf32> -> vector<64x128xf32>
    %241 = arith.addf %221, %240 : vector<64x128xf32>
    %c0_94 = arith.constant 0 : index
    %c0_95 = arith.constant 0 : index
    %c0_96 = arith.constant 0 : index
    %242 = vector.load %arg8[%c0_94, %c0_95, %c0_96] : memref<1x64x128xf32, #tpu.memory_space<vmem>>, vector<1x64x128xf32>
    %243 = vector.shape_cast %242 : vector<1x64x128xf32> to vector<64x128xf32>
    %244 = vector.shape_cast %241 : vector<64x128xf32> to vector<1x64x128xf32>
    tpu.vector_store %arg8[%c0_94, %c0_95, %c0_96], %244 {strides = array<i32>} : memref<1x64x128xf32, #tpu.memory_space<vmem>>, vector<1x64x128xf32>,
    return
  }
  func.func @transform_0(%arg0: i32) -> (i32, i32, i32) {
    %c0_i32 = arith.constant 0 : i32
    %c0_i32_0 = arith.constant 0 : i32
    %c0_i32_1 = arith.constant 0 : i32
    return %arg0, %c0_i32, %c0_i32_0 : i32, i32, i32
  }
  func.func @transform_1(%arg0: i32) -> (i32, i32) {
    %c0_i32 = arith.constant 0 : i32
    %c0_i32_0 = arith.constant 0 : i32
    %c0_i32_1 = arith.constant 0 : i32
    return %c0_i32, %c0_i32_0 : i32, i32
  }
  func.func @transform_2(%arg0: i32) -> (i32, i32) {
    %c0_i32 = arith.constant 0 : i32
    %c0_i32_0 = arith.constant 0 : i32
    %c0_i32_1 = arith.constant 0 : i32
    return %c0_i32, %c0_i32_0 : i32, i32
  }
  func.func @transform_3(%arg0: i32) -> (i32, i32) {
    %c0_i32 = arith.constant 0 : i32
    %c0_i32_0 = arith.constant 0 : i32
    %c0_i32_1 = arith.constant 0 : i32
    return %c0_i32, %c0_i32_0 : i32, i32
  }
  func.func @transform_4(%arg0: i32) -> (i32, i32) {
    %c0_i32 = arith.constant 0 : i32
    %c0_i32_0 = arith.constant 0 : i32
    %c0_i32_1 = arith.constant 0 : i32
    return %c0_i32, %c0_i32_0 : i32, i32
  }
  func.func @transform_5(%arg0: i32) -> (i32, i32) {
    %c0_i32 = arith.constant 0 : i32
    %c0_i32_0 = arith.constant 0 : i32
    %c0_i32_1 = arith.constant 0 : i32
    return %c0_i32, %c0_i32_0 : i32, i32
  }
  func.func @transform_6(%arg0: i32) -> (i32, i32) {
    %c0_i32 = arith.constant 0 : i32
    %c0_i32_0 = arith.constant 0 : i32
    %c0_i32_1 = arith.constant 0 : i32
    return %c0_i32, %c0_i32_0 : i32, i32
  }
  func.func @transform_7(%arg0: i32) -> (i32, i32, i32) {
    %c0_i32 = arith.constant 0 : i32
    %c0_i32_0 = arith.constant 0 : i32
    %c0_i32_1 = arith.constant 0 : i32
    return %arg0, %c0_i32, %c0_i32_0 : i32, i32, i32
  }
}

</mosaic_0001>

<bundles_post_ra>
// kernel: attention_forward.1
= control target key start
LH: loop header
LB: loop body
LE: loop exit
PB: predicated region body
PF: predicated region fallthrough
CT: control target
= control target key end

     0   :  { %s7023_s0 = inlined_call_operand.vmem [shape: f32[2,64,128], index: 0, kind: input, shape index: {}]   ;;  %s7024_s1 = inlined_call_operand.vmem [shape: bf16[128,128], index: 1, kind: input, shape index: {}]   ;;  %s7025_s2 = inlined_call_operand.hbm [shape: bf16[128,256], index: 2, kind: input, shape index: {}]   ;;  %s7026_s3 = inlined_call_operand.hbm [shape: bf16[128,128], index: 3, kind: input, shape index: {}]   ;;  %s7027_s4 = inlined_call_operand.vmem [shape: f32[1,128], index: 4, kind: input, shape index: {}]   ;;  %s7028_s5 = inlined_call_operand.hbm [shape: f32[9,128], index: 5, kind: input, shape index: {}]   ;;  %s7029_s6 = inlined_call_operand.hbm [shape: f32[1,128], index: 6, kind: input, shape index: {}]   ;;  %s7030_s7 = inlined_call_operand.hbm [shape: f32[2,64,128], index: 7, kind: output, shape index: {}]  }
   0x1   :  { %7053 = sst [smem:[#allocation39_spill]] %s7025_s2 }
   0x2   :  { %7054 = sst [smem:[#allocation40_spill]] %s7026_s3 }
   0x3   :  { %12 = vsyncpa [#allocation4], 0 }
   0x4   :  { %13 = vsyncpa [#allocation7], 0 }
   0x5   :  { %14 = vsyncpa [#allocation10], 0 }
   0x6   :  { %15 = vsyncpa [#allocation5], 0 }
   0x7   :  { %17 = vsyncpa [#allocation5 + $0x1], 0  ;;  %s4997_s24 = smov 0   ;;  %s4999_s25 = smov 0  }
   0x8   :  { %s5001_s26 = smov 0   ;;  %s5003_s27 = smov 0  }
   0x9 LB: > { %7055 = sst [smem:[#allocation16_spill]] %s4933_s26  ;;  %s5018_s28 = sadd.s32 4294967295, %s4937_s27   ;;  %s4937_s27 = sphi %s5003_s27, %s7169_s27   ;;  %s4933_s26 = sphi %s5001_s26, %s7166_s26   ;;  %s4929_s25 = sphi %s4999_s25, %s7168_s25   ;;  %s4925_s24 = sphi %s4997_s24, %s7167_s24  }
   0xa   : > { %s4070_s29 = sadd.s32 4294967294, %s4937_s27   ;;  %s5022_s30 = sadd.s32 1, %s4937_s27  }
   0xb   : > { %s182_s8 = sadd.s32 1, %s4933_s26  ;;  %s179_s9 = ssub.s32 %s4937_s27, %s5022_s30 }
   0xc   : > { %p192_p0 = scmp.ne.s32.totalorder %s4933_s26, %s4929_s25  ;;  %p180_p1 = scmp.eq.s32.totalorder %s179_s9, 0 }
   0xd   : > { %p193_p2 = scmp.eq.s32.totalorder %s5018_s28, 1  ;;  %p198_p3 = scmp.ne.s32.totalorder %s4929_s25, %s4925_s24 }
   0xe   : > { %p199_p4 = scmp.eq.s32.totalorder %s4070_s29, 1  ;;  %p4071_p7 = scmp.ge.s32.totalorder %s4937_s27, 1 }
   0xf   : > { %s5033_s10 = scalar_select %p180_p1, %s4933_s26, %s182_s8  }
  0x10   : > { %p5035_p5 = por %p193_p2, %p192_p0  ;;  %p5039_p6 = por %p199_p4, %p198_p3 }
  0x11   : > { %7056 = sst [smem:[#allocation17_spill]] %s5033_s10  ;;  %p206_p8 = scmp.lt.s32.totalorder %s4937_s27, 3 }
  0x12   : > { %p4396_p9 = scmp.eq.s32.totalorder %s5018_s28, 0  ;;  %s7060_s3 = sld [smem:[#allocation40_spill]] }
  0x13   : > { %p5046_p10 = pnand %p4071_p7, %p206_p8  ;;  %s4939_s17 = smov [#allocation6]  }
  0x14   : > { %s236_s18 = sshll.u32 %s4939_s17, 4  ;;  %s7062_s2 = sld [smem:[#allocation39_spill]]  ;;  %s237_s18 = int_to_ptr.vmem [resolvable:$true] %s236_s18 }
  0x15   : > { %p4379_p11 = pneg %p5046_p10  ;;  %s4940_s23 = smov 64  }
  0x16   : > { %s4941_s29 = smov 4   ;;  %s4942_s8 = smov [#allocation3]  }
  0x17   : > { %p5057_p12 = pnand %p4396_p9, %p4379_p11  ;;  %s222_s9 = sshll.u32 %s4942_s8, 4  ;;  %s223_s9 = int_to_ptr.vmem [resolvable:$true] %s222_s9 }
  0x18   : > { %s234_s16 = sshll.u32 %s7060_s3, 4  ;;  %s4943_s14 = smov 128   ;;  %s235_s16 = int_to_ptr.hbm [resolvable:$true] %s234_s16 }
  0x19   : > { %4385 = dma.hbm_to_vmem [thread:$0]  (!%p5057_p12), %s235_s16, 1024, %s237_s18, [#allocation7], %s4940_s23, %s4940_s23, %s4941_s29  }
  0x1a   : > { %s220_s22 = sshll.u32 %s7062_s2, 4  ;;  %s4944_s15 = smov 8   ;;  %s221_s22 = int_to_ptr.hbm [resolvable:$true] %s220_s22 }
  0x1b   : > { %4382 = dma.hbm_to_vmem [thread:$0]  (!%p5057_p12), %s221_s22, 2048, %s223_s9, [#allocation4], %s4943_s14, %s4943_s14, %s4944_s15  }
  0x1c   : > { %s251_s20 = sshll.u32 %s7028_s5, 4  ;;  %s4945_s21 = smov [#allocation8]   ;;  %s252_s20 = int_to_ptr.hbm [resolvable:$true] %s251_s20 }
  0x1d   : > { %s253_s2 = sshll.u32 %s4945_s21, 4  ;;  %s266_s16 = sshll.u32 %s7029_s6, 4  ;;  %s254_s2 = int_to_ptr.vmem [resolvable:$true] %s253_s2  ;;  %s267_s16 = int_to_ptr.hbm [resolvable:$true] %s266_s16 }
  0x1e   : > { %4388 = dma.hbm_to_vmem [thread:$0]  (!%p5057_p12), %s252_s20, 256, %s254_s2, [#allocation7], %s4943_s14, %s4943_s14, %s4944_s15  }
  0x1f   : > { %s4946_s18 = smov [#allocation9]   ;;  %289 = sbr.rel (%p5046_p10) target bundleno = 3230 (0xc9e), region = 48 }
  0x20   : > { %s268_s23 = sshll.u32 %s4946_s18, 4  ;;  %s269_s23 = int_to_ptr.vmem [resolvable:$true] %s268_s23 }
  0x21   : > { %4391 = dma.hbm_to_vmem [thread:$0]  (!%p5057_p12), %s267_s16, 16, %s269_s23, [#allocation10]  }
  0x24   : > { %4908 = dma.done.wait (%p4396_p9), [#allocation4], 2048  }
  0x25   : > { %4910 = vsyncadd (%p4396_p9), [#allocation4], 4294965248 }
  0x26   : > { %4912 = dma.done.wait (%p4396_p9), [#allocation7], 1280  }
  0x27   : > { %4914 = vsyncadd (%p4396_p9), [#allocation7], 4294966016 }
  0x28   : > { %4916 = dma.done.wait (%p4396_p9), [#allocation10], 16  }
  0x29   : > { %4918 = vsyncadd (%p4396_p9), [#allocation10], 4294967280  ;;  %p337_p13 = scmp.lt.s32.totalorder %s5018_s28, 1  ;;  %v4322_v0 = vld [vmem:[%s7024_s1 + $0x38] sm:$0xff]  ;;  %v4337_v1 = vld [vmem:[#allocation3 + $0x74] sm:$0xf] }
  0x2a   : > { %v4177_v2 = vld [vmem:[#allocation3 + $0x78] sm:$0xf0]  ;;  %v4335_v4 = vld [vmem:[#allocation3 + $0x64] sm:$0xf]  ;;  %v4169_v5 = vld [vmem:[#allocation3 + $0x68] sm:$0xf0]  ;;  %419 = vmatpush.bf16.msra.mxu0 %v4322_v0 }
  0x2b   : > { %v4180_v3 = vor.u32 %v4337_v1, %v4177_v2  ;;  %v4321_v6 = vld [vmem:[%s7024_s1 + $0x30] sm:$0xff]  ;;  %s338_s13 = scalar_select %p337_p13, %s5018_s28, 1  ;;  %v4947_v7 = vmov 0.0   ;;  %v4172_v8 = vor.u32 %v4335_v4, %v4169_v5  ;;  %v4161_v10 = vld [vmem:[#allocation3 + $0x58] sm:$0xf0]  ;;  %v4320_v15 = vld [vmem:[%s7024_s1 + $0x28] sm:$0xff] }
  0x2c   : > { %620 = vst [vmem:[#allocation2 + $0x10] sm:$0xff] %v4947_v7  ;;  %v4333_v9 = vld [vmem:[#allocation3 + $0x54] sm:$0xf]  ;;  %v4175_v11 = vld [vmem:[#allocation3 + $0x70] sm:$0xf]  ;;  %v4319_v23 = vld [vmem:[%s7024_s1 + $0x20] sm:$0xff] }
  0x2d   : > { %573 = vmatpush.bf16.msra.mxu2 %v4180_v3  ;;  %622 = vst [vmem:[#allocation2 + $0x20] sm:$0xff] %v4947_v7  ;;  %v4338_v12 = vld [vmem:[#allocation3 + $0x74] sm:$0xf0]  ;;  %v4167_v14 = vld [vmem:[#allocation3 + $0x60] sm:$0xf]  ;;  %s4314_s29 = sshll.u32 %s338_s13, 6  ;;  %v4164_v17 = vor.u32 %v4333_v9, %v4161_v10 }
  0x2e   : > { %618 = vst [vmem:[#allocation2] sm:$0xff] %v4947_v7  ;;  %v5103_v13 = vor.u32 %v4338_v12, %v4175_v11  ;;  %420 = vmatpush.bf16.msra.mxu0 %v4321_v6  ;;  %v4336_v16 = vld [vmem:[#allocation3 + $0x64] sm:$0xf0]  ;;  %v4331_v18 = vld [vmem:[#allocation3 + $0x44] sm:$0xf]  ;;  %s5116_s14 = scalar_lea.vmem %s7023_s0, %s4314_s29  ;;  %v4318_v32 = vld [vmem:[%s7024_s1 + $0x18] sm:$0xff] }
  0x2f   : > { %624 = vst [vmem:[#allocation2 + $0x30] sm:$0xff] %v4947_v7  ;;  %v4153_v19 = vld [vmem:[#allocation3 + $0x48] sm:$0xf0]  ;;  %v5110_v20 = vor.u32 %v4336_v16, %v4167_v14  ;;  %v4159_v21 = vld [vmem:[#allocation3 + $0x50] sm:$0xf]  ;;  %v343_v30 = vld [vmem:[%s5116_s14] sm:$0xff] }
  0x30   : > { %4348 = vmatpush.bf16.msra.mxu1 %v5103_v13  ;;  %v4334_v22 = vld [vmem:[#allocation3 + $0x54] sm:$0xf0]  ;;  %626 = vst [vmem:[#allocation2 + $0x40] sm:$0xff] %v4947_v7  ;;  %v4329_v24 = vld [vmem:[#allocation3 + $0x34] sm:$0xf]  ;;  %v4156_v25 = vor.u32 %v4331_v18, %v4153_v19  ;;  %v344_v31 = vld [vmem:[%s5116_s14 + $0x8] sm:$0xff] }
  0x31   : > { %574 = vmatpush.bf16.msra.mxu2 %v4172_v8  ;;  %628 = vst [vmem:[#allocation2 + $0x50] sm:$0xff] %v4947_v7  ;;  %v4145_v26 = vld [vmem:[#allocation3 + $0x38] sm:$0xf0]  ;;  %v5123_v27 = vor.u32 %v4334_v22, %v4159_v21  ;;  %v4151_v28 = vld [vmem:[#allocation3 + $0x40] sm:$0xf]  ;;  %v4317_v39 = vld [vmem:[%s7024_s1 + $0x10] sm:$0xff]  ;;  %v351_v61 = vpack.c.bf16 %v344_v31, %v343_v30 }
  0x32   : > { %421 = vmatpush.bf16.msra.mxu0 %v4320_v15  ;;  %621 = vst [vmem:[#allocation2 + $0x18] sm:$0x3] %v4947_v7  ;;  %v4332_v29 = vld [vmem:[#allocation3 + $0x44] sm:$0xf0]  ;;  %v4327_v33 = vld [vmem:[#allocation3 + $0x24] sm:$0xf]  ;;  %v4148_v34 = vor.u32 %v4329_v24, %v4145_v26 }
  0x33   : > { %623 = vst [vmem:[#allocation2 + $0x28] sm:$0x3] %v4947_v7  ;;  %v4137_v35 = vld [vmem:[#allocation3 + $0x28] sm:$0xf0]  ;;  %v5133_v36 = vor.u32 %v4332_v29, %v4151_v28  ;;  %v4143_v37 = vld [vmem:[#allocation3 + $0x30] sm:$0xf] }
  0x34   : > { %4349 = vmatpush.bf16.msra.mxu1 %v5110_v20  ;;  %639 = vst [vmem:[#allocation2 + $0x11] sm:$0xff] %v343_v30  ;;  %v4330_v38 = vld [vmem:[#allocation3 + $0x34] sm:$0xf0]  ;;  %v4140_v40 = vor.u32 %v4327_v33, %v4137_v35  ;;  %v4325_v41 = vld [vmem:[#allocation3 + $0x14] sm:$0xf]  ;;  %v4316_v46 = vld [vmem:[%s7024_s1 + $0x8] sm:$0xff] }
  0x35   : > { %575 = vmatpush.bf16.msra.mxu2 %v4164_v17  ;;  %640 = vst [vmem:[#allocation2 + $0x21] sm:$0xff] %v344_v31  ;;  %v4129_v42 = vld [vmem:[#allocation3 + $0x18] sm:$0xf0]  ;;  %v4144_v43 = vor.u32 %v4330_v38, %v4143_v37  ;;  %v4135_v44 = vld [vmem:[#allocation3 + $0x20] sm:$0xf]  ;;  %v345_v54 = vld [vmem:[%s5116_s14 + $0x10] sm:$0xff] }
  0x36   : > { %422 = vmatpush.bf16.msra.mxu0 %v4319_v23  ;;  %619 = vst [vmem:[#allocation2 + $0x8] sm:$0x3] %v4947_v7  ;;  %v4328_v45 = vld [vmem:[#allocation3 + $0x24] sm:$0xf0]  ;;  %v4132_v47 = vor.u32 %v4325_v41, %v4129_v42  ;;  %v4323_v48 = vld [vmem:[#allocation3 + $0x4] sm:$0xf] }
  0x37   : > { %625 = vst [vmem:[#allocation2 + $0x38] sm:$0x3] %v4947_v7  ;;  %v4121_v49 = vld [vmem:[#allocation3 + $0x8] sm:$0xf0]  ;;  %v4136_v50 = vor.u32 %v4328_v45, %v4135_v44  ;;  %v4127_v51 = vld [vmem:[#allocation3 + $0x10] sm:$0xf] }
  0x38   : > { %4350 = vmatpush.bf16.msra.mxu1 %v5123_v27  ;;  %627 = vst [vmem:[#allocation2 + $0x48] sm:$0x3] %v4947_v7  ;;  %v4326_v52 = vld [vmem:[#allocation3 + $0x14] sm:$0xf0]  ;;  %v4315_v53 = vld [vmem:[%s7024_s1] sm:$0xff]  ;;  %v4124_v55 = vor.u32 %v4323_v48, %v4121_v49  ;;  %v348_v62 = vld [vmem:[%s5116_s14 + $0x28] sm:$0xff] }
  0x39   : > { %576 = vmatpush.bf16.msra.mxu2 %v4156_v25  ;;  %629 = vst [vmem:[#allocation2 + $0x58] sm:$0x3] %v4947_v7  ;;  %v4128_v56 = vor.u32 %v4326_v52, %v4127_v51  ;;  %v346_v57 = vld [vmem:[%s5116_s14 + $0x18] sm:$0xff]  ;;  %v4119_v58 = vld [vmem:[#allocation3] sm:$0xf]  ;;  %v349_v1 = vld [vmem:[%s5116_s14 + $0x30] sm:$0xff] }
  0x3a   : > { %423 = vmatpush.bf16.msra.mxu0 %v4318_v32  ;;  %630 = vst [vmem:[#allocation2 + $0x60] sm:$0xff] %v4947_v7  ;;  %v4324_v59 = vld [vmem:[#allocation3 + $0x4] sm:$0xf0]  ;;  %v347_v60 = vld [vmem:[%s5116_s14 + $0x20] sm:$0xff]  ;;  %v352_v0 = vpack.c.bf16 %v346_v57, %v345_v54  ;;  %v350_v2 = vld [vmem:[%s5116_s14 + $0x38] sm:$0xff]  ;;  %s4948_s10 = smov 112  }
  0x3b   : > { %631 = vst [vmem:[#allocation2 + $0x68] sm:$0x3] %v4947_v7  ;;  %v4120_v63 = vor.u32 %v4324_v59, %v4119_v58  ;;  %v353_v3 = vpack.c.bf16 %v348_v62, %v347_v60  ;;  %v354_v4 = vpack.c.bf16 %v350_v2, %v349_v1  ;;  %vm921_vm0 = vcmask 130048   ;;  %s4949_s13 = smov 96   ;;  %s4950_s19 = smov 80  }
  0x3c   : > { %4351 = vmatpush.bf16.msra.mxu1 %v5133_v36  ;;  %632 = vst [vmem:[#allocation2 + $0x70] sm:$0xff] %v4947_v7  ;;  %vm975_vm1 = vcmask 523264   ;;  %s4951_s8 = smov 64   ;;  %s4952_s9 = smov 48  }
  0x3d   : > { %577 = vmatpush.bf16.msra.mxu2 %v4148_v34  ;;  %633 = vst [vmem:[#allocation2 + $0x78] sm:$0x3] %v4947_v7  ;;  %s4953_s14 = smov 32   ;;  %s4954_s15 = smov 16  }
  0x3e   : > { %424 = vmatpush.bf16.msra.mxu0 %v4317_v39  ;;  %634 = vst [vmem:[#allocation2 + $0x80] sm:$0xff] %v4947_v7  ;;  %s334_s17 = sand.u32 1, %s4929_s25   ;;  %s4347_s16 = sshll.u32 %s5018_s28, 6 }
  0x3f   : > { %635 = vst [vmem:[#allocation2 + $0x88] sm:$0x3] %v4947_v7  ;;  %s4082_s20 = sshll.u32 %s334_s17, 6  ;;  %s3963_s2 = scalar_lea.hbm %s7030_s7, %s4347_s16 }
  0x40   : > { %4352 = vmatpush.bf16.msra.mxu1 %v4144_v43  ;;  %636 = vst [vmem:[#allocation2 + $0x90] sm:$0xff] %v4947_v7  ;;  %s6972_s21 = scalar_lea.vmem [#allocation11], %s4082_s20  ;;  %s3966_s26 = sshll.u32 %s3963_s2, 4  ;;  %s3967_s26 = int_to_ptr.hbm [resolvable:$true] %s3966_s26 }
  0x41   : > { %578 = vmatpush.bf16.msra.mxu2 %v4140_v40  ;;  %637 = vst [vmem:[#allocation2 + $0x98] sm:$0x3] %v4947_v7  ;;  %s3964_s3 = sshll.u32 %s6972_s21, 4  ;;  %s4877_s28 = sshra.s32 %s3967_s26, 4  ;;  %s3965_s3 = int_to_ptr.vmem [resolvable:$true] %s3964_s3  ;;  %s4878_s28 = int_to_ptr.hbm [resolvable:$true] %s4877_s28 }
  0x42   : > { %425 = vmatpush.bf16.msra.mxu0 %v4316_v46  ;;  %641 = vst [vmem:[#allocation2 + $0x31] sm:$0xff] %v345_v54  ;;  %s4883_s29 = scalar_lea.hbm %s7030_s7, 128  ;;  %p4884_p3 = scmp.lt.s32.totalorder %s4878_s28, %s7030_s7 }
  0x43   : > { %642 = vst [vmem:[#allocation2 + $0x41] sm:$0xff] %v346_v57 }
  0x44   : > { %4353 = vmatpush.bf16.msra.mxu1 %v4136_v50  ;;  %643 = vst [vmem:[#allocation2 + $0x51] sm:$0xff] %v347_v60 }
  0x45   : > { %579 = vmatpush.bf16.msra.mxu2 %v4132_v47  ;;  %644 = vst [vmem:[#allocation2 + $0x61] sm:$0xff] %v348_v62 }
  0x46   : > { %426 = vmatpush.bf16.msra.mxu0 %v4315_v53  ;;  %645 = vst [vmem:[#allocation2 + $0x71] sm:$0xff] %v349_v1 }
  0x47   : > { %646 = vst [vmem:[#allocation2 + $0x81] sm:$0xff] %v350_v2 }
  0x48   : > { %4354 = vmatpush.bf16.msra.mxu1 %v4128_v56 }
  0x49   : > { %580 = vmatpush.bf16.msra.mxu2 %v4124_v55  ;;  %427 = vmatmul.bf16.vlgmr.msra.gmra.mxu0 %v351_v61 }
  0x4a   : > { %544 = vmatpush.bf16.msrb.mxu0 %v5103_v13 }
  0x4c   : > { %581 = vmatmul.bf16.vlgmr.msra.gmra.mxu2 %v351_v61  ;;  %4355 = vmatpush.bf16.msra.mxu1 %v4120_v63 }
  0x4e   : > { %545 = vmatpush.bf16.msrb.mxu0 %v5110_v20 }
  0x4f   : > { %557 = vmatmul.bf16.vlgmr.msra.gmra.mxu1 %v352_v0 }
  0x52   : > { %546 = vmatpush.bf16.msrb.mxu0 %v5123_v27 }
  0x56   : > { %547 = vmatpush.bf16.msrb.mxu0 %v5133_v36 }
  0x59   : > { %432 = vmatmul.bf16.gmra.mxu0 %v352_v0 }
  0x5a   : > { %548 = vmatpush.bf16.msrb.mxu0 %v4144_v43 }
  0x5c   : > { %586 = vmatmul.bf16.gmra.mxu2 %v352_v0 }
  0x5e   : > { %549 = vmatpush.bf16.msrb.mxu0 %v4136_v50 }
  0x5f   : > { %562 = vmatmul.bf16.gmra.mxu1 %v353_v3 }
  0x62   : > { %550 = vmatpush.bf16.msrb.mxu0 %v4128_v56 }
  0x66   : > { %551 = vmatpush.bf16.msrb.mxu0 %v4120_v63 }
  0x69   : > { %437 = vmatmul.bf16.gmra.mxu0 %v353_v3 }
  0x6c   : > { %591 = vmatmul.bf16.gmra.mxu2 %v353_v3 }
  0x6f   : > { %567 = vmatmul.bf16.gmra.mxu1 %v354_v4 }
  0x79   : > { %442 = vmatmul.bf16.gmra.mxu0 %v354_v4 }
  0x7c   : > { %596 = vmatmul.bf16.gmra.mxu2 %v354_v4 }
  0x89   : > { %552 = vmatmul.bf16.vlgmr.msrb.gmra.mxu0 %v351_v61 }
  0xc6   : > { %v428_v5 = vpop.f32.mrf.mxu0 }
  0xc7   : > { %v602_v6 = vpack.c.bf16 %v428_v5, %v428_v5 }
  0xc9   : > { %v889_v9 = vunpack.c.l.b16 %v602_v6 }
  0xcc   : > { %v558_v13 = vpop.f32.mrf.mxu1 }
  0xce   : > { %v430_v8 = vpop.f32.mrf.mxu0 }
  0xcf   : > { %v582_v7 = vpop.f32.mrf.mxu2  ;;  %v603_v10 = vpack.c.bf16 %v430_v8, %v430_v8 }
  0xd1   : > { %v890_v11 = vunpack.c.l.b16 %v603_v10 }
  0xd3   : > { %v5167_v12 = vpack.c.b16 %v890_v11, %v889_v9 }
  0xd4   : > { %v560_v17 = vpop.f32.mrf.mxu1 }
  0xd5   : > { %1290 = vrot.lane.b32.xlu2 %v5167_v12, %s4948_s10 }
  0xd6   : > { %v433_v15 = vpop.f32.mrf.mxu0 }
  0xd7   : > { %v584_v14 = vpop.f32.mrf.mxu2  ;;  %v604_v16 = vpack.c.bf16 %v433_v15, %v433_v15 }
  0xd9   : > { %v891_v20 = vunpack.c.l.b16 %v604_v16 }
  0xdc   : > { %v563_v28 = vpop.f32.mrf.mxu1 }
  0xde   : > { %v435_v19 = vpop.f32.mrf.mxu0 }
  0xdf   : > { %v587_v18 = vpop.f32.mrf.mxu2  ;;  %v605_v21 = vpack.c.bf16 %v435_v19, %v435_v19 }
  0xe0   : > { %v612_v24 = vpack.c.bf16 %v587_v18, %v558_v13 }
  0xe1   : > { %v892_v22 = vunpack.c.l.b16 %v605_v21 }
  0xe2   : > { %v911_v29 = vunpack.c.l.b16 %v612_v24  ;;  %v1174_v63 = vunpack.c.h.b16 %v612_v24 }
  0xe3   : > { %v5171_v23 = vpack.c.b16 %v892_v22, %v891_v20 }
  0xe4   : > { %v565_v34 = vpop.f32.mrf.mxu1 }
  0xe5   : > { %1292 = vrot.lane.b32.xlu2 %v5171_v23, %s4948_s10 }
  0xe6   : > { %v5175_v27 = vpop.f32.mrf.mxu0 }
  0xe7   : > { %v589_v25 = vpop.f32.mrf.mxu2  ;;  %v606_v11 = vpack.c.bf16 %v5175_v27, %v5175_v27 }
  0xe8   : > { %v613_v26 = vpack.c.bf16 %v589_v25, %v560_v17 }
  0xea   : > { %v912_v30 = vunpack.c.l.b16 %v613_v26  ;;  %v1175_v58 = vunpack.c.h.b16 %v613_v26 }
  0xec   : > { %v5177_v31 = vpack.c.b16 %v912_v30, %v911_v29  ;;  %v568_v37 = vpop.f32.mrf.mxu1  ;;  %v5195_v3 = vpack.c.b16 %v1175_v58, %v1174_v63 }
  0xee   : > { %1300 = vrot.lane.b32.xlu1 %v5177_v31, %s4948_s10  ;;  %v440_v33 = vpop.f32.mrf.mxu0  ;;  %7064 = vst [vmem:[#allocation19_spill] sm:$0xff] %v5195_v3  ;;  %v938_v9 = vsel %vm921_vm0, %v5177_v31, 0 }
  0xef   : > { %v592_v32 = vpop.f32.mrf.mxu2  ;;  %v607_v13 = vpack.c.bf16 %v440_v33, %v440_v33 }
  0xf0   : > { %v614_v46 = vpack.c.bf16 %v592_v32, %v563_v28 }
  0xf1   : > { %v894_v15 = vunpack.c.l.b16 %v607_v13 }
  0xf2   : > { %v1176_v54 = vunpack.c.h.b16 %v614_v46  ;;  %v913_v59 = vunpack.c.l.b16 %v614_v46 }
  0xf4   : > { %v570_v41 = vpop.f32.mrf.mxu1 }
  0xf6   : > { %v443_v36 = vpop.f32.mrf.mxu0 }
  0xf7   : > { %v594_v35 = vpop.f32.mrf.mxu2  ;;  %v608_v17 = vpack.c.bf16 %v443_v36, %v443_v36 }
  0xf8   : > { %v615_v43 = vpack.c.bf16 %v594_v35, %v565_v34 }
  0xf9   : > { %v895_v19 = vunpack.c.l.b16 %v608_v17 }
  0xfa   : > { %v1177_v51 = vunpack.c.h.b16 %v615_v43  ;;  %v914_v55 = vunpack.c.l.b16 %v615_v43 }
  0xfc   : > { %v5190_v60 = vpack.c.b16 %v1177_v51, %v1176_v54  ;;  %v5192_v0 = vpack.c.b16 %v914_v55, %v913_v59 }
  0xfe   : > { %v445_v39 = vpop.f32.mrf.mxu0  ;;  %7063 = vst [vmem:[#allocation18_spill] sm:$0xff] %v5190_v60 }
  0xff   : > { %v597_v38 = vpop.f32.mrf.mxu2  ;;  %v609_v18 = vpack.c.bf16 %v445_v39, %v445_v39 }
 0x100   : > { %v616_v40 = vpack.c.bf16 %v597_v38, %v568_v37 }
 0x101   : > { %v896_v20 = vunpack.c.l.b16 %v609_v18 }
 0x102   : > { %v915_v47 = vunpack.c.l.b16 %v616_v40  ;;  %v1178_v48 = vunpack.c.h.b16 %v616_v40 }
 0x103   : > { %v5223_v21 = vpack.c.b16 %v896_v20, %v895_v19 }
 0x106   : > { %v553_v45 = vpop.f32.mrf.mxu0 }
 0x107   : > { %v599_v42 = vpop.f32.mrf.mxu2  ;;  %v610_v57 = vpack.c.bf16 %v582_v7, %v553_v45  ;;  %v941_v7 = vsel %vm921_vm0, %v5192_v0, 0 }
 0x108   : > { %v617_v44 = vpack.c.bf16 %v599_v42, %v570_v41 }
 0x109   : > { %v909_v1 = vunpack.c.l.b16 %v610_v57  ;;  %v1172_v6 = vunpack.c.h.b16 %v610_v57 }
 0x10a   : > { %v916_v49 = vunpack.c.l.b16 %v617_v44  ;;  %v1179_v50 = vunpack.c.h.b16 %v617_v44 }
 0x10c   : > { %v5181_v52 = vpack.c.b16 %v916_v49, %v915_v47  ;;  %v5183_v53 = vpack.c.b16 %v1179_v50, %v1178_v48 }
 0x10e   : > { %1304 = vrot.lane.b32.xlu0 %v5181_v52, %s4948_s10  ;;  %1204 = vmatpush.bf16.msra.mxu0 %v5183_v53  ;;  %v944_v56 = vsel %vm921_vm0, %v5181_v52, 0  ;;  %v555_v61 = vpop.f32.mrf.mxu0 }
 0x10f   : > { %950 = vmatpush.bf16.xpose.msra.mxu3 %v944_v56  ;;  %v611_v62 = vpack.c.bf16 %v584_v14, %v555_v61  ;;  %v893_v14 = vunpack.c.l.b16 %v606_v11 }
 0x111   : > { %v910_v2 = vunpack.c.l.b16 %v611_v62  ;;  %v1173_v4 = vunpack.c.h.b16 %v611_v62  ;;  %v5219_v16 = vpack.c.b16 %v894_v15, %v893_v14 }
 0x112   : > { %1205 = vmatpush.bf16.msra.mxu0 %v5190_v60 }
 0x113   : > { %v5197_v5 = vpack.c.b16 %v910_v2, %v909_v1  ;;  %v5206_v8 = vpack.c.b16 %v1173_v4, %v1172_v6 }
 0x115   : > { %1298 = vrot.lane.b32.xlu1 %v5197_v5, %s4948_s10  ;;  %7065 = vst [vmem:[#allocation20_spill] sm:$0xff] %v5206_v8  ;;  %v935_v10 = vsel %vm921_vm0, %v5197_v5, 0 }
 0x116   : > { %1302 = vrot.lane.b32.xlu0 %v5192_v0, %s4948_s10  ;;  %1206 = vmatpush.bf16.msra.mxu0 %v5195_v3 }
 0x117   : > { %951 = vmatpush.bf16.xpose.msra.mxu3 %v941_v7 }
 0x11a   : > { %1207 = vmatpush.bf16.msra.mxu0 %v5206_v8 }
 0x11f   : > { %952 = vmatpush.bf16.xpose.msra.mxu3 %v938_v9 }
 0x127   : > { %953 = vmatpush.bf16.xpose.msra.mxu3 %v935_v10 }
 0x12e   : > { %4181 = vmatmul.msk.bf16.vlgmr.msra.gmra.mxu3 %vm921_vm0, %v5167_v12 }
 0x12f   : > { %v1291_v32 = vpop.permute.xlu2 %1290 }
 0x13e   : > { %4182 = vmatmul.msk.bf16.gmra.mxu3 %vm921_vm0, %v5171_v23 }
 0x13f   : > { %v1293_v33 = vpop.permute.xlu2 %1292 }
 0x14e   : > { %4183 = vmatmul.msk.bf16.gmra.mxu3 %vm921_vm0, %v5219_v16 }
 0x15e   : > { %4184 = vmatmul.msk.bf16.gmra.mxu3 %vm921_vm0, %v5223_v21 }
 0x160   : > { %v1301_v27 = vpop.permute.xlu1 %1300 }
 0x161   : > { %v1322_v28 = vsel %vm921_vm0, %v1301_v27, 0 }
 0x180   : > { %v1305_v22 = vpop.permute.xlu0 %1304 }
 0x181   : > { %v1328_v24 = vsel %vm921_vm0, %v1305_v22, 0 }
 0x182   : > { %1334 = vmatpush.bf16.xpose.msrb.mxu2 %v1328_v24  ;;  %4356 = vmatpush.bf16.xpose.msrb.mxu3 %v1328_v24 }
 0x187   : > { %v1299_v29 = vpop.permute.xlu1 %1298 }
 0x188   : > { %v1303_v25 = vpop.permute.xlu0 %1302  ;;  %v1319_v30 = vsel %vm921_vm0, %v1299_v29, 0 }
 0x189   : > { %v1325_v26 = vsel %vm921_vm0, %v1303_v25, 0 }
 0x18a   : > { %1335 = vmatpush.bf16.xpose.msrb.mxu2 %v1325_v26  ;;  %4357 = vmatpush.bf16.xpose.msrb.mxu3 %v1325_v26 }
 0x192   : > { %1336 = vmatpush.bf16.xpose.msrb.mxu2 %v1322_v28  ;;  %4358 = vmatpush.bf16.xpose.msrb.mxu3 %v1322_v28 }
 0x19a   : > { %1337 = vmatpush.bf16.xpose.msrb.mxu2 %v1319_v30  ;;  %4359 = vmatpush.bf16.xpose.msrb.mxu3 %v1319_v30 }
 0x1a1   : > { %4197 = vmatmul.msk.bf16.vlgmr.msrb.gmra.mxu2 %vm921_vm0, %v1291_v32 }
 0x1b1   : > { %v955_v34 = vpop.f32.mrf.mxu3  ;;  %4198 = vmatmul.msk.bf16.gmra.mxu2 %vm921_vm0, %v1293_v33 }
 0x1b2   : > { %v976_v35 = vsel %vm975_vm1, %v955_v34, -inf }
 0x1b3   : > { %977 = vmax.xlane.f32.xlu0 %v976_v35 }
 0x1b9   : > { %v957_v36 = vpop.f32.mrf.mxu3 }
 0x1ba   : > { %v979_v37 = vsel %vm975_vm1, %v957_v36, -inf }
 0x1bb   : > { %980 = vmax.xlane.f32.xlu1 %v979_v37 }
 0x1c1   : > { %v960_v38 = vpop.f32.mrf.mxu3 }
 0x1c2   : > { %v982_v39 = vsel %vm975_vm1, %v960_v38, -inf }
 0x1c3   : > { %983 = vmax.xlane.f32.xlu2 %v982_v39 }
 0x1c9   : > { %v962_v40 = vpop.f32.mrf.mxu3 }
 0x1ca   : > { %v985_v41 = vsel %vm975_vm1, %v962_v40, -inf }
 0x1cb   : > { %986 = vmax.xlane.f32.xlu2 %v985_v41 }
 0x1d1   : > { %v965_v42 = vpop.f32.mrf.mxu3 }
 0x1d2   : > { %v988_v43 = vsel %vm975_vm1, %v965_v42, -inf }
 0x1d3   : > { %989 = vmax.xlane.f32.xlu0 %v988_v43 }
 0x1d9   : > { %v967_v44 = vpop.f32.mrf.mxu3 }
 0x1da   : > { %v991_v45 = vsel %vm975_vm1, %v967_v44, -inf }
 0x1db   : > { %992 = vmax.xlane.f32.xlu1 %v991_v45 }
 0x1e1   : > { %v5239_v46 = vpop.f32.mrf.mxu3 }
 0x1e2   : > { %v994_v47 = vsel %vm975_vm1, %v5239_v46, -inf }
 0x1e3   : > { %995 = vmax.xlane.f32.xlu1 %v994_v47 }
 0x1e9   : > { %v972_v48 = vpop.f32.mrf.mxu3 }
 0x1ea   : > { %v997_v49 = vsel %vm975_vm1, %v972_v48, -inf }
 0x1eb   : > { %998 = vmax.xlane.f32.xlu2 %v997_v49 }
 0x224   : > { %v5244_v50 = vpop.f32.mrf.mxu2 }
 0x225   : > { %v1359_v51 = vsel %vm975_vm1, %v5244_v50, -inf }
 0x226   : > { %v978_v54 = vpop.xlane.xlu0 %977  ;;  %1360 = vmax.xlane.f32.xlu2 %v1359_v51 }
 0x227   : > { %v1000_v55 = vsub.f32 %v955_v34, %v978_v54 }
 0x229   : > { %v1008_v56 = vmul.f32 1.442695, %v1000_v55 }
 0x22b   : > { %4456 = vpow2.f32 %v1008_v56 }
 0x22c   : > { %v5248_v57 = vpop.f32.mrf.mxu2 }
 0x22d   : > { %v1362_v58 = vsel %vm975_vm1, %v5248_v57, -inf }
 0x22e   : > { %v981_v59 = vpop.xlane.xlu1 %980  ;;  %1363 = vmax.xlane.f32.xlu0 %v1362_v58 }
 0x22f   : > { %v1001_v61 = vsub.f32 %v957_v36, %v981_v59 }
 0x231   : > { %v5252_v62 = vpop.eup %4456  ;;  %v1010_v63 = vmul.f32 1.442695, %v1001_v61 }
 0x232   : > { %v1024_v1 = vsel %vm975_vm1, %v5252_v62, 0.0 }
 0x233   : > { %1025 = vadd.xlane.f32.xlu2 %v1024_v1  ;;  %4458 = vpow2.f32 %v1010_v63 }
 0x234   : > { %v5256_v2 = vpop.f32.mrf.mxu2 }
 0x235   : > { %v1365_v4 = vsel %vm975_vm1, %v5256_v2, -inf }
 0x236   : > { %v984_v6 = vpop.xlane.xlu2 %983  ;;  %1366 = vmax.xlane.f32.xlu0 %v1365_v4 }
 0x237   : > { %v1002_v7 = vsub.f32 %v960_v38, %v984_v6 }
 0x239   : > { %v1012_v9 = vmul.f32 1.442695, %v1002_v7  ;;  %v5260_v10 = vpop.eup %4458 }
 0x23a   : > { %v1027_v13 = vsel %vm975_vm1, %v5260_v10, 0.0 }
 0x23b   : > { %4460 = vpow2.f32 %v1012_v9 }
 0x23c   : > { %v5262_v11 = vpop.f32.mrf.mxu2 }
 0x23d   : > { %v1368_v14 = vsel %vm975_vm1, %v5262_v11, -inf }
 0x23e   : > { %v987_v15 = vpop.xlane.xlu2 %986  ;;  %1028 = vadd.xlane.f32.xlu0 %v1027_v13  ;;  %1369 = vmax.xlane.f32.xlu1 %v1368_v14 }
 0x23f   : > { %v1003_v17 = vsub.f32 %v962_v40, %v987_v15 }
 0x241   : > { %v1014_v18 = vmul.f32 1.442695, %v1003_v17  ;;  %v5268_v19 = vpop.eup %4460 }
 0x242   : > { %v1030_v20 = vsel %vm975_vm1, %v5268_v19, 0.0 }
 0x243   : > { %4462 = vpow2.f32 %v1014_v18 }
 0x246   : > { %v990_v22 = vpop.xlane.xlu0 %989  ;;  %1031 = vadd.xlane.f32.xlu1 %v1030_v20 }
 0x247   : > { %v1004_v24 = vsub.f32 %v965_v42, %v990_v22 }
 0x249   : > { %v5272_v25 = vpop.eup %4462  ;;  %v1016_v26 = vmul.f32 1.442695, %v1004_v24 }
 0x24a   : > { %v1033_v27 = vsel %vm975_vm1, %v5272_v25, 0.0 }
 0x24b   : > { %4464 = vpow2.f32 %v1016_v26  ;;  %1034 = vadd.xlane.f32.xlu2 %v1033_v27 }
 0x24e   : > { %v993_v28 = vpop.xlane.xlu1 %992 }
 0x24f   : > { %v1005_v29 = vsub.f32 %v967_v44, %v993_v28 }
 0x251   : > { %v5276_v30 = vpop.eup %4464  ;;  %v1018_v32 = vmul.f32 1.442695, %v1005_v29 }
 0x252   : > { %v1036_v33 = vsel %vm975_vm1, %v5276_v30, 0.0 }
 0x253   : > { %4466 = vpow2.f32 %v1018_v32  ;;  %1037 = vadd.xlane.f32.xlu0 %v1036_v33 }
 0x256   : > { %v996_v39 = vpop.xlane.xlu1 %995 }
 0x257   : > { %v1006_v40 = vsub.f32 %v5239_v46, %v996_v39 }
 0x259   : > { %v5280_v34 = vpop.eup %4466  ;;  %v1020_v42 = vmul.f32 1.442695, %v1006_v40 }
 0x25a   : > { %v1039_v35 = vsel %vm975_vm1, %v5280_v34, 0.0 }
 0x25b   : > { %1040 = vadd.xlane.f32.xlu1 %v1039_v35 }
 0x25e   : > { %v999_v36 = vpop.xlane.xlu2 %998 }
 0x25f   : > { %v1007_v37 = vsub.f32 %v972_v48, %v999_v36 }
 0x261   : > { %v1022_v38 = vmul.f32 1.442695, %v1007_v37 }
 0x263   : > { %1561 = vrot.lane.b32.xlu2 %v5183_v53, %s4948_s10  ;;  %4468 = vpow2.f32 %v1022_v38 }
 0x264   : > { %4470 = vpow2.f32 %v1020_v42 }
 0x267   : > { %1559 = vrot.lane.b32.xlu0 %v5190_v60, %s4948_s10 }
 0x269   : > { %v5291_v41 = vpop.eup %4468 }
 0x26a   : > { %v1045_v43 = vsel %vm975_vm1, %v5291_v41, 0.0  ;;  %v5295_v45 = vpop.eup %4470 }
 0x26b   : > { %v1042_v48 = vsel %vm975_vm1, %v5295_v45, 0.0 }
 0x274   : > { %1296 = vrot.lane.b32.xlu1 %v5223_v21, %s4948_s10 }
 0x291   : > { %1046 = vadd.xlane.f32.xlu0 %v1045_v43 }
 0x299   : > { %v1361_v44 = vpop.xlane.xlu2 %1360 }
 0x29a   : > { %v1383_v47 = vsub.f32 %v5244_v50, %v1361_v44 }
 0x29c   : > { %v1391_v49 = vmul.f32 1.442695, %v1383_v47 }
 0x29e   : > { %4472 = vpow2.f32 %v1391_v49  ;;  %1043 = vadd.xlane.f32.xlu1 %v1042_v48 }
 0x2a1   : > { %v1364_v46 = vpop.xlane.xlu0 %1363 }
 0x2a2   : > { %v1384_v51 = vsub.f32 %v5248_v57, %v1364_v46 }
 0x2a4   : > { %v5301_v54 = vpop.eup %4472  ;;  %v1393_v55 = vmul.f32 1.442695, %v1384_v51 }
 0x2a5   : > { %v1407_v56 = vsel %vm975_vm1, %v5301_v54, 0.0 }
 0x2a6   : > { %4474 = vpow2.f32 %v1393_v55  ;;  %1408 = vadd.xlane.f32.xlu2 %v1407_v56  ;;  %v1026_v58 = vpop.xlane.xlu2 %1025 }
 0x2a7   : > { %4476 = vrcp.f32 %v1026_v58  ;;  %v1059_v20 = vand.u32 2147483648, %v1026_v58  ;;  %vm1053_vm3 = vweird.f32 %v1026_v58  ;;  %v1057_v22 = vand.u32 2147483647, %v1026_v58 }
 0x2a9   : > { %v5305_v50 = vpop.xlane.xlu0 %1366  ;;  %v1060_v33 = vor.u32 1.1754944e-38, %v1059_v20  ;;  %vm1058_vm6 = vcmp.eq.f32.partialorder %v1057_v22, 8.507059e+37 }
 0x2ac   : > { %v5307_v59 = vpop.eup %4474 }
 0x2ad   : > { %v4477_v61 = vpop.eup %4476  ;;  %v1410_v63 = vsel %vm975_vm1, %v5307_v59, 0.0 }
 0x2ae   : > { %v1049_v1 = vmul.f32 %v4477_v61, %v1026_v58  ;;  %1411 = vadd.xlane.f32.xlu0 %v1410_v63  ;;  %vm1054_vm2 = vweird.f32 %v4477_v61 }
 0x2af   : > { %vm5315_vm4 = vmor %vm1053_vm3, %vm1054_vm2 }
 0x2b0   : > { %v1050_v57 = vsub.f32 1.0, %v1049_v1 }
 0x2b1   : > { %v1029_v4 = vpop.xlane.xlu0 %1028  ;;  %v1370_v6 = vpop.xlane.xlu1 %1369 }
 0x2b2   : > { %4478 = vrcp.f32 %v1029_v4  ;;  %v1386_v7 = vsub.f32 %v5262_v11, %v1370_v6  ;;  %v1051_v9 = vmul.f32 %v4477_v61, %v1050_v57  ;;  %v1073_v11 = vand.u32 2147483648, %v1029_v4 }
 0x2b3   : > { %v1071_v32 = vand.u32 2147483647, %v1029_v4  ;;  %vm1067_vm7 = vweird.f32 %v1029_v4 }
 0x2b4   : > { %v1397_v13 = vmul.f32 1.442695, %v1386_v7  ;;  %v1052_v15 = vadd.f32 %v4477_v61, %v1051_v9  ;;  %v1074_v40 = vor.u32 1.1754944e-38, %v1073_v11 }
 0x2b5   : > { %vm1072_vm9 = vcmp.eq.f32.partialorder %v1071_v32, 8.507059e+37  ;;  %v1385_v32 = vsub.f32 %v5256_v2, %v5305_v50 }
 0x2b6   : > { %4480 = vpow2.f32 %v1397_v13  ;;  %v1056_v28 = vsel %vm5315_vm4, %v4477_v61, %v1052_v15 }
 0x2b7   : > { %v1061_v39 = vsel %vm1058_vm6, %v1060_v33, %v1056_v28 }
 0x2b8   : > { %v4479_v14 = vpop.eup %4478  ;;  %v1160_v49 = vmul.f32 %v5252_v62, %v1061_v39 }
 0x2b9   : > { %v1063_v17 = vmul.f32 %v4479_v14, %v1029_v4  ;;  %v5312_v18 = vpop.xlane.xlu1 %1031  ;;  %vm1068_vm5 = vweird.f32 %v4479_v14 }
 0x2ba   : > { %4482 = vrcp.f32 %v5312_v18  ;;  %vm1069_vm8 = vmor %vm1067_vm7, %vm1068_vm5  ;;  %v1087_v62 = vand.u32 2147483648, %v5312_v18  ;;  %vm1081_vm12 = vweird.f32 %v5312_v18  ;;  %v1085_v6 = vand.u32 2147483647, %v5312_v18 }
 0x2bb   : > { %v1064_v24 = vsub.f32 1.0, %v1063_v17 }
 0x2bc   : > { %v5319_v27 = vpop.eup %4480  ;;  %v1088_v20 = vor.u32 1.1754944e-38, %v1087_v62  ;;  %vm1086_vm3 = vcmp.eq.f32.partialorder %v1085_v6, 8.507059e+37 }
 0x2bd   : > { %v1065_v29 = vmul.f32 %v4479_v14, %v1064_v24  ;;  %v1416_v35 = vsel %vm975_vm1, %v5319_v27, 0.0 }
 0x2be   : > { %1557 = vrot.lane.b32.xlu2 %v5195_v3, %s4948_s10  ;;  %v1035_v36 = vpop.xlane.xlu2 %1034  ;;  %1417 = vadd.xlane.f32.xlu1 %v1416_v35 }
 0x2bf   : > { %v1066_v37 = vadd.f32 %v4479_v14, %v1065_v29  ;;  %4484 = vrcp.f32 %v1035_v36  ;;  %v1101_v1 = vand.u32 2147483648, %v1035_v36  ;;  %vm1095_vm13 = vweird.f32 %v1035_v36 }
 0x2c0   : > { %v4483_v38 = vpop.eup %4482 }
 0x2c1   : > { %v1070_v42 = vsel %vm1069_vm8, %v4479_v14, %v1066_v37  ;;  %v1077_v43 = vmul.f32 %v4483_v38, %v5312_v18  ;;  %vm1082_vm10 = vweird.f32 %v4483_v38  ;;  %v1102_v14 = vor.u32 1.1754944e-38, %v1101_v1 }
 0x2c2   : > { %v1075_v44 = vsel %vm1072_vm9, %v1074_v40, %v1070_v42  ;;  %1555 = vrot.lane.b32.xlu0 %v5206_v8, %s4948_s10  ;;  %vm1083_vm14 = vmor %vm1081_vm12, %vm1082_vm10 }
 0x2c3   : > { %v1078_v47 = vsub.f32 1.0, %v1077_v43  ;;  %v1161_v48 = vmul.f32 %v5260_v10, %v1075_v44  ;;  %v1099_v10 = vand.u32 2147483647, %v1035_v36 }
 0x2c5   : > { %v4485_v46 = vpop.eup %4484  ;;  %v1079_v51 = vmul.f32 %v4483_v38, %v1078_v47  ;;  %v1168_v55 = vpack.c.bf16 %v1161_v48, %v1160_v49  ;;  %vm1100_vm2 = vcmp.eq.f32.partialorder %v1099_v10, 8.507059e+37 }
 0x2c6   : > { %v1091_v56 = vmul.f32 %v4485_v46, %v1035_v36  ;;  %v5332_v58 = vpop.xlane.xlu0 %1037  ;;  %v1562_v61 = vpop.permute.xlu2 %1561  ;;  %vm1096_vm11 = vweird.f32 %v4485_v46 }
 0x2c7   : > { %4486 = vrcp.f32 %v5332_v58  ;;  %4185 = vmatmul.msk.bf16.vlgmr.msra.gmra.mxu0 %vm975_vm1, %v1168_v55  ;;  %1583 = vmatpush.bf16.msra.mxu3 %v1562_v61  ;;  %v1080_v57 = vadd.f32 %v4483_v38, %v1079_v51  ;;  %vm1097_vm15 = vmor %vm1095_vm13, %vm1096_vm11  ;;  %vm1109_vm6 = vweird.f32 %v5332_v58  ;;  %v1115_v50 = vand.u32 2147483648, %v5332_v58 }
 0x2c8   : > { %v1092_v63 = vsub.f32 1.0, %v1091_v56  ;;  %v1113_v42 = vand.u32 2147483647, %v5332_v58 }
 0x2c9   : > { %v1084_v13 = vsel %vm1083_vm14, %v4483_v38, %v1080_v57  ;;  %v1116_v48 = vor.u32 1.1754944e-38, %v1115_v50 }
 0x2ca   : > { %v1093_v4 = vmul.f32 %v4485_v46, %v1092_v63  ;;  %1681 = vrot.lane.b32.xlu0 %v5192_v0, %s4949_s13  ;;  %v1089_v26 = vsel %vm1086_vm3, %v1088_v20, %v1084_v13  ;;  %vm1114_vm11 = vcmp.eq.f32.partialorder %v1113_v42, 8.507059e+37 }
 0x2cb   : > { %v1162_v28 = vmul.f32 %v5268_v19, %v1089_v26 }
 0x2cc   : > { %v1094_v7 = vadd.f32 %v4485_v46, %v1093_v4 }
 0x2cd   : > { %v4487_v9 = vpop.eup %4486 }
 0x2ce   : > { %v1105_v15 = vmul.f32 %v4487_v9, %v5332_v58  ;;  %v1041_v17 = vpop.xlane.xlu1 %1040  ;;  %v1098_v22 = vsel %vm1097_vm15, %v4485_v46, %v1094_v7  ;;  %vm1110_vm4 = vweird.f32 %v4487_v9 }
 0x2cf   : > { %4488 = vrcp.f32 %v1041_v17  ;;  %v1103_v24 = vsel %vm1100_vm2, %v1102_v14, %v1098_v22  ;;  %v1129_v38 = vand.u32 2147483648, %v1041_v17  ;;  %v1127_v2 = vand.u32 2147483647, %v1041_v17  ;;  %vm1111_vm8 = vmor %vm1109_vm6, %vm1110_vm4 }
 0x2d0   : > { %v1163_v11 = vmul.f32 %v5272_v25, %v1103_v24  ;;  %v1106_v18 = vsub.f32 1.0, %v1105_v15  ;;  %v1395_v25 = vmul.f32 1.442695, %v1385_v32  ;;  %vm1123_vm7 = vweird.f32 %v1041_v17 }
 0x2d1   : > { %v1130_v44 = vor.u32 1.1754944e-38, %v1129_v38  ;;  %vm1128_vm10 = vcmp.eq.f32.partialorder %v1127_v2, 8.507059e+37  ;;  %v4340_v2 = vld [vmem:[#allocation6 + $0x8] sm:$0xff] }
 0x2d2   : > { %2062 = vrot.lane.b32.xlu0 %v5181_v52, %s4950_s19  ;;  %v1169_v33 = vpack.c.bf16 %v1163_v11, %v1162_v28  ;;  %v1107_v35 = vmul.f32 %v4487_v9, %v1106_v18  ;;  %4490 = vpow2.f32 %v1395_v25  ;;  %1639 = vmatpush.bf16.msrb.mxu0 %v4340_v2 }
 0x2d4   : > { %v1108_v19 = vadd.f32 %v4487_v9, %v1107_v35 }
 0x2d5   : > { %v4489_v29 = vpop.eup %4488 }
 0x2d6   : > { %v1119_v36 = vmul.f32 %v4489_v29, %v1041_v17  ;;  %vm1124_vm5 = vweird.f32 %v4489_v29  ;;  %v1112_v47 = vsel %vm1111_vm8, %v4487_v9, %v1108_v19 }
 0x2d7   : > { %4186 = vmatmul.msk.bf16.gmra.mxu0 %vm975_vm1, %v1169_v33  ;;  %1294 = vrot.lane.b32.xlu1 %v5219_v16, %s4948_s10  ;;  %vm1125_vm9 = vmor %vm1123_vm7, %vm1124_vm5  ;;  %v1117_v51 = vsel %vm1114_vm11, %v1116_v48, %v1112_v47  ;;  %s3952_s10 = scalar_lea.sflag [#allocation5], %s334_s17 }
 0x2d8   : > { %v1120_v37 = vsub.f32 1.0, %v1119_v36  ;;  %v5361_v56 = vpop.eup %4490  ;;  %v1164_v58 = vmul.f32 %v5276_v30, %v1117_v51  ;;  %v4339_v51 = vld [vmem:[#allocation6] sm:$0xff] }
 0x2d9   : > { %v1560_v39 = vpop.permute.xlu0 %1559  ;;  %v1413_v63 = vsel %vm975_vm1, %v5361_v56, 0.0  ;;  %1260 = vmatpush.bf16.msrb.mxu1 %v4339_v51 }
 0x2da   : > { %v1121_v40 = vmul.f32 %v4489_v29, %v1120_v37  ;;  %1677 = vrot.lane.b32.xlu0 %v5197_v5, %s4949_s13  ;;  %1584 = vmatpush.bf16.msra.mxu3 %v1560_v39 }
 0x2dc   : > { %v1122_v43 = vadd.f32 %v4489_v29, %v1121_v40 }
 0x2de   : > { %v1126_v49 = vsel %vm1125_vm9, %v4489_v29, %v1122_v43 }
 0x2df   : > { %v1131_v46 = vsel %vm1128_vm10, %v1130_v44, %v1126_v49  ;;  %1679 = vrot.lane.b32.xlu1 %v5177_v31, %s4949_s13 }
 0x2e0   : > { %v1165_v55 = vmul.f32 %v5280_v34, %v1131_v46 }
 0x2e2   : > { %2056 = vrot.lane.b32.xlu0 %v5197_v5, %s4950_s19  ;;  %v1170_v1 = vpack.c.bf16 %v1165_v55, %v1164_v58 }
 0x2e6   : > { %v1297_v61 = vpop.permute.xlu1 %1296 }
 0x2e7   : > { %4200 = vmatmul.msk.bf16.vlgmr.msrb.gmra.mxu3 %vm921_vm0, %v1297_v61  ;;  %1414 = vadd.xlane.f32.xlu2 %v1413_v63 }
 0x2e8   : > { %2058 = vrot.lane.b32.xlu1 %v5177_v31, %s4950_s19  ;;  %4187 = vmatmul.msk.bf16.gmra.mxu0 %vm975_vm1, %v1170_v1 }
 0x2ea   : > { %2050 = vrot.lane.b32.xlu0 %v5171_v23, %s4950_s19 }
 0x2f0   : > { %2048 = vrot.lane.b32.xlu1 %v5167_v12, %s4950_s19 }
 0x2f2   : > { %1675 = vrot.lane.b32.xlu0 %v5223_v21, %s4949_s13 }
 0x2f8   : > { %1673 = vrot.lane.b32.xlu1 %v5219_v16, %s4949_s13 }
 0x2ff   : > { %1683 = vrot.lane.b32.xlu2 %v5181_v52, %s4949_s13 }
 0x300   : > { %2054 = vrot.lane.b32.xlu1 %v5223_v21, %s4950_s19 }
 0x304   : > { %v1047_v30 = vpop.xlane.xlu0 %1046 }
 0x305   : > { %4492 = vrcp.f32 %v1047_v30  ;;  %v1157_v14 = vand.u32 2147483648, %v1047_v30  ;;  %vm1151_vm13 = vweird.f32 %v1047_v30  ;;  %v1155_v17 = vand.u32 2147483647, %v1047_v30 }
 0x307   : > { %2060 = vrot.lane.b32.xlu2 %v5192_v0, %s4950_s19  ;;  %v1158_v28 = vor.u32 1.1754944e-38, %v1157_v14  ;;  %vm1156_vm4 = vcmp.eq.f32.partialorder %v1155_v17, 8.507059e+37 }
 0x30b   : > { %v4493_v34 = vpop.eup %4492 }
 0x30c   : > { %v1147_v57 = vmul.f32 %v4493_v34, %v1047_v30  ;;  %vm1152_vm12 = vweird.f32 %v4493_v34 }
 0x30d   : > { %vm5388_vm15 = vmor %vm1151_vm13, %vm1152_vm12 }
 0x30e   : > { %v1148_v4 = vsub.f32 1.0, %v1147_v57 }
 0x30f   : > { %1669 = vrot.lane.b32.xlu2 %v5167_v12, %s4949_s13 }
 0x310   : > { %v1149_v10 = vmul.f32 %v4493_v34, %v1148_v4 }
 0x311   : > { %v1044_v62 = vpop.xlane.xlu1 %1043 }
 0x312   : > { %4494 = vrcp.f32 %v1044_v62  ;;  %v1150_v13 = vadd.f32 %v4493_v34, %v1149_v10  ;;  %v1143_v22 = vand.u32 2147483648, %v1044_v62  ;;  %v1141_v26 = vand.u32 2147483647, %v1044_v62 }
 0x313   : > { %vm1137_vm2 = vweird.f32 %v1044_v62 }
 0x314   : > { %v1154_v11 = vsel %vm5388_vm15, %v4493_v34, %v1150_v13  ;;  %v1144_v37 = vor.u32 1.1754944e-38, %v1143_v22  ;;  %vm1142_vm5 = vcmp.eq.f32.partialorder %v1141_v26, 8.507059e+37 }
 0x315   : > { %v1159_v25 = vsel %vm1156_vm4, %v1158_v28, %v1154_v11 }
 0x316   : > { %v1167_v19 = vmul.f32 %v5291_v41, %v1159_v25 }
 0x317   : > { %1671 = vrot.lane.b32.xlu2 %v5171_v23, %s4949_s13 }
 0x318   : > { %v4495_v6 = vpop.eup %4494 }
 0x319   : > { %v1133_v7 = vmul.f32 %v4495_v6, %v1044_v62  ;;  %v1409_v9 = vpop.xlane.xlu2 %1408  ;;  %vm1138_vm14 = vweird.f32 %v4495_v6 }
 0x31a   : > { %4496 = vrcp.f32 %v1409_v9  ;;  %vm1139_vm3 = vmor %vm1137_vm2, %vm1138_vm14  ;;  %v1442_v49 = vand.u32 2147483648, %v1409_v9  ;;  %vm1436_vm7 = vweird.f32 %v1409_v9  ;;  %v1440_v48 = vand.u32 2147483647, %v1409_v9 }
 0x31b   : > { %v1134_v15 = vsub.f32 1.0, %v1133_v7 }
 0x31c   : > { %v1443_v61 = vor.u32 1.1754944e-38, %v1442_v49  ;;  %vm1441_vm10 = vcmp.eq.f32.partialorder %v1440_v48, 8.507059e+37 }
 0x31d   : > { %v1135_v20 = vmul.f32 %v4495_v6, %v1134_v15 }
 0x31f   : > { %2052 = vrot.lane.b32.xlu2 %v5219_v16, %s4950_s19  ;;  %v1136_v18 = vadd.f32 %v4495_v6, %v1135_v20 }
 0x320   : > { %v4497_v29 = vpop.eup %4496 }
 0x321   : > { %v1432_v32 = vmul.f32 %v4497_v29, %v1409_v9  ;;  %v1412_v33 = vpop.xlane.xlu0 %1411  ;;  %v1558_v35 = vpop.permute.xlu2 %1557  ;;  %v1140_v36 = vsel %vm1139_vm3, %v4495_v6, %v1136_v18  ;;  %vm1437_vm6 = vweird.f32 %v4497_v29 }
 0x322   : > { %4498 = vrcp.f32 %v1412_v33  ;;  %1585 = vmatpush.bf16.msra.mxu3 %v1558_v35  ;;  %v1145_v39 = vsel %vm1142_vm5, %v1144_v37, %v1140_v36  ;;  %vm1438_vm8 = vmor %vm1436_vm7, %vm1437_vm6  ;;  %v1456_v55 = vand.u32 2147483648, %v1412_v33  ;;  %v1454_v41 = vand.u32 2147483647, %v1412_v33 }
 0x323   : > { %v1433_v38 = vsub.f32 1.0, %v1432_v32  ;;  %v1166_v40 = vmul.f32 %v5295_v45, %v1145_v39  ;;  %vm1450_vm11 = vweird.f32 %v1412_v33 }
 0x324   : > { %v1457_v30 = vor.u32 1.1754944e-38, %v1456_v55  ;;  %vm1455_vm13 = vcmp.eq.f32.partialorder %v1454_v41, 8.507059e+37 }
 0x325   : > { %v1434_v50 = vmul.f32 %v4497_v29, %v1433_v38  ;;  %v1171_v42 = vpack.c.bf16 %v1167_v19, %v1166_v40 }
 0x327   : > { %4188 = vmatmul.msk.bf16.gmra.mxu0 %vm975_vm1, %v1171_v42  ;;  %v1435_v44 = vadd.f32 %v4497_v29, %v1434_v50 }
 0x328   : > { %v4499_v43 = vpop.eup %4498 }
 0x329   : > { %v1446_v47 = vmul.f32 %v4499_v43, %v1412_v33  ;;  %v1439_v45 = vsel %vm1438_vm8, %v4497_v29, %v1435_v44  ;;  %vm1451_vm9 = vweird.f32 %v4499_v43 }
 0x32a   : > { %v1444_v1 = vsel %vm1441_vm10, %v1443_v61, %v1439_v45  ;;  %vm1452_vm12 = vmor %vm1450_vm11, %vm1451_vm9 }
 0x32b   : > { %v1447_v46 = vsub.f32 1.0, %v1446_v47  ;;  %v1543_v62 = vmul.f32 %v5301_v54, %v1444_v1 }
 0x32d   : > { %v1448_v58 = vmul.f32 %v4499_v43, %v1447_v46 }
 0x32f   : > { %v1449_v63 = vadd.f32 %v4499_v43, %v1448_v58 }
 0x331   : > { %v1453_v34 = vsel %vm1452_vm12, %v4499_v43, %v1449_v63  ;;  %v1418_v9 = vpop.xlane.xlu1 %1417 }
 0x332   : > { %v1458_v57 = vsel %vm1455_vm13, %v1457_v30, %v1453_v34  ;;  %4500 = vrcp.f32 %v1418_v9  ;;  %v1484_v37 = vand.u32 2147483648, %v1418_v9  ;;  %vm1478_vm15 = vweird.f32 %v1418_v9 }
 0x333   : > { %v1544_v4 = vmul.f32 %v5307_v59, %v1458_v57  ;;  %v1482_v39 = vand.u32 2147483647, %v1418_v9 }
 0x334   : > { %v1556_v10 = vpop.permute.xlu0 %1555  ;;  %v1485_v44 = vor.u32 1.1754944e-38, %v1484_v37 }
 0x335   : > { %1586 = vmatpush.bf16.msra.mxu3 %v1556_v10  ;;  %v1551_v6 = vpack.c.bf16 %v1544_v4, %v1543_v62  ;;  %vm1483_vm5 = vcmp.eq.f32.partialorder %v1482_v39, 8.507059e+37 }
 0x338   : > { %4201 = vmatmul.msk.bf16.vlgmr.msra.gmra.mxu3 %vm975_vm1, %v1551_v6  ;;  %v4501_v59 = vpop.eup %4500 }
 0x339   : > { %4360 = vmatpush.bf16.msrb.mxu3 %v4340_v2  ;;  %v1474_v24 = vmul.f32 %v4501_v59, %v1418_v9  ;;  %vm1479_vm14 = vweird.f32 %v4501_v59 }
 0x33a   : > { %vm1480_vm2 = vmor %vm1478_vm15, %vm1479_vm14 }
 0x33b   : > { %v1475_v26 = vsub.f32 1.0, %v1474_v24 }
 0x33c   : > { %v1682_v7 = vpop.permute.xlu0 %1681 }
 0x33d   : > { %v1476_v29 = vmul.f32 %v4501_v59, %v1475_v26  ;;  %v1704_v58 = vsel %vm921_vm0, %v1682_v7, 0 }
 0x33f   : > { %v1477_v36 = vadd.f32 %v4501_v59, %v1476_v29 }
 0x341   : > { %v1481_v42 = vsel %vm1480_vm2, %v4501_v59, %v1477_v36 }
 0x342   : > { %v1486_v48 = vsel %vm1483_vm5, %v1485_v44, %v1481_v42 }
 0x343   : > { %v1546_v1 = vmul.f32 %v5319_v27, %v1486_v48 }
 0x344   : > { %v2063_v13 = vpop.permute.xlu0 %2062  ;;  %v1209_v14 = vpop.f32.mrf.mxu0 }
 0x345   : > { %v2086_v15 = vsel %vm921_vm0, %v2063_v13, 0 }
 0x346   : > { %2092 = vmatpush.bf16.xpose.msra.mxu0 %v2086_v15 }
 0x349   : > { %v1295_v17 = vpop.permute.xlu1 %1294 }
 0x34a   : > { %4199 = vmatmul.msk.bf16.gmra.mxu2 %vm921_vm0, %v1295_v17 }
 0x34c   : > { %v1211_v20 = vpop.f32.mrf.mxu0  ;;  %v1678_v62 = vpop.permute.xlu0 %1677 }
 0x34d   : > { %v1229_v54 = vpack.c.bf16 %v1211_v20, %v1209_v14 }
 0x34f   : > { %4193 = vmatmul.msk.bf16.vlgmr.msrb.gmra.mxu1 %vm921_vm0, %v1229_v54 }
 0x351   : > { %v1680_v43 = vpop.permute.xlu1 %1679 }
 0x352   : > { %v1701_v10 = vsel %vm921_vm0, %v1680_v43, 0 }
 0x354   : > { %v1214_v22 = vpop.f32.mrf.mxu0  ;;  %v2057_v7 = vpop.permute.xlu0 %2056 }
 0x355   : > { %v2077_v27 = vsel %vm921_vm0, %v2057_v7, 0 }
 0x35a   : > { %v1415_v11 = vpop.xlane.xlu2 %1414  ;;  %v2059_v4 = vpop.permute.xlu1 %2058 }
 0x35b   : > { %4502 = vrcp.f32 %v1415_v11  ;;  %v1470_v40 = vand.u32 2147483648, %v1415_v11  ;;  %v1468_v50 = vand.u32 2147483647, %v1415_v11  ;;  %vm1464_vm4 = vweird.f32 %v1415_v11 }
 0x35c   : > { %v1216_v18 = vpop.f32.mrf.mxu0  ;;  %v2080_v6 = vsel %vm921_vm0, %v2059_v4, 0 }
 0x35d   : > { %v1230_v28 = vpack.c.bf16 %v1216_v18, %v1214_v22  ;;  %v1471_v49 = vor.u32 1.1754944e-38, %v1470_v40  ;;  %vm1469_vm7 = vcmp.eq.f32.partialorder %v1468_v50, 8.507059e+37 }
 0x35f   : > { %4194 = vmatmul.msk.bf16.gmra.mxu1 %vm921_vm0, %v1230_v28 }
 0x361   : > { %v4503_v32 = vpop.eup %4502 }
 0x362   : > { %v1460_v33 = vmul.f32 %v4503_v32, %v1415_v11  ;;  %v1684_v35 = vpop.permute.xlu2 %1683  ;;  %vm1465_vm3 = vweird.f32 %v4503_v32  ;;  %v2049_v54 = vpop.permute.xlu1 %2048 }
 0x363   : > { %v1707_v25 = vsel %vm921_vm0, %v1684_v35, 0  ;;  %vm1466_vm6 = vmor %vm1464_vm4, %vm1465_vm3 }
 0x364   : > { %v1461_v38 = vsub.f32 1.0, %v1460_v33  ;;  %1713 = vmatpush.bf16.xpose.msra.mxu1 %v1707_v25  ;;  %v2051_v25 = vpop.permute.xlu0 %2050 }
 0x365   : > { %v1219_v19 = vpop.f32.mrf.mxu0 }
 0x366   : > { %v1462_v2 = vmul.f32 %v4503_v32, %v1461_v38 }
 0x368   : > { %v1463_v47 = vadd.f32 %v4503_v32, %v1462_v2 }
 0x36a   : > { %v1354_v46 = vpop.f32.mrf.mxu3  ;;  %v1467_v51 = vsel %vm1466_vm6, %v4503_v32, %v1463_v47  ;;  %v2061_v55 = vpop.permute.xlu2 %2060 }
 0x36b   : > { %v1377_v45 = vsel %vm975_vm1, %v1354_v46, -inf  ;;  %v1472_v41 = vsel %vm1469_vm7, %v1471_v49, %v1467_v51  ;;  %v2083_v61 = vsel %vm921_vm0, %v2061_v55, 0  ;;  %v1674_v24 = vpop.permute.xlu1 %1673  ;;  %v647_v49 = vld [vmem:[#allocation8] sm:$0xff] }
 0x36c   : > { %1378 = vmax.xlane.f32.xlu1 %v1377_v45  ;;  %1714 = vmatpush.bf16.xpose.msra.mxu1 %v1704_v58  ;;  %v1545_v63 = vmul.f32 %v5361_v56, %v1472_v41  ;;  %v1698_v56 = vsel %vm921_vm0, %v1678_v62, 0  ;;  %v1676_v40 = vpop.permute.xlu0 %1675  ;;  %v5454_v48 = vperm.slane %v647_v49, 0  ;;  %v666_v51 = vld [vmem:[#allocation2 + $0x1] sm:$0xff]  ;;  %v5460_v41 = vperm.slane %v647_v49, 2 }
 0x36d   : > { %v1221_v30 = vpop.f32.mrf.mxu0  ;;  %2093 = vmatpush.bf16.xpose.msra.mxu0 %v2083_v61  ;;  %v4712_v55 = vld [vmem:[#allocation2] sm:$0xff] }
 0x36e   : > { %v1231_v34 = vpack.c.bf16 %v1221_v30, %v1219_v19  ;;  %v1552_v57 = vpack.c.bf16 %v1546_v1, %v1545_v63  ;;  %v658_v45 = vmul.f32 %v4712_v55, %v5454_v48  ;;  %7073 = vst [vmem:[#allocation24_spill] sm:$0xff] %v5460_v41  ;;  %v691_v61 = vld [vmem:[#allocation2 + $0x2] sm:$0xff] }
 0x36f   : > { %v700_v30 = vmul.f32 %v5460_v41, %v691_v61 }
 0x370   : > { %4195 = vmatmul.msk.bf16.gmra.mxu1 %vm921_vm0, %v1231_v34  ;;  %4202 = vmatmul.msk.bf16.gmra.mxu3 %vm975_vm1, %v1552_v57  ;;  %v5465_v34 = vperm.slane %v647_v49, 3  ;;  %v716_v57 = vld [vmem:[#allocation2 + $0x10] sm:$0xff] }
 0x372   : > { %v5419_v15 = vpop.f32.mrf.mxu3  ;;  %v1670_v20 = vpop.permute.xlu2 %1669  ;;  %7075 = vst [vmem:[#allocation26_spill] sm:$0xff] %v5465_v34  ;;  %v725_v4 = vmul.f32 %v5465_v34, %v716_v57 }
 0x373   : > { %v5430_v29 = vpop.permute.xlu1 %2054  ;;  %v1380_v33 = vsel %vm975_vm1, %v5419_v15, -inf }
 0x374   : > { %1715 = vmatpush.bf16.xpose.msra.mxu1 %v1701_v10  ;;  %v5469_v10 = vperm.slane %v647_v49, 4 }
 0x375   : > { %2094 = vmatpush.bf16.xpose.msra.mxu0 %v2080_v6  ;;  %v741_v6 = vld [vmem:[#allocation2 + $0x11] sm:$0xff] }
 0x376   : > { %7076 = vst [vmem:[#allocation27_spill] sm:$0xff] %v5469_v10 }
 0x37a   : > { %v1672_v11 = vpop.permute.xlu2 %1671 }
 0x37c   : > { %1716 = vmatpush.bf16.xpose.msra.mxu1 %v1698_v56 }
 0x37d   : > { %2095 = vmatpush.bf16.xpose.msra.mxu0 %v2077_v27  ;;  %v750_v27 = vmul.f32 %v5469_v10, %v741_v6 }
 0x3a4   : > { %v1224_v9 = vpop.f32.mrf.mxu0 }
 0x3ac   : > { %v1226_v13 = vpop.f32.mrf.mxu0 }
 0x3ad   : > { %v1232_v14 = vpack.c.bf16 %v1226_v13, %v1224_v9  ;;  %v5474_v9 = vperm.slane %v647_v49, 5  ;;  %v766_v13 = vld [vmem:[#allocation2 + $0x12] sm:$0xff] }
 0x3af   : > { %4196 = vmatmul.msk.bf16.gmra.mxu1 %vm921_vm0, %v1232_v14  ;;  %7078 = vst [vmem:[#allocation29_spill] sm:$0xff] %v5474_v9 }
 0x3bb   : > { %v1588_v17 = vpop.f32.mrf.mxu3 }
 0x3bf   : > { %4213 = vmatmul.msk.bf16.vlgmr.msra.gmra.mxu1 %vm921_vm0, %v1670_v20  ;;  %v5477_v20 = vperm.slane %v647_v49, 6 }
 0x3c1   : > { %7079 = vst [vmem:[#allocation30_spill] sm:$0xff] %v5477_v20 }
 0x3c3   : > { %v1590_v59 = vpop.f32.mrf.mxu3 }
 0x3c4   : > { %v1608_v22 = vpack.c.bf16 %v1590_v59, %v1588_v17  ;;  %v775_v17 = vmul.f32 %v5474_v9, %v766_v13  ;;  %v2053_v59 = vpop.permute.xlu2 %2052 }
 0x3c6   : > { %4209 = vmatmul.msk.bf16.vlgmr.msrb.gmra.mxu0 %vm921_vm0, %v1608_v22 }
 0x3cc   : > { %v1262_v19 = vpop.f32.mrf.mxu1 }
 0x3cd   : > { %v5423_v26 = vpop.f32.mrf.mxu2 }
 0x3ce   : > { %v1371_v18 = vsel %vm975_vm1, %v5423_v26, -inf }
 0x3cf   : > { %1372 = vmax.xlane.f32.xlu2 %v1371_v18  ;;  %4214 = vmatmul.msk.bf16.gmra.mxu1 %vm921_vm0, %v1672_v11  ;;  %v5482_v18 = vperm.slane %v647_v49, 7 }
 0x3d1   : > { %7081 = vst [vmem:[#allocation32_spill] sm:$0xff] %v5482_v18 }
 0x3d4   : > { %v5444_v43 = vpop.f32.mrf.mxu1 }
 0x3d5   : > { %v5428_v28 = vpop.f32.mrf.mxu2  ;;  %7070 = vst [vmem:[#allocation21_spill] sm:$0xff] %v5444_v43 }
 0x3d6   : > { %v1374_v32 = vsel %vm975_vm1, %v5428_v28, -inf }
 0x3d7   : > { %1375 = vmax.xlane.f32.xlu0 %v1374_v32  ;;  %1381 = vmax.xlane.f32.xlu2 %v1380_v33  ;;  %v817_v32 = vld [vmem:[#allocation2 + $0x21] sm:$0xff] }
 0x3dc   : > { %v5449_v44 = vpop.f32.mrf.mxu1 }
 0x3df   : > { %v1379_v35 = vpop.xlane.xlu1 %1378  ;;  %4215 = vmatmul.msk.bf16.gmra.mxu1 %vm921_vm0, %v1674_v24 }
 0x3e0   : > { %v1389_v36 = vsub.f32 %v1354_v46, %v1379_v35  ;;  %v5456_v46 = vperm.slane %v647_v49, 1  ;;  %v826_v35 = vmul.f32 %v5482_v18, %v817_v32 }
 0x3e2   : > { %v1403_v37 = vmul.f32 1.442695, %v1389_v36  ;;  %7072 = vst [vmem:[#allocation23_spill] sm:$0xff] %v5456_v46  ;;  %v675_v58 = vmul.f32 %v5456_v46, %v666_v51  ;;  %v4455_v36 = vld [vmem:[#allocation8 + $0x8] ss:$0 sm:$0xff] }
 0x3e4   : > { %4504 = vpow2.f32 %v1403_v37  ;;  %v5452_v47 = vpop.f32.mrf.mxu1  ;;  %v683_v1 = vadd.f32 %v675_v58, %v658_v45  ;;  %v842_v37 = vld [vmem:[#allocation2 + $0x22] sm:$0xff] }
 0x3e5   : > { %7071 = vst [vmem:[#allocation22_spill] sm:$0xff] %v5452_v47 }
 0x3e6   : > { %v708_v62 = vadd.f32 %v700_v30, %v683_v1 }
 0x3e8   : > { %v733_v56 = vadd.f32 %v725_v4, %v708_v62 }
 0x3ea   : > { %v5437_v38 = vpop.eup %4504  ;;  %v758_v14 = vadd.f32 %v750_v27, %v733_v56 }
 0x3eb   : > { %v1425_v39 = vsel %vm975_vm1, %v5437_v38, 0.0 }
 0x3ec   : > { %1426 = vadd.xlane.f32.xlu0 %v1425_v39  ;;  %v783_v24 = vadd.f32 %v775_v17, %v758_v14  ;;  %v868_v39 = vld [vmem:[%s7027_s4] sm:$0x1] }
 0x3ed   : > { %v5462_v63 = vpop.f32.mrf.mxu1 }
 0x3ee   : > { %7074 = vst [vmem:[#allocation25_spill] sm:$0xff] %v5462_v63 }
 0x3ef   : > { %1938 = vrot.lane.b32.xlu2 %v5190_v60, %s4949_s13  ;;  %4216 = vmatmul.msk.bf16.gmra.mxu1 %vm921_vm0, %v1676_v40 }
 0x3f3   : > { %v1593_v2 = vpop.f32.mrf.mxu3 }
 0x3f5   : > { %v5471_v7 = vpop.f32.mrf.mxu1 }
 0x3f6   : > { %7077 = vst [vmem:[#allocation28_spill] sm:$0xff] %v5471_v7 }
 0x3fb   : > { %v1595_v50 = vpop.f32.mrf.mxu3 }
 0x3fc   : > { %v1609_v42 = vpack.c.bf16 %v1595_v50, %v1593_v2  ;;  %v851_v50 = vmul.f32 %v4455_v36, %v842_v37 }
 0x3fe   : > { %4210 = vmatmul.msk.bf16.gmra.mxu0 %vm921_vm0, %v1609_v42 }
 0x400   : > { %1936 = vrot.lane.b32.xlu0 %v5195_v3, %s4949_s13 }
 0x40e   : > { %4229 = vmatmul.msk.bf16.vlgmr.msra.gmra.mxu0 %vm921_vm0, %v2049_v54  ;;  %v792_v54 = vld [vmem:[#allocation2 + $0x20] sm:$0xff] }
 0x40f   : > { %v801_v11 = vmul.f32 %v5477_v20, %v792_v54 }
 0x411   : > { %v809_v33 = vadd.f32 %v801_v11, %v783_v24  ;;  %v702_v24 = vmul.f32 %v842_v37, %v5460_v41 }
 0x413   : > { %v834_v2 = vadd.f32 %v826_v35, %v809_v33  ;;  %v793_v35 = vld [vmem:[#allocation2 + $0x30] sm:$0xff] }
 0x415   : > { %v859_v49 = vadd.f32 %v851_v50, %v834_v2  ;;  %v843_v50 = vld [vmem:[#allocation2 + $0x32] sm:$0xff] }
 0x41e   : > { %4230 = vmatmul.msk.bf16.gmra.mxu0 %vm921_vm0, %v2051_v25  ;;  %v867_v25 = vld [vmem:[#allocation9] sm:$0x1] }
 0x41f   : > { %v869_v42 = vadd.f32 %v868_v39, %v867_v25  ;;  %v727_v25 = vmul.f32 %v793_v35, %v5465_v34  ;;  %v818_v39 = vld [vmem:[#allocation2 + $0x31] sm:$0xff] }
 0x420   : > { %v752_v2 = vmul.f32 %v818_v39, %v5469_v10 }
 0x421   : > { %v5491_v51 = vperm.slane %v869_v42, 0 }
 0x423   : > { %7083 = vst [vmem:[#allocation34_spill] sm:$0xff] %v5491_v51  ;;  %v873_v45 = vadd.f32 %v5491_v51, %v859_v49  ;;  %v777_v49 = vmul.f32 %v843_v50, %v5474_v9 }
 0x425   : > { %v1282_v58 = vadd.f32 %v1262_v19, %v873_v45  ;;  %v677_v19 = vmul.f32 %v817_v32, %v5456_v46  ;;  %v794_v45 = vld [vmem:[#allocation2 + $0x40] sm:$0xff] }
 0x42c   : > { %v5479_v22 = vpop.f32.mrf.mxu1 }
 0x42d   : > { %7080 = vst [vmem:[#allocation31_spill] sm:$0xff] %v5479_v22 }
 0x42e   : > { %4231 = vmatmul.msk.bf16.gmra.mxu0 %vm921_vm0, %v2053_v59 }
 0x434   : > { %v5489_v40 = vpop.f32.mrf.mxu1 }
 0x435   : > { %7082 = vst [vmem:[#allocation33_spill] sm:$0xff] %v5489_v40 }
 0x43c   : > { %v5493_v55 = vpop.f32.mrf.mxu1 }
 0x43d   : > { %v1738_v33 = vsel %vm975_vm1, %v5493_v55, -inf }
 0x43e   : > { %4232 = vmatmul.msk.bf16.gmra.mxu0 %vm921_vm0, %v5430_v29 }
 0x442   : > { %v1373_v61 = vpop.xlane.xlu2 %1372 }
 0x443   : > { %v1641_v1 = vpop.f32.mrf.mxu0  ;;  %v1387_v30 = vsub.f32 %v5423_v26, %v1373_v61  ;;  %v660_v26 = vmul.f32 %v792_v54, %v5454_v48  ;;  %v803_v61 = vmul.f32 %v5477_v20, %v794_v45 }
 0x444   : > { %v5499_v57 = vadd.f32 %v1641_v1, %v1282_v58  ;;  %v5501_v62 = vpop.f32.mrf.mxu1  ;;  %v819_v1 = vld [vmem:[#allocation2 + $0x41] sm:$0xff] }
 0x445   : > { %v1399_v4 = vmul.f32 1.442695, %v1387_v30  ;;  %v685_v59 = vadd.f32 %v677_v19, %v660_v26  ;;  %v1741_v45 = vsel %vm975_vm1, %v5501_v62, -inf }
 0x446   : > { %7084 = vst [vmem:[#allocation35_spill] sm:$0xff] %v5499_v57 }
 0x447   : > { %4506 = vpow2.f32 %v1399_v4  ;;  %v710_v32 = vadd.f32 %v702_v24, %v685_v59  ;;  %v828_v4 = vmul.f32 %v5482_v18, %v819_v1 }
 0x449   : > { %v735_v37 = vadd.f32 %v727_v25, %v710_v32 }
 0x44a   : > { %v1382_v6 = vpop.xlane.xlu2 %1381 }
 0x44b   : > { %v1390_v56 = vsub.f32 %v5419_v15, %v1382_v6  ;;  %v760_v42 = vadd.f32 %v752_v2, %v735_v37  ;;  %v844_v6 = vld [vmem:[#allocation2 + $0x42] sm:$0xff]  ;;  %v5532_v26 = vpop.f32.mrf.mxu0 }
 0x44c   : > { %v5504_v27 = vpop.f32.mrf.mxu1  ;;  %7085 = vst [vmem:[#allocation36_spill] sm:$0xff] %v5532_v26 }
 0x44d   : > { %v5506_v13 = vpop.eup %4506  ;;  %v1405_v14 = vmul.f32 1.442695, %v1390_v56  ;;  %v785_v58 = vadd.f32 %v777_v49, %v760_v42 }
 0x44e   : > { %v1419_v29 = vsel %vm975_vm1, %v5506_v13, 0.0 }
 0x44f   : > { %1420 = vadd.xlane.f32.xlu0 %v1419_v29  ;;  %4508 = vpow2.f32 %v1405_v14  ;;  %v811_v30 = vadd.f32 %v803_v61, %v785_v58  ;;  %v853_v14 = vmul.f32 %v4455_v36, %v844_v6 }
 0x451   : > { %v836_v56 = vadd.f32 %v828_v4, %v811_v30  ;;  %v1744_v4 = vsel %vm975_vm1, %v5504_v27, -inf }
 0x453   : > { %v861_v29 = vadd.f32 %v853_v14, %v836_v56 }
 0x454   : > { %v5512_v17 = vpop.f32.mrf.mxu1 }
 0x455   : > { %v1747_v15 = vsel %vm975_vm1, %v5512_v17, -inf  ;;  %v5517_v11 = vpop.eup %4508  ;;  %v875_v19 = vadd.f32 %v5491_v51, %v861_v29 }
 0x456   : > { %1748 = vmax.xlane.f32.xlu2 %v1747_v15  ;;  %v1428_v54 = vsel %vm975_vm1, %v5517_v11, 0.0 }
 0x457   : > { %1739 = vmax.xlane.f32.xlu0 %v1738_v33  ;;  %1429 = vadd.xlane.f32.xlu1 %v1428_v54  ;;  %v1284_v59 = vadd.f32 %v5449_v44, %v875_v19  ;;  %v1376_v54 = vpop.xlane.xlu0 %1375 }
 0x458   : > { %v1388_v35 = vsub.f32 %v5428_v28, %v1376_v54 }
 0x45a   : > { %v1401_v25 = vmul.f32 1.442695, %v1388_v35 }
 0x45c   : > { %v5542_v33 = vpop.f32.mrf.mxu1  ;;  %4510 = vpow2.f32 %v1401_v25 }
 0x45d   : > { %v1750_v29 = vsel %vm975_vm1, %v5542_v33, -inf }
 0x45f   : > { %v5579_v14 = vpop.xlane.xlu0 %1426 }
 0x460   : > { %vm1520_vm6 = vweird.f32 %v5579_v14 }
 0x462   : > { %v5553_v2 = vpop.eup %4510 }
 0x463   : > { %v1422_v42 = vsel %vm975_vm1, %v5553_v2, 0.0 }
 0x464   : > { %v5547_v39 = vpop.f32.mrf.mxu1 }
 0x465   : > { %v1753_v49 = vsel %vm975_vm1, %v5547_v39, -inf }
 0x46c   : > { %v5555_v50 = vpop.f32.mrf.mxu1 }
 0x46e   : > { %1934 = vrot.lane.b32.xlu2 %v5206_v8, %s4949_s13 }
 0x470   : > { %1940 = vrot.lane.b32.xlu1 %v5183_v53, %s4949_s13  ;;  %s4879_s13 = scalar_lea.hbm %s4878_s28, 64 }
 0x471   : > { %p4880_p0 = scmp.ne.s32.totalorder %s4878_s28, %s4879_s13  ;;  %p4885_p4 = scmp.lt.s32.totalorder %s4883_s29, %s4879_s13 }
 0x473   : > { %p4881_p1 = pnand %p4880_p0, %p5035_p5  ;;  %p4886_p7 = por %p4885_p4, %p4884_p3 }
 0x474   : > { %v5567_v61 = vpop.f32.mrf.mxu1 }
 0x475   : > { %v1759_v30 = vsel %vm975_vm1, %v5567_v61, -inf  ;;  %p4882_p2 = pneg %p4881_p1 }
 0x476   : > { %2317 = vrot.lane.b32.xlu2 %v5190_v60, %s4950_s19 }
 0x477   : > { %p4887_p8 = pnand %p4886_p7, %p4882_p2 }
 0x47b   : > { %v1646_v24 = vpop.f32.mrf.mxu0 }
 0x47c   : > { %v5538_v15 = vadd.f32 %v1646_v24, %v1284_v59  ;;  %v1937_v24 = vpop.permute.xlu0 %1936 }
 0x47e   : > { %7086 = vst [vmem:[#allocation37_spill] sm:$0xff] %v5538_v15 }
 0x483   : > { %v5540_v36 = vpop.f32.mrf.mxu0 }
 0x484   : > { %7087 = vst [vmem:[#allocation38_spill] sm:$0xff] %v5540_v36 }
 0x48b   : > { %v5545_v32 = vpop.f32.mrf.mxu0 }
 0x48c   : > { %v2117_v6 = vsel %vm975_vm1, %v5545_v32, -inf }
 0x493   : > { %v5549_v37 = vpop.f32.mrf.mxu0 }
 0x494   : > { %v2120_v44 = vsel %vm975_vm1, %v5549_v37, -inf }
 0x495   : > { %2121 = vmax.xlane.f32.xlu0 %v2120_v44 }
 0x49a   : > { %1423 = vadd.xlane.f32.xlu1 %v1422_v42 }
 0x49b   : > { %v5559_v28 = vpop.f32.mrf.mxu0 }
 0x49c   : > { %v2123_v19 = vsel %vm975_vm1, %v5559_v28, -inf }
 0x49f   : > { %1754 = vmax.xlane.f32.xlu2 %v1753_v49 }
 0x4a2   : > { %1742 = vmax.xlane.f32.xlu1 %v1741_v45 }
 0x4a3   : > { %v5565_v58 = vpop.f32.mrf.mxu0 }
 0x4a4   : > { %v2126_v1 = vsel %vm975_vm1, %v5565_v58, -inf }
 0x4a5   : > { %2127 = vmax.xlane.f32.xlu0 %v2126_v1  ;;  %v1939_v1 = vpop.permute.xlu2 %1938 }
 0x4a7   : > { %1760 = vmax.xlane.f32.xlu2 %v1759_v30 }
 0x4aa   : > { %1745 = vmax.xlane.f32.xlu1 %v1744_v4 }
 0x4ab   : > { %v5577_v56 = vpop.f32.mrf.mxu0 }
 0x4ac   : > { %v2129_v54 = vsel %vm975_vm1, %v5577_v56, -inf }
 0x4af   : > { %2118 = vmax.xlane.f32.xlu2 %v2117_v6 }
 0x4b2   : > { %1751 = vmax.xlane.f32.xlu1 %v1750_v29 }
 0x4b3   : > { %v5585_v59 = vpop.f32.mrf.mxu0 }
 0x4b7   : > { %2124 = vmax.xlane.f32.xlu2 %v2123_v19 }
 0x4bb   : > { %v5591_v25 = vpop.f32.mrf.mxu0 }
 0x4bc   : > { %v2135_v44 = vsel %vm975_vm1, %v5591_v25, -inf }
 0x4bf   : > { %2130 = vmax.xlane.f32.xlu2 %v2129_v54 }
 0x4c2   : > { %v5589_v35 = vpop.xlane.xlu0 %1420 }
 0x4c3   : > { %v1498_v47 = vand.u32 2147483648, %v5589_v35  ;;  %vm1492_vm9 = vweird.f32 %v5589_v35 }
 0x4c5   : > { %v1499_v51 = vor.u32 1.1754944e-38, %v1498_v47 }
 0x4c7   : > { %2136 = vmax.xlane.f32.xlu2 %v2135_v44  ;;  %v5607_v44 = vpop.f32.mrf.mxu0 }
 0x4c9   : > { %v1749_v6 = vpop.xlane.xlu2 %1748 }
 0x4ca   : > { %v1740_v42 = vpop.xlane.xlu0 %1739  ;;  %v5602_v29 = vpop.xlane.xlu1 %1429  ;;  %v1765_v19 = vsub.f32 %v5512_v17, %v1749_v6  ;;  %v1756_v6 = vsel %vm975_vm1, %v5555_v50, -inf }
 0x4cb   : > { %v1762_v49 = vsub.f32 %v5493_v55, %v1740_v42  ;;  %2319 = vrot.lane.b32.xlu1 %v5183_v53, %s4950_s19  ;;  %v2132_v55 = vsel %vm975_vm1, %v5585_v59, -inf  ;;  %vm1534_vm3 = vweird.f32 %v5602_v29 }
 0x4cc   : > { %v1776_v54 = vmul.f32 1.442695, %v1765_v19 }
 0x4cd   : > { %v1770_v45 = vmul.f32 1.442695, %v1762_v49  ;;  %v2138_v49 = vsel %vm975_vm1, %v5607_v44, -inf }
 0x4cf   : > { %4512 = vpow2.f32 %v1770_v45 }
 0x4d0   : > { %4514 = vpow2.f32 %v1776_v54 }
 0x4d1   : > { %4516 = vrcp.f32 %v5589_v35 }
 0x4d5   : > { %v5598_v30 = vpop.eup %4512 }
 0x4d6   : > { %v1786_v4 = vsel %vm975_vm1, %v5598_v30, 0.0  ;;  %v5611_v45 = vpop.eup %4514 }
 0x4d7   : > { %1787 = vadd.xlane.f32.xlu0 %v1786_v4  ;;  %v1795_v17 = vsel %vm975_vm1, %v5611_v45, 0.0  ;;  %v1935_v4 = vpop.permute.xlu2 %1934  ;;  %v4517_v19 = vpop.eup %4516 }
 0x4d8   : > { %vm1493_vm8 = vweird.f32 %v4517_v19 }
 0x4d9   : > { %vm5642_vm10 = vmor %vm1492_vm9, %vm1493_vm8 }
 0x4df   : > { %2133 = vmax.xlane.f32.xlu0 %v2132_v55 }
 0x4e2   : > { %v1941_v42 = vpop.permute.xlu1 %1940 }
 0x4e3   : > { %1962 = vmatpush.bf16.msra.mxu2 %v1941_v42  ;;  %v5620_v42 = vpop.permute.xlu2 %2317 }
 0x4e7   : > { %2139 = vmax.xlane.f32.xlu0 %v2138_v49  ;;  %1963 = vmatpush.bf16.msra.mxu2 %v1939_v1  ;;  %v1488_v1 = vmul.f32 %v4517_v19, %v5589_v35 }
 0x4e9   : > { %v1489_v49 = vsub.f32 1.0, %v1488_v1 }
 0x4eb   : > { %1964 = vmatpush.bf16.msra.mxu2 %v1937_v24 }
 0x4ef   : > { %1796 = vadd.xlane.f32.xlu0 %v1795_v17  ;;  %1965 = vmatpush.bf16.msra.mxu2 %v1935_v4 }
 0x4f5   : > { %1757 = vmax.xlane.f32.xlu1 %v1756_v6  ;;  %v1490_v6 = vmul.f32 %v4517_v19, %v1489_v49  ;;  %v1496_v49 = vand.u32 2147483647, %v5589_v35 }
 0x4f7   : > { %v1491_v1 = vadd.f32 %v4517_v19, %v1490_v6  ;;  %vm1497_vm12 = vcmp.eq.f32.partialorder %v1496_v49, 8.507059e+37 }
 0x4f9   : > { %v1495_v35 = vsel %vm5642_vm10, %v4517_v19, %v1491_v1 }
 0x4fa   : > { %v1500_v9 = vsel %vm1497_vm12, %v1499_v51, %v1495_v35 }
 0x4fb   : > { %v1547_v19 = vmul.f32 %v5506_v13, %v1500_v9  ;;  %v1538_v13 = vand.u32 2147483647, %v5602_v29 }
 0x4fd   : > { %vm1539_vm8 = vcmp.eq.f32.partialorder %v1538_v13, 8.507059e+37 }
 0x508   : > { %v2122_v55 = vpop.xlane.xlu0 %2121 }
 0x509   : > { %v2142_v54 = vsub.f32 %v5549_v37, %v2122_v55 }
 0x50b   : > { %v2151_v24 = vmul.f32 1.442695, %v2142_v54 }
 0x50d   : > { %4518 = vpow2.f32 %v2151_v24  ;;  %v1424_v17 = vpop.xlane.xlu1 %1423 }
 0x50e   : > { %4520 = vrcp.f32 %v5602_v29  ;;  %v1512_v57 = vand.u32 2147483648, %v1424_v17  ;;  %vm1506_vm13 = vweird.f32 %v1424_v17 }
 0x50f   : > { %4522 = vrcp.f32 %v1424_v17 }
 0x510   : > { %4524 = vrcp.f32 %v5579_v14  ;;  %v1513_v20 = vor.u32 1.1754944e-38, %v1512_v57 }
 0x512   : > { %v5626_v40 = vpop.xlane.xlu2 %1754 }
 0x513   : > { %v5624_v4 = vpop.eup %4518 }
 0x514   : > { %v2168_v37 = vsel %vm975_vm1, %v5624_v4, 0.0  ;;  %v5630_v55 = vpop.eup %4520 }
 0x515   : > { %2169 = vadd.xlane.f32.xlu0 %v2168_v37  ;;  %v4523_v54 = vpop.eup %4522  ;;  %v1743_v36 = vpop.xlane.xlu1 %1742  ;;  %v1530_v43 = vmul.f32 %v5630_v55, %v5602_v29  ;;  %vm1535_vm2 = vweird.f32 %v5630_v55 }
 0x516   : > { %v5632_v24 = vpop.eup %4524  ;;  %v1502_v7 = vmul.f32 %v4523_v54, %v1424_v17  ;;  %v1763_v26 = vsub.f32 %v5501_v62, %v1743_v36  ;;  %vm1507_vm11 = vweird.f32 %v4523_v54  ;;  %v1510_v62 = vand.u32 2147483647, %v1424_v17  ;;  %vm5670_vm5 = vmor %vm1534_vm3, %vm1535_vm2 }
 0x517   : > { %v1516_v37 = vmul.f32 %v5632_v24, %v5579_v14  ;;  %vm1508_vm14 = vmor %vm1506_vm13, %vm1507_vm11  ;;  %vm1521_vm4 = vweird.f32 %v5632_v24 }
 0x518   : > { %v1503_v15 = vsub.f32 1.0, %v1502_v7  ;;  %v1772_v22 = vmul.f32 1.442695, %v1763_v26  ;;  %v1531_v7 = vsub.f32 1.0, %v1530_v43  ;;  %vm1511_vm15 = vcmp.eq.f32.partialorder %v1510_v62, 8.507059e+37  ;;  %vm1522_vm7 = vmor %vm1520_vm6, %vm1521_vm4 }
 0x519   : > { %v1517_v10 = vsub.f32 1.0, %v1516_v37 }
 0x51a   : > { %v1504_v63 = vmul.f32 %v4523_v54, %v1503_v15  ;;  %v5646_v36 = vpop.xlane.xlu2 %1760  ;;  %4526 = vpow2.f32 %v1772_v22  ;;  %v1532_v46 = vmul.f32 %v5630_v55, %v1531_v7 }
 0x51c   : > { %v1505_v18 = vadd.f32 %v4523_v54, %v1504_v63  ;;  %v1518_v63 = vmul.f32 %v5632_v24, %v1517_v10  ;;  %v1533_v9 = vadd.f32 %v5630_v55, %v1532_v46  ;;  %v2128_v10 = vpop.xlane.xlu0 %2127 }
 0x51d   : > { %v1746_v26 = vpop.xlane.xlu1 %1745  ;;  %v2144_v49 = vsub.f32 %v5565_v58, %v2128_v10 }
 0x51e   : > { %v1509_v15 = vsel %vm1508_vm14, %v4523_v54, %v1505_v18  ;;  %v1764_v34 = vsub.f32 %v5504_v27, %v1746_v26  ;;  %v1519_v27 = vadd.f32 %v5632_v24, %v1518_v63  ;;  %v1524_v54 = vand.u32 2147483647, %v5579_v14 }
 0x51f   : > { %v1514_v41 = vsel %vm1511_vm15, %v1513_v20, %v1509_v15 }
 0x520   : > { %v1548_v47 = vmul.f32 %v5553_v2, %v1514_v41  ;;  %v5654_v22 = vpop.eup %4526  ;;  %v1774_v43 = vmul.f32 1.442695, %v1764_v34  ;;  %v1540_v41 = vand.u32 2147483648, %v5602_v29  ;;  %v1537_v29 = vsel %vm5670_vm5, %v5630_v55, %v1533_v9 }
 0x521   : > { %v1789_v51 = vsel %vm975_vm1, %v5654_v22, 0.0  ;;  %v1523_v62 = vsel %vm1522_vm7, %v5632_v24, %v1519_v27  ;;  %vm1525_vm9 = vcmp.eq.f32.partialorder %v1524_v54, 8.507059e+37  ;;  %v2155_v55 = vmul.f32 1.442695, %v2144_v49 }
 0x522   : > { %v2119_v57 = vpop.xlane.xlu2 %2118  ;;  %v1553_v17 = vpack.c.bf16 %v1548_v47, %v1547_v19  ;;  %4528 = vpow2.f32 %v1774_v43  ;;  %1790 = vadd.xlane.f32.xlu1 %v1789_v51  ;;  %v1541_v37 = vor.u32 1.1754944e-38, %v1540_v41  ;;  %v1767_v24 = vsub.f32 %v5547_v39, %v5626_v40 }
 0x523   : > { %v2141_v20 = vsub.f32 %v5545_v32, %v2119_v57  ;;  %v1526_v32 = vand.u32 2147483648, %v5579_v14 }
 0x524   : > { %4203 = vmatmul.msk.bf16.gmra.mxu3 %vm975_vm1, %v1553_v17  ;;  %v1542_v35 = vsel %vm1539_vm8, %v1541_v37, %v1537_v29  ;;  %v1780_v57 = vmul.f32 1.442695, %v1767_v24 }
 0x525   : > { %v2149_v34 = vmul.f32 1.442695, %v2141_v20  ;;  %v1752_v18 = vpop.xlane.xlu1 %1751  ;;  %v1527_v14 = vor.u32 1.1754944e-38, %v1526_v32  ;;  %v1550_v15 = vmul.f32 %v5517_v11, %v1542_v35 }
 0x526   : > { %v1766_v46 = vsub.f32 %v5542_v33, %v1752_v18 }
 0x527   : > { %4530 = vpow2.f32 %v2149_v34  ;;  %v1528_v26 = vsel %vm1525_vm9, %v1527_v14, %v1523_v62 }
 0x528   : > { %v5681_v1 = vpop.eup %4528  ;;  %v1778_v33 = vmul.f32 1.442695, %v1766_v46  ;;  %v1549_v19 = vmul.f32 %v5437_v38, %v1528_v26 }
 0x529   : > { %2313 = vrot.lane.b32.xlu0 %v5206_v8, %s4950_s19  ;;  %v1792_v6 = vsel %vm975_vm1, %v5681_v1, 0.0 }
 0x52a   : > { %4532 = vpow2.f32 %v1778_v33  ;;  %1793 = vadd.xlane.f32.xlu1 %v1792_v6  ;;  %v1554_v63 = vpack.c.bf16 %v1550_v15, %v1549_v19  ;;  %v2125_v51 = vpop.xlane.xlu2 %2124 }
 0x52b   : > { %4534 = vpow2.f32 %v2155_v55  ;;  %v2143_v29 = vsub.f32 %v5559_v28, %v2125_v51 }
 0x52c   : > { %4536 = vpow2.f32 %v1780_v57 }
 0x52d   : > { %v5687_v7 = vpop.eup %4530 }
 0x52e   : > { %v2165_v58 = vsel %vm975_vm1, %v5687_v7, 0.0 }
 0x52f   : > { %2166 = vadd.xlane.f32.xlu2 %v2165_v58 }
 0x530   : > { %v5693_v47 = vpop.eup %4532 }
 0x531   : > { %v1798_v43 = vsel %vm975_vm1, %v5693_v47, 0.0  ;;  %v5700_v17 = vpop.eup %4534 }
 0x532   : > { %1799 = vadd.xlane.f32.xlu1 %v1798_v43  ;;  %v2174_v38 = vsel %vm975_vm1, %v5700_v17, 0.0  ;;  %v2131_v11 = vpop.xlane.xlu2 %2130  ;;  %v5704_v40 = vpop.eup %4536 }
 0x533   : > { %v2145_v39 = vsub.f32 %v5577_v56, %v2131_v11  ;;  %v1801_v9 = vsel %vm975_vm1, %v5704_v40, 0.0 }
 0x534   : > { %4204 = vmatmul.msk.bf16.gmra.mxu3 %vm975_vm1, %v1554_v63 }
 0x535   : > { %v2157_v41 = vmul.f32 1.442695, %v2145_v39 }
 0x537   : > { %4538 = vpow2.f32 %v2157_v41 }
 0x53a   : > { %2175 = vadd.xlane.f32.xlu1 %v2174_v38  ;;  %v2137_v6 = vpop.xlane.xlu2 %2136 }
 0x53b   : > { %v2147_v35 = vsub.f32 %v5591_v25, %v2137_v6 }
 0x53d   : > { %v2320_v20 = vpop.permute.xlu1 %2319  ;;  %v5714_v10 = vpop.eup %4538 }
 0x53e   : > { %2341 = vmatpush.bf16.msrb.mxu1 %v2320_v20  ;;  %v2177_v18 = vsel %vm975_vm1, %v5714_v10, 0.0 }
 0x542   : > { %2342 = vmatpush.bf16.msrb.mxu1 %v5620_v42  ;;  %1802 = vadd.xlane.f32.xlu1 %v1801_v9  ;;  %v1769_v42 = vsub.f32 %v5567_v61, %v5646_v36 }
 0x544   : > { %v1784_v32 = vmul.f32 1.442695, %v1769_v42 }
 0x547   : > { %2315 = vrot.lane.b32.xlu2 %v5195_v3, %s4950_s19 }
 0x54a   : > { %v5712_v34 = vpop.xlane.xlu0 %1787 }
 0x54b   : > { %v1821_v42 = vand.u32 2147483648, %v5712_v34  ;;  %vm1815_vm11 = vweird.f32 %v5712_v34 }
 0x552   : > { %v2134_v27 = vpop.xlane.xlu0 %2133 }
 0x553   : > { %2178 = vadd.xlane.f32.xlu0 %v2177_v18  ;;  %v2146_v56 = vsub.f32 %v5585_v59, %v2134_v27  ;;  %v2153_v59 = vmul.f32 1.442695, %v2143_v29 }
 0x555   : > { %v2159_v13 = vmul.f32 1.442695, %v2146_v56 }
 0x557   : > { %4540 = vpow2.f32 %v2159_v13 }
 0x558   : > { %4542 = vpow2.f32 %v1784_v32  ;;  %v1819_v32 = vand.u32 2147483647, %v5712_v34 }
 0x55a   : > { %v2140_v46 = vpop.xlane.xlu0 %2139  ;;  %vm1820_vm15 = vcmp.eq.f32.partialorder %v1819_v32, 8.507059e+37 }
 0x55b   : > { %v2148_v54 = vsub.f32 %v5607_v44, %v2140_v46 }
 0x55d   : > { %v5721_v2 = vpop.eup %4540  ;;  %v2163_v33 = vmul.f32 1.442695, %v2148_v54 }
 0x55e   : > { %v2180_v49 = vsel %vm975_vm1, %v5721_v2, 0.0  ;;  %v5727_v37 = vpop.eup %4542 }
 0x55f   : > { %2181 = vadd.xlane.f32.xlu1 %v2180_v49  ;;  %4544 = vpow2.f32 %v2163_v33  ;;  %v1807_v61 = vsel %vm975_vm1, %v5727_v37, 0.0 }
 0x560   : > { %4546 = vpow2.f32 %v2153_v59 }
 0x562   : > { %v5761_v24 = vpop.xlane.xlu0 %1796 }
 0x563   : > { %vm1857_vm5 = vweird.f32 %v5761_v24  ;;  %v1863_v32 = vand.u32 2147483648, %v5761_v24 }
 0x565   : > { %v5734_v36 = vpop.eup %4544 }
 0x566   : > { %v5736_v62 = vpop.eup %4546  ;;  %v2186_v55 = vsel %vm975_vm1, %v5734_v36, 0.0 }
 0x567   : > { %2439 = vrot.lane.b32.xlu0 %v5192_v0, %s4951_s8  ;;  %1808 = vadd.xlane.f32.xlu1 %v1807_v61  ;;  %v2171_v26 = vsel %vm975_vm1, %v5736_v62, 0.0 }
 0x568   : > { %v1758_v44 = vpop.xlane.xlu1 %1757 }
 0x569   : > { %v1768_v28 = vsub.f32 %v5555_v50, %v1758_v44  ;;  %v2161_v50 = vmul.f32 1.442695, %v2147_v35 }
 0x56b   : > { %v1782_v14 = vmul.f32 1.442695, %v1768_v28 }
 0x56d   : > { %4548 = vpow2.f32 %v1782_v14 }
 0x56e   : > { %4550 = vpow2.f32 %v2161_v50 }
 0x56f   : > { %2427 = vrot.lane.b32.xlu0 %v5167_v12, %s4951_s8  ;;  %2187 = vadd.xlane.f32.xlu1 %v2186_v55  ;;  %4552 = vrcp.f32 %v5712_v34 }
 0x570   : > { %2172 = vadd.xlane.f32.xlu2 %v2171_v26 }
 0x573   : > { %v5745_v58 = vpop.eup %4548 }
 0x574   : > { %v1804_v25 = vsel %vm975_vm1, %v5745_v58, 0.0  ;;  %v5751_v15 = vpop.eup %4550 }
 0x575   : > { %v2183_v19 = vsel %vm975_vm1, %v5751_v15, 0.0  ;;  %v4553_v43 = vpop.eup %4552 }
 0x576   : > { %v1811_v51 = vmul.f32 %v4553_v43, %v5712_v34  ;;  %vm1816_vm10 = vweird.f32 %v4553_v43  ;;  %v1822_v34 = vor.u32 1.1754944e-38, %v1821_v42 }
 0x577   : > { %2808 = vrot.lane.b32.xlu0 %v5171_v23, %s4952_s9  ;;  %vm5793_vm12 = vmor %vm1815_vm11, %vm1816_vm10 }
 0x578   : > { %1805 = vadd.xlane.f32.xlu2 %v1804_v25  ;;  %v1812_v38 = vsub.f32 1.0, %v1811_v51 }
 0x57a   : > { %v1813_v20 = vmul.f32 %v4553_v43, %v1812_v38 }
 0x57c   : > { %v1814_v27 = vadd.f32 %v4553_v43, %v1813_v20 }
 0x57e   : > { %v1818_v61 = vsel %vm5793_vm12, %v4553_v43, %v1814_v27 }
 0x57f   : > { %2433 = vrot.lane.b32.xlu0 %v5223_v21, %s4951_s8  ;;  %v1823_v55 = vsel %vm1820_vm15, %v1822_v34, %v1818_v61 }
 0x580   : > { %2184 = vadd.xlane.f32.xlu2 %v2183_v19 }
 0x587   : > { %2696 = vrot.lane.b32.xlu0 %v5190_v60, %s4951_s8 }
 0x588   : > { %2820 = vrot.lane.b32.xlu1 %v5181_v52, %s4952_s9  ;;  %v5768_v63 = vpop.xlane.xlu0 %2169 }
 0x589   : > { %4554 = vrcp.f32 %v5768_v63  ;;  %vm2208_vm6 = vweird.f32 %v5768_v63 }
 0x58f   : > { %3075 = vrot.lane.b32.xlu0 %v5190_v60, %s4952_s9  ;;  %v5776_v11 = vpop.eup %4554 }
 0x590   : > { %2437 = vrot.lane.b32.xlu1 %v5177_v31, %s4951_s8  ;;  %v2204_v9 = vmul.f32 %v5776_v11, %v5768_v63  ;;  %vm2209_vm4 = vweird.f32 %v5776_v11 }
 0x591   : > { %vm5828_vm8 = vmor %vm2208_vm6, %vm2209_vm4 }
 0x592   : > { %v2205_v46 = vsub.f32 1.0, %v2204_v9 }
 0x594   : > { %v2206_v14 = vmul.f32 %v5776_v11, %v2205_v46 }
 0x595   : > { %v1791_v57 = vpop.xlane.xlu1 %1790 }
 0x596   : > { %4556 = vrcp.f32 %v1791_v57  ;;  %v1835_v54 = vand.u32 2147483648, %v1791_v57  ;;  %v1833_v33 = vand.u32 2147483647, %v1791_v57  ;;  %vm1829_vm14 = vweird.f32 %v1791_v57 }
 0x597   : > { %4558 = vrcp.f32 %v5761_v24  ;;  %v2207_v9 = vadd.f32 %v5776_v11, %v2206_v14 }
 0x598   : > { %2435 = vrot.lane.b32.xlu1 %v5197_v5, %s4951_s8  ;;  %2441 = vrot.lane.b32.xlu2 %v5181_v52, %s4951_s8  ;;  %v1836_v35 = vor.u32 1.1754944e-38, %v1835_v54  ;;  %vm1834_vm3 = vcmp.eq.f32.partialorder %v1833_v33, 8.507059e+37  ;;  %v2212_v54 = vand.u32 2147483647, %v5768_v63 }
 0x59a   : > { %vm2213_vm12 = vcmp.eq.f32.partialorder %v2212_v54, 8.507059e+37 }
 0x59c   : > { %v4557_v39 = vpop.eup %4556 }
 0x59d   : > { %v1825_v41 = vmul.f32 %v4557_v39, %v1791_v57  ;;  %v5781_v18 = vpop.xlane.xlu1 %1793  ;;  %v5784_v56 = vpop.eup %4558  ;;  %vm1830_vm13 = vweird.f32 %v4557_v39 }
 0x59e   : > { %4560 = vrcp.f32 %v5781_v18  ;;  %v1853_v44 = vmul.f32 %v5784_v56, %v5761_v24  ;;  %vm1831_vm2 = vmor %vm1829_vm14, %vm1830_vm13  ;;  %vm1858_vm7 = vweird.f32 %v5784_v56  ;;  %v1849_v34 = vand.u32 2147483648, %v5781_v18 }
 0x59f   : > { %v1826_v13 = vsub.f32 1.0, %v1825_v41  ;;  %vm1843_vm11 = vweird.f32 %v5781_v18 }
 0x5a0   : > { %2806 = vrot.lane.b32.xlu1 %v5167_v12, %s4952_s9  ;;  %2818 = vrot.lane.b32.xlu2 %v5192_v0, %s4952_s9  ;;  %v1854_v19 = vsub.f32 1.0, %v1853_v44  ;;  %v2314_v44 = vpop.permute.xlu0 %2313 }
 0x5a1   : > { %v1827_v49 = vmul.f32 %v4557_v39, %v1826_v13  ;;  %v2214_v13 = vand.u32 2147483648, %v5768_v63 }
 0x5a2   : > { %v5797_v59 = vpop.xlane.xlu2 %2166  ;;  %v1855_v42 = vmul.f32 %v5784_v56, %v1854_v19 }
 0x5a3   : > { %4562 = vrcp.f32 %v5797_v59  ;;  %v1828_v28 = vadd.f32 %v4557_v39, %v1827_v49  ;;  %v2211_v49 = vsel %vm5828_vm8, %v5776_v11, %v2207_v9  ;;  %v2200_v61 = vand.u32 2147483648, %v5797_v59 }
 0x5a4   : > { %v5804_v6 = vpop.eup %4560  ;;  %v2198_v63 = vand.u32 2147483647, %v5797_v59  ;;  %v2215_v11 = vor.u32 1.1754944e-38, %v2214_v13  ;;  %vm2194_vm14 = vweird.f32 %v5797_v59 }
 0x5a5   : > { %v1832_v26 = vsel %vm1831_vm2, %v4557_v39, %v1828_v28  ;;  %v1839_v50 = vmul.f32 %v5804_v6, %v5781_v18  ;;  %v5809_v25 = vpop.xlane.xlu1 %1799  ;;  %v1922_v39 = vmul.f32 %v5598_v30, %v1823_v55  ;;  %vm1844_vm9 = vweird.f32 %v5804_v6  ;;  %vm5869_vm2 = vmor %vm1857_vm5, %vm1858_vm7 }
 0x5a6   : > { %v1837_v43 = vsel %vm1834_vm3, %v1836_v35, %v1832_v26  ;;  %4564 = vrcp.f32 %v5809_v25  ;;  %v1856_v35 = vadd.f32 %v5784_v56, %v1855_v42  ;;  %v1847_v55 = vand.u32 2147483647, %v5781_v18  ;;  %vm5851_vm13 = vmor %vm1843_vm11, %vm1844_vm9 }
 0x5a7   : > { %v1598_v51 = vpop.f32.mrf.mxu3  ;;  %v1923_v57 = vmul.f32 %v5654_v22, %v1837_v43  ;;  %v1840_v38 = vsub.f32 1.0, %v1839_v50  ;;  %v1861_v18 = vand.u32 2147483647, %v5761_v24  ;;  %vm2199_vm3 = vcmp.eq.f32.partialorder %v2198_v63, 8.507059e+37 }
 0x5a8   : > { %2431 = vrot.lane.b32.xlu1 %v5219_v16, %s4951_s8  ;;  %2816 = vrot.lane.b32.xlu2 %v5177_v31, %s4952_s9  ;;  %vm1848_vm4 = vcmp.eq.f32.partialorder %v1847_v55, 8.507059e+37  ;;  %v1864_v42 = vor.u32 1.1754944e-38, %v1863_v32  ;;  %vm1871_vm7 = vweird.f32 %v5809_v25 }
 0x5a9   : > { %v4563_v20 = vpop.eup %4562  ;;  %v1841_v41 = vmul.f32 %v5804_v6, %v1840_v38  ;;  %v1930_v30 = vpack.c.bf16 %v1923_v57, %v1922_v39  ;;  %v2216_v38 = vsel %vm2213_vm12, %v2215_v11, %v2211_v49  ;;  %v2201_v39 = vor.u32 1.1754944e-38, %v2200_v61 }
 0x5aa   : > { %v2190_v22 = vmul.f32 %v4563_v20, %v5797_v59  ;;  %v2316_v27 = vpop.permute.xlu2 %2315  ;;  %vm2195_vm10 = vweird.f32 %v4563_v20  ;;  %v2302_v24 = vmul.f32 %v5624_v4, %v2216_v38  ;;  %vm1862_vm5 = vcmp.eq.f32.partialorder %v1861_v18, 8.507059e+37 }
 0x5ab   : > { %2343 = vmatpush.bf16.msrb.mxu1 %v2316_v27  ;;  %v1842_v33 = vadd.f32 %v5804_v6, %v1841_v41  ;;  %4217 = vmatmul.msk.bf16.vlgmr.msra.gmra.mxu2 %vm975_vm1, %v1930_v30  ;;  %vm2196_vm15 = vmor %vm2194_vm14, %vm2195_vm10 }
 0x5ac   : > { %v2191_v29 = vsub.f32 1.0, %v2190_v22  ;;  %v5847_v50 = vpop.eup %4564 }
 0x5ad   : > { %v5842_v14 = vpop.xlane.xlu1 %2175  ;;  %v1846_v9 = vsel %vm5851_vm13, %v5804_v6, %v1842_v33  ;;  %v1867_v27 = vmul.f32 %v5847_v50, %v5809_v25  ;;  %v1860_v6 = vsel %vm5869_vm2, %v5784_v56, %v1856_v35  ;;  %vm1872_vm6 = vweird.f32 %v5847_v50 }
 0x5ae   : > { %v2192_v28 = vmul.f32 %v4563_v20, %v2191_v29  ;;  %v1865_v54 = vsel %vm1862_vm5, %v1864_v42, %v1860_v6  ;;  %vm1873_vm8 = vmor %vm1871_vm7, %vm1872_vm6  ;;  %v4341_v6 = vld [vmem:[#allocation6 + $0x10] sm:$0xff] }
 0x5af   : > { %v1600_v26 = vpop.f32.mrf.mxu3  ;;  %2344 = vmatpush.bf16.msrb.mxu1 %v2314_v44  ;;  %v1868_v29 = vsub.f32 1.0, %v1867_v27  ;;  %v1925_v4 = vmul.f32 %v5611_v45, %v1865_v54  ;;  %v1875_v45 = vand.u32 2147483647, %v5809_v25  ;;  %v4342_v27 = vld [vmem:[#allocation6 + $0x18] sm:$0xff]  ;;  %2018 = vmatpush.bf16.msra.mxu3 %v4341_v6 }
 0x5b0   : > { %v2193_v43 = vadd.f32 %v4563_v20, %v2192_v28  ;;  %v1610_v57 = vpack.c.bf16 %v1600_v26, %v1598_v51  ;;  %2812 = vrot.lane.b32.xlu1 %v5223_v21, %s4952_s9  ;;  %2814 = vrot.lane.b32.xlu2 %v5197_v5, %s4952_s9  ;;  %v1850_v51 = vor.u32 1.1754944e-38, %v1849_v34  ;;  %v1877_v34 = vand.u32 2147483648, %v5809_v25 }
 0x5b1   : > { %vm1876_vm10 = vcmp.eq.f32.partialorder %v1875_v45, 8.507059e+37  ;;  %2397 = vmatpush.bf16.msrb.mxu2 %v4342_v27 }
 0x5b2   : > { %v2197_v41 = vsel %vm2196_vm15, %v4563_v20, %v2193_v43  ;;  %4211 = vmatmul.msk.bf16.vlgmr.msrb.gmra.mxu3 %vm921_vm0, %v1610_v57  ;;  %v1851_v30 = vsel %vm1848_vm4, %v1850_v51, %v1846_v9  ;;  %v1878_v19 = vor.u32 1.1754944e-38, %v1877_v34  ;;  %vm2236_vm15 = vweird.f32 %v5842_v14 }
 0x5b3   : > { %v2202_v22 = vsel %vm2199_vm3, %v2201_v39, %v2197_v41  ;;  %v1924_v33 = vmul.f32 %v5681_v1, %v1851_v30 }
 0x5b4   : > { %v2301_v13 = vmul.f32 %v5687_v7, %v2202_v22  ;;  %v1869_v7 = vmul.f32 %v5847_v50, %v1868_v29  ;;  %v2240_v29 = vand.u32 2147483647, %v5842_v14 }
 0x5b5   : > { %v1803_v20 = vpop.xlane.xlu1 %1802  ;;  %v1931_v56 = vpack.c.bf16 %v1925_v4, %v1924_v33 }
 0x5b6   : > { %v2309_v46 = vpack.c.bf16 %v2302_v24, %v2301_v13  ;;  %4566 = vrcp.f32 %v1803_v20  ;;  %v1870_v44 = vadd.f32 %v5847_v50, %v1869_v7  ;;  %v1891_v11 = vand.u32 2147483648, %v1803_v20 }
 0x5b7   : > { %v1603_v49 = vpop.f32.mrf.mxu3  ;;  %v1889_v55 = vand.u32 2147483647, %v1803_v20  ;;  %vm1885_vm11 = vweird.f32 %v1803_v20  ;;  %4568 = vrcp.f32 %v5842_v14  ;;  %vm2241_vm3 = vcmp.eq.f32.partialorder %v2240_v29, 8.507059e+37 }
 0x5b8   : > { %3077 = vrot.lane.b32.xlu1 %v5183_v53, %s4952_s9  ;;  %2429 = vrot.lane.b32.xlu2 %v5171_v23, %s4951_s8  ;;  %v1874_v26 = vsel %vm1873_vm8, %v5847_v50, %v1870_v44  ;;  %v1892_v57 = vor.u32 1.1754944e-38, %v1891_v11 }
 0x5b9   : > { %4233 = vmatmul.msk.bf16.vlgmr.msrb.gmra.mxu1 %vm975_vm1, %v2309_v46  ;;  %v1879_v18 = vsel %vm1876_vm10, %v1878_v19, %v1874_v26  ;;  %vm1890_vm13 = vcmp.eq.f32.partialorder %v1889_v55, 8.507059e+37  ;;  %v2242_v46 = vand.u32 2147483648, %v5842_v14 }
 0x5ba   : > { %v1926_v39 = vmul.f32 %v5693_v47, %v1879_v18 }
 0x5bb   : > { %4218 = vmatmul.msk.bf16.gmra.mxu2 %vm975_vm1, %v1931_v56 }
 0x5bc   : > { %v4567_v32 = vpop.eup %4566 }
 0x5bd   : > { %v1881_v61 = vmul.f32 %v4567_v32, %v1803_v20  ;;  %vm1886_vm9 = vweird.f32 %v4567_v32  ;;  %v4569_v51 = vpop.eup %4568 }
 0x5be   : > { %vm1887_vm12 = vmor %vm1885_vm11, %vm1886_vm9  ;;  %v2232_v41 = vmul.f32 %v4569_v51, %v5842_v14  ;;  %vm2237_vm14 = vweird.f32 %v4569_v51 }
 0x5bf   : > { %v1605_v1 = vpop.f32.mrf.mxu3  ;;  %v1882_v28 = vsub.f32 1.0, %v1881_v61  ;;  %vm2238_vm2 = vmor %vm2236_vm15, %vm2237_vm14  ;;  %v2243_v61 = vor.u32 1.1754944e-38, %v2242_v46 }
 0x5c0   : > { %v1611_v63 = vpack.c.bf16 %v1605_v1, %v1603_v49  ;;  %2810 = vrot.lane.b32.xlu2 %v5219_v16, %s4952_s9  ;;  %v2233_v47 = vsub.f32 1.0, %v2232_v41 }
 0x5c1   : > { %v1883_v35 = vmul.f32 %v4567_v32, %v1882_v28 }
 0x5c2   : > { %4212 = vmatmul.msk.bf16.gmra.mxu3 %vm921_vm0, %v1611_v63  ;;  %v2234_v42 = vmul.f32 %v4569_v51, %v2233_v47 }
 0x5c3   : > { %v1884_v43 = vadd.f32 %v4567_v32, %v1883_v35 }
 0x5c4   : > { %v2235_v30 = vadd.f32 %v4569_v51, %v2234_v42 }
 0x5c5   : > { %v1888_v38 = vsel %vm1887_vm12, %v4567_v32, %v1884_v43 }
 0x5c6   : > { %v1893_v25 = vsel %vm1890_vm13, %v1892_v57, %v1888_v38  ;;  %v2239_v4 = vsel %vm2238_vm2, %v4569_v51, %v2235_v30 }
 0x5c7   : > { %v1927_v9 = vmul.f32 %v5704_v40, %v1893_v25  ;;  %v5913_v40 = vpop.xlane.xlu0 %2178  ;;  %v2244_v28 = vsel %vm2241_vm3, %v2243_v61, %v2239_v4 }
 0x5c8   : > { %2698 = vrot.lane.b32.xlu2 %v5183_v53, %s4951_s8  ;;  %v2304_v57 = vmul.f32 %v5700_v17, %v2244_v28 }
 0x5c9   : > { %v1932_v59 = vpack.c.bf16 %v1927_v9, %v1926_v39 }
 0x5cb   : > { %4219 = vmatmul.msk.bf16.gmra.mxu2 %vm975_vm1, %v1932_v59 }
 0x5d0   : > { %2694 = vrot.lane.b32.xlu2 %v5195_v3, %s4951_s8 }
 0x5d2   : > { %v5907_v50 = vpop.xlane.xlu1 %2181 }
 0x5da   : > { %v5910_v22 = vpop.xlane.xlu1 %1808 }
 0x5db   : > { %4570 = vrcp.f32 %v5910_v22  ;;  %vm1913_vm8 = vweird.f32 %v5910_v22  ;;  %v1919_v51 = vand.u32 2147483648, %v5910_v22  ;;  %v1917_v41 = vand.u32 2147483647, %v5910_v22 }
 0x5dc   : > { %4572 = vrcp.f32 %v5913_v40 }
 0x5dd   : > { %v1920_v46 = vor.u32 1.1754944e-38, %v1919_v51  ;;  %vm1918_vm13 = vcmp.eq.f32.partialorder %v1917_v41, 8.507059e+37 }
 0x5e1   : > { %v5916_v13 = vpop.eup %4570 }
 0x5e2   : > { %v1909_v20 = vmul.f32 %v5916_v13, %v5910_v22  ;;  %v5922_v54 = vpop.eup %4572  ;;  %vm1914_vm6 = vweird.f32 %v5916_v13  ;;  %v5934_v43 = vpop.xlane.xlu1 %2187 }
 0x5e3   : > { %v2173_v24 = vpop.xlane.xlu2 %2172  ;;  %v2246_v44 = vmul.f32 %v5922_v54, %v5913_v40  ;;  %vm5948_vm10 = vmor %vm1913_vm8, %vm1914_vm6  ;;  %vm2251_vm12 = vweird.f32 %v5922_v54  ;;  %vm2250_vm6 = vweird.f32 %v5913_v40 }
 0x5e4   : > { %4574 = vrcp.f32 %v2173_v24  ;;  %v1910_v7 = vsub.f32 1.0, %v1909_v20  ;;  %v2228_v45 = vand.u32 2147483648, %v2173_v24  ;;  %v2226_v11 = vand.u32 2147483647, %v2173_v24 }
 0x5e5   : > { %4576 = vrcp.f32 %v5907_v50  ;;  %v2247_v35 = vsub.f32 1.0, %v2246_v44  ;;  %vm2222_vm5 = vweird.f32 %v2173_v24 }
 0x5e6   : > { %v1911_v14 = vmul.f32 %v5916_v13, %v1910_v7  ;;  %v2229_v25 = vor.u32 1.1754944e-38, %v2228_v45  ;;  %vm2227_vm9 = vcmp.eq.f32.partialorder %v2226_v11, 8.507059e+37  ;;  %v2256_v11 = vand.u32 2147483648, %v5913_v40 }
 0x5e7   : > { %v2248_v59 = vmul.f32 %v5922_v54, %v2247_v35 }
 0x5e8   : > { %v1912_v18 = vadd.f32 %v5916_v13, %v1911_v14 }
 0x5ea   : > { %v4575_v49 = vpop.eup %4574  ;;  %v1916_v20 = vsel %vm5948_vm10, %v5916_v13, %v1912_v18 }
 0x5eb   : > { %v5926_v33 = vpop.eup %4576  ;;  %v2218_v56 = vmul.f32 %v4575_v49, %v2173_v24  ;;  %v1806_v32 = vpop.xlane.xlu2 %1805  ;;  %vm2223_vm4 = vweird.f32 %v4575_v49  ;;  %v1921_v61 = vsel %vm1918_vm13, %v1920_v46, %v1916_v20  ;;  %v4713_v20 = vld [vmem:[#allocation2 + $0x40] sm:$0xff] }
 0x5ec   : > { %4578 = vrcp.f32 %v1806_v32  ;;  %v2260_v34 = vmul.f32 %v5926_v33, %v5907_v50  ;;  %vm2224_vm7 = vmor %vm2222_vm5, %vm2223_vm4  ;;  %v1905_v42 = vand.u32 2147483648, %v1806_v32  ;;  %v1903_v22 = vand.u32 2147483647, %v1806_v32 }
 0x5ed   : > { %v2219_v1 = vsub.f32 1.0, %v2218_v56  ;;  %vm1899_vm14 = vweird.f32 %v1806_v32  ;;  %vm2265_vm15 = vweird.f32 %v5926_v33  ;;  %vm2264_vm4 = vweird.f32 %v5907_v50 }
 0x5ee   : > { %v2261_v19 = vsub.f32 1.0, %v2260_v34  ;;  %v1906_v56 = vor.u32 1.1754944e-38, %v1905_v42  ;;  %vm1904_vm3 = vcmp.eq.f32.partialorder %v1903_v22, 8.507059e+37  ;;  %vm5980_vm5 = vmor %vm2264_vm4, %vm2265_vm15  ;;  %v662_v46 = vmul.f32 %v4713_v20, %v5454_v48 }
 0x5ef   : > { %v2220_v63 = vmul.f32 %v4575_v49, %v2219_v1  ;;  %v2270_v1 = vand.u32 2147483648, %v5907_v50 }
 0x5f0   : > { %v2262_v6 = vmul.f32 %v5926_v33, %v2261_v19  ;;  %v1929_v19 = vmul.f32 %v5727_v37, %v1921_v61 }
 0x5f1   : > { %v2221_v55 = vadd.f32 %v4575_v49, %v2220_v63  ;;  %v2268_v63 = vand.u32 2147483647, %v5907_v50  ;;  %v2254_v50 = vand.u32 2147483647, %v5913_v40  ;;  %v2440_v40 = vpop.permute.xlu0 %2439 }
 0x5f2   : > { %v4579_v26 = vpop.eup %4578  ;;  %v2263_v7 = vadd.f32 %v5926_v33, %v2262_v6 }
 0x5f3   : > { %v2225_v38 = vsel %vm2224_vm7, %v4575_v49, %v2221_v55  ;;  %v1895_v39 = vmul.f32 %v4579_v26, %v1806_v32  ;;  %v5938_v9 = vpop.xlane.xlu2 %2184  ;;  %vm1900_vm11 = vweird.f32 %v4579_v26  ;;  %v2249_v49 = vadd.f32 %v5922_v54, %v2248_v59  ;;  %vm2252_vm7 = vmor %vm2250_vm6, %vm2251_vm12 }
 0x5f4   : > { %4580 = vrcp.f32 %v5938_v9  ;;  %v2230_v17 = vsel %vm2227_vm9, %v2229_v25, %v2225_v38  ;;  %vm5961_vm2 = vmor %vm1899_vm14, %vm1900_vm11  ;;  %v2271_v38 = vor.u32 1.1754944e-38, %v2270_v1  ;;  %vm2269_vm8 = vcmp.eq.f32.partialorder %v2268_v63, 8.507059e+37 }
 0x5f5   : > { %v1896_v27 = vsub.f32 1.0, %v1895_v39  ;;  %4582 = vrcp.f32 %v5934_v43  ;;  %v2303_v24 = vmul.f32 %v5736_v62, %v2230_v17  ;;  %v2253_v37 = vsel %vm2252_vm7, %v5922_v54, %v2249_v49  ;;  %v7106_v49 = vld [vmem:[#allocation23_spill] sm:$0xff] }
 0x5f6   : > { %v2257_v39 = vor.u32 1.1754944e-38, %v2256_v11  ;;  %vm2255_vm9 = vcmp.eq.f32.partialorder %v2254_v50, 8.507059e+37  ;;  %v2462_v17 = vsel %vm921_vm0, %v2440_v40, 0  ;;  %vm2278_vm12 = vweird.f32 %v5938_v9  ;;  %v7111_v11 = vld [vmem:[#allocation24_spill] sm:$0xff] }
 0x5f7   : > { %v1897_v30 = vmul.f32 %v4579_v26, %v1896_v27  ;;  %v2310_v29 = vpack.c.bf16 %v2304_v57, %v2303_v24  ;;  %v2267_v57 = vsel %vm5980_vm5, %v5926_v33, %v2263_v7  ;;  %v2298_v1 = vand.u32 2147483648, %v5934_v43 }
 0x5f8   : > { %v2272_v59 = vsel %vm2269_vm8, %v2271_v38, %v2267_v57  ;;  %v2258_v27 = vsel %vm2255_vm9, %v2257_v39, %v2253_v37  ;;  %vm2292_vm14 = vweird.f32 %v5934_v43 }
 0x5f9   : > { %v1898_v4 = vadd.f32 %v4579_v26, %v1897_v30  ;;  %4234 = vmatmul.msk.bf16.gmra.mxu1 %vm975_vm1, %v2310_v29  ;;  %v2306_v47 = vmul.f32 %v5721_v2, %v2272_v59  ;;  %v2305_v42 = vmul.f32 %v5714_v10, %v2258_v27  ;;  %v4714_v2 = vld [vmem:[#allocation2 + $0x41] sm:$0xff]  ;;  %v2284_v10 = vand.u32 2147483648, %v5938_v9 }
 0x5fa   : > { %v2821_v13 = vpop.permute.xlu1 %2820  ;;  %v5966_v44 = vpop.eup %4580 }
 0x5fb   : > { %v2844_v32 = vsel %vm921_vm0, %v2821_v13, 0  ;;  %v2442_v34 = vpop.permute.xlu2 %2441  ;;  %v1902_v28 = vsel %vm5961_vm2, %v4579_v26, %v1898_v4  ;;  %v5972_v14 = vpop.eup %4582  ;;  %v2274_v18 = vmul.f32 %v5966_v44, %v5938_v9  ;;  %v2311_v22 = vpack.c.bf16 %v2306_v47, %v2305_v42  ;;  %v796_v47 = vld [vmem:[#allocation2 + $0x60] sm:$0xff] }
 0x5fc   : > { %v2465_v45 = vsel %vm921_vm0, %v2442_v34, 0  ;;  %2850 = vmatpush.bf16.xpose.msra.mxu2 %v2844_v32  ;;  %v1907_v35 = vsel %vm1904_vm3, %v1906_v56, %v1902_v28  ;;  %vm2279_vm10 = vweird.f32 %v5966_v44  ;;  %v679_v4 = vmul.f32 %v4714_v2, %v7106_v49 }
 0x5fd   : > { %2471 = vmatpush.bf16.xpose.msrb.mxu3 %v2465_v45  ;;  %v1928_v26 = vmul.f32 %v5745_v58, %v1907_v35  ;;  %v2288_v58 = vmul.f32 %v5972_v14, %v5934_v43  ;;  %v2275_v33 = vsub.f32 1.0, %v2274_v18  ;;  %vm2293_vm11 = vweird.f32 %v5972_v14  ;;  %vm6018_vm13 = vmor %vm2278_vm12, %vm2279_vm10  ;;  %v4715_v35 = vld [vmem:[#allocation2 + $0x42] sm:$0xff]  ;;  %v7112_v18 = vld [vmem:[#allocation26_spill] sm:$0xff] }
 0x5fe   : > { %v2282_v56 = vand.u32 2147483647, %v5938_v9  ;;  %v2296_v34 = vand.u32 2147483647, %v5934_v43  ;;  %vm6027_vm15 = vmor %vm2292_vm14, %vm2293_vm11  ;;  %v2285_v63 = vor.u32 1.1754944e-38, %v2284_v10  ;;  %v687_v45 = vadd.f32 %v679_v4, %v662_v46  ;;  %v7115_v4 = vld [vmem:[#allocation30_spill] sm:$0xff] }
 0x5ff   : > { %v1933_v25 = vpack.c.bf16 %v1929_v19, %v1928_v26  ;;  %v2289_v51 = vsub.f32 1.0, %v2288_v58  ;;  %v2276_v54 = vmul.f32 %v5966_v44, %v2275_v33  ;;  %v704_v55 = vmul.f32 %v4715_v35, %v7111_v11  ;;  %v6035_v19 = vpop.permute.xlu0 %2427  ;;  %v820_v33 = vld [vmem:[#allocation2 + $0x51] sm:$0xff] }
 0x600   : > { %vm2283_vm2 = vcmp.eq.f32.partialorder %v2282_v56, 8.507059e+37  ;;  %v2299_v43 = vor.u32 1.1754944e-38, %v2298_v1  ;;  %vm2297_vm3 = vcmp.eq.f32.partialorder %v2296_v34, 8.507059e+37  ;;  %v664_v20 = vmul.f32 %v796_v47, %v5454_v48  ;;  %v797_v56 = vld [vmem:[#allocation2 + $0x70] sm:$0xff]  ;;  %v7116_v1 = vld [vmem:[#allocation32_spill] sm:$0xff] }
 0x601   : > { %4220 = vmatmul.msk.bf16.gmra.mxu2 %vm975_vm1, %v1933_v25  ;;  %v2290_v24 = vmul.f32 %v5972_v14, %v2289_v51  ;;  %v2277_v29 = vadd.f32 %v5966_v44, %v2276_v54  ;;  %v712_v37 = vadd.f32 %v704_v55, %v687_v45  ;;  %v821_v54 = vld [vmem:[#allocation2 + $0x61] sm:$0xff] }
 0x602   : > { %v2438_v30 = vpop.permute.xlu1 %2437  ;;  %v830_v32 = vmul.f32 %v7116_v1, %v821_v54  ;;  %v4716_v55 = vld [vmem:[#allocation8 + $0x8] ss:$0 sm:$0xff] }
 0x603   : > { %v2819_v41 = vpop.permute.xlu2 %2818  ;;  %v2291_v7 = vadd.f32 %v5972_v14, %v2290_v24  ;;  %v2459_v13 = vsel %vm921_vm0, %v2438_v30, 0  ;;  %v2281_v9 = vsel %vm6018_vm13, %v5966_v44, %v2277_v29  ;;  %v795_v44 = vld [vmem:[#allocation2 + $0x50] sm:$0xff]  ;;  %v846_v29 = vld [vmem:[#allocation2 + $0x62] sm:$0xff] }
 0x604   : > { %v2841_v6 = vsel %vm921_vm0, %v2819_v41, 0  ;;  %v2286_v57 = vsel %vm2283_vm2, %v2285_v63, %v2281_v9  ;;  %v729_v38 = vmul.f32 %v795_v44, %v7112_v18  ;;  %v7113_v41 = vld [vmem:[#allocation27_spill] sm:$0xff]  ;;  %v731_v9 = vmul.f32 %v797_v56, %v7112_v18  ;;  %v822_v63 = vld [vmem:[#allocation2 + $0x71] sm:$0xff] }
 0x605   : > { %2472 = vmatpush.bf16.xpose.msrb.mxu3 %v2462_v17  ;;  %2851 = vmatpush.bf16.xpose.msra.mxu2 %v2841_v6  ;;  %v2295_v26 = vsel %vm6027_vm15, %v5972_v14, %v2291_v7  ;;  %v2307_v59 = vmul.f32 %v5751_v15, %v2286_v57  ;;  %v754_v27 = vmul.f32 %v820_v33, %v7113_v41  ;;  %v845_v6 = vld [vmem:[#allocation2 + $0x52] sm:$0xff]  ;;  %v7114_v15 = vld [vmem:[#allocation29_spill] sm:$0xff] }
 0x606   : > { %v2300_v25 = vsel %vm2297_vm3, %v2299_v43, %v2295_v26  ;;  %v737_v51 = vadd.f32 %v729_v38, %v712_v37  ;;  %v805_v7 = vmul.f32 %v7115_v4, %v796_v47  ;;  %v855_v26 = vmul.f32 %v4716_v55, %v846_v29  ;;  %v847_v57 = vld [vmem:[#allocation2 + $0x72] sm:$0xff]  ;;  %v798_v37 = vld [vmem:[#allocation2 + $0x80] sm:$0xff]  ;;  %v7118_v47 = vld [vmem:[#allocation25_spill] sm:$0xff] }
 0x607   : > { %v2308_v14 = vmul.f32 %v5734_v36, %v2300_v25  ;;  %v6044_v42 = vpop.permute.xlu0 %2808  ;;  %v681_v36 = vmul.f32 %v821_v54, %v7106_v49  ;;  %v781_v25 = vmul.f32 %v847_v57, %v7114_v15  ;;  %v807_v33 = vmul.f32 %v7115_v4, %v798_v37 }
 0x608   : > { %v762_v30 = vadd.f32 %v754_v27, %v737_v51  ;;  %v823_v27 = vld [vmem:[#allocation2 + $0x81] sm:$0xff] }
 0x609   : > { %4235 = vmatmul.msk.bf16.gmra.mxu1 %vm975_vm1, %v2311_v22  ;;  %v2312_v17 = vpack.c.bf16 %v2308_v14, %v2307_v59  ;;  %v779_v22 = vmul.f32 %v845_v6, %v7114_v15  ;;  %v689_v10 = vadd.f32 %v681_v36, %v664_v20  ;;  %v848_v20 = vld [vmem:[#allocation2 + $0x82] sm:$0xff] }
 0x60a   : > { %v2436_v50 = vpop.permute.xlu1 %2435 }
 0x60b   : > { %v2817_v62 = vpop.permute.xlu2 %2816  ;;  %v2456_v39 = vsel %vm921_vm0, %v2436_v50, 0  ;;  %v787_v2 = vadd.f32 %v779_v22, %v762_v30  ;;  %v756_v50 = vmul.f32 %v822_v63, %v7113_v41  ;;  %v832_v22 = vmul.f32 %v7116_v1, %v823_v27 }
 0x60c   : > { %v2838_v61 = vsel %vm921_vm0, %v2817_v62, 0  ;;  %v706_v62 = vmul.f32 %v846_v29, %v7111_v11 }
 0x60d   : > { %2473 = vmatpush.bf16.xpose.msrb.mxu3 %v2459_v13  ;;  %2852 = vmatpush.bf16.xpose.msra.mxu2 %v2838_v61  ;;  %v813_v61 = vadd.f32 %v805_v7, %v787_v2 }
 0x60e   : > { %v714_v34 = vadd.f32 %v706_v62, %v689_v10  ;;  %v857_v10 = vmul.f32 %v4716_v55, %v848_v20 }
 0x60f   : > { %v6059_v28 = vpop.permute.xlu0 %2433  ;;  %v838_v35 = vadd.f32 %v830_v32, %v813_v61 }
 0x610   : > { %v739_v43 = vadd.f32 %v731_v9, %v714_v34 }
 0x611   : > { %v863_v38 = vadd.f32 %v855_v26, %v838_v35 }
 0x612   : > { %v6051_v46 = vpop.permute.xlu1 %2806 }
 0x613   : > { %v2815_v58 = vpop.permute.xlu2 %2814 }
 0x614   : > { %v2835_v40 = vsel %vm921_vm0, %v2815_v58, 0  ;;  %v764_v58 = vadd.f32 %v756_v50, %v739_v43  ;;  %v7119_v50 = vld [vmem:[#allocation31_spill] sm:$0xff] }
 0x615   : > { %2474 = vmatpush.bf16.xpose.msrb.mxu3 %v2456_v39  ;;  %2853 = vmatpush.bf16.xpose.msra.mxu2 %v2835_v40  ;;  %v7117_v40 = vld [vmem:[#allocation34_spill] sm:$0xff] }
 0x616   : > { %v877_v59 = vadd.f32 %v7117_v40, %v863_v38  ;;  %v789_v14 = vadd.f32 %v781_v25, %v764_v58 }
 0x617   : > { %v2697_v39 = vpop.permute.xlu0 %2696 }
 0x618   : > { %v1286_v54 = vadd.f32 %v7118_v47, %v877_v59  ;;  %v815_v30 = vadd.f32 %v807_v33, %v789_v14 }
 0x619   : > { %4236 = vmatmul.msk.bf16.gmra.mxu1 %vm975_vm1, %v2312_v17 }
 0x61a   : > { %v6061_v45 = vpop.permute.xlu1 %2431  ;;  %v840_v7 = vadd.f32 %v832_v22, %v815_v30 }
 0x61b   : > { %v6046_v24 = vpop.permute.xlu2 %2429 }
 0x61c   : > { %v865_v32 = vadd.f32 %v857_v10, %v840_v7  ;;  %v7120_v10 = vld [vmem:[#allocation35_spill] sm:$0xff] }
 0x61e   : > { %v879_v26 = vadd.f32 %v7117_v40, %v865_v32  ;;  %v7121_v32 = vld [vmem:[#allocation37_spill] sm:$0xff] }
 0x61f   : > { %v3076_v63 = vpop.permute.xlu0 %3075 }
 0x620   : > { %v1288_v55 = vadd.f32 %v7119_v50, %v879_v26 }
 0x622   : > { %v6067_v17 = vpop.permute.xlu1 %2812 }
 0x623   : > { %v6055_v13 = vpop.permute.xlu2 %2810 }
 0x62a   : > { %v3078_v61 = vpop.permute.xlu1 %3077 }
 0x62b   : > { %v2699_v44 = vpop.permute.xlu2 %2698 }
 0x62c   : > { %2720 = vmatpush.bf16.msrb.mxu0 %v2699_v44 }
 0x62e   : > { %v1967_v51 = vpop.f32.mrf.mxu2 }
 0x630   : > { %2721 = vmatpush.bf16.msrb.mxu0 %v2697_v39 }
 0x633   : > { %v2695_v6 = vpop.permute.xlu2 %2694 }
 0x634   : > { %2722 = vmatpush.bf16.msrb.mxu0 %v2695_v6 }
 0x635   : > { %v1651_v36 = vpop.f32.mrf.mxu3 }
 0x636   : > { %v1665_v29 = vadd.f32 %v1651_v36, %v1286_v54  ;;  %v2346_v2 = vpop.f32.mrf.mxu1  ;;  %v1969_v62 = vpop.f32.mrf.mxu2 }
 0x637   : > { %v1987_v56 = vpack.c.bf16 %v1969_v62, %v1967_v51 }
 0x639   : > { %4225 = vmatmul.msk.bf16.vlgmr.msra.gmra.mxu3 %vm921_vm0, %v1987_v56 }
 0x63a   : > { %3099 = vmatpush.bf16.msra.mxu3 %v3078_v61 }
 0x63d   : > { %v6072_v34 = vpop.f32.mrf.mxu3 }
 0x63e   : > { %v2348_v9 = vpop.f32.mrf.mxu1  ;;  %3100 = vmatpush.bf16.msra.mxu3 %v3076_v63  ;;  %v1972_v43 = vpop.f32.mrf.mxu2 }
 0x63f   : > { %v2366_v35 = vpack.c.bf16 %v2348_v9, %v2346_v2 }
 0x641   : > { %4241 = vmatmul.msk.bf16.vlgmr.msrb.gmra.mxu2 %vm921_vm0, %v2366_v35 }
 0x645   : > { %v1656_v57 = vpop.f32.mrf.mxu3 }
 0x646   : > { %v1667_v44 = vadd.f32 %v1656_v57, %v1288_v55  ;;  %v1974_v38 = vpop.f32.mrf.mxu2 }
 0x647   : > { %v1988_v58 = vpack.c.bf16 %v1974_v38, %v1972_v43 }
 0x649   : > { %4226 = vmatmul.msk.bf16.gmra.mxu3 %vm921_vm0, %v1988_v58 }
 0x64d   : > { %v6089_v2 = vpop.f32.mrf.mxu3 }
 0x64e   : > { %v1977_v25 = vpop.f32.mrf.mxu2 }
 0x656   : > { %v1979_v37 = vpop.f32.mrf.mxu2 }
 0x657   : > { %v1989_v39 = vpack.c.bf16 %v1979_v37, %v1977_v25 }
 0x659   : > { %4227 = vmatmul.msk.bf16.gmra.mxu3 %vm921_vm0, %v1989_v39 }
 0x676   : > { %v2351_v59 = vpop.f32.mrf.mxu1 }
 0x67e   : > { %v2353_v14 = vpop.f32.mrf.mxu1 }
 0x67f   : > { %v2367_v33 = vpack.c.bf16 %v2353_v14, %v2351_v59 }
 0x681   : > { %4242 = vmatmul.msk.bf16.gmra.mxu2 %vm921_vm0, %v2367_v33 }
 0x684   : > { %v1982_v51 = vpop.f32.mrf.mxu2 }
 0x686   : > { %v2356_v27 = vpop.f32.mrf.mxu1 }
 0x68c   : > { %v1984_v6 = vpop.f32.mrf.mxu2 }
 0x68d   : > { %v1990_v47 = vpack.c.bf16 %v1984_v6, %v1982_v51 }
 0x68e   : > { %v2358_v54 = vpop.f32.mrf.mxu1 }
 0x68f   : > { %4228 = vmatmul.msk.bf16.gmra.mxu3 %vm921_vm0, %v1990_v47  ;;  %v2368_v30 = vpack.c.bf16 %v2358_v54, %v2356_v27 }
 0x691   : > { %4243 = vmatmul.msk.bf16.gmra.mxu2 %vm921_vm0, %v2368_v30 }
 0x696   : > { %v2361_v22 = vpop.f32.mrf.mxu1 }
 0x69e   : > { %v2363_v20 = vpop.f32.mrf.mxu1 }
 0x69f   : > { %4245 = vmatmul.msk.bf16.vlgmr.msrb.gmra.mxu3 %vm921_vm0, %v6035_v19  ;;  %v2369_v36 = vpack.c.bf16 %v2363_v20, %v2361_v22 }
 0x6a1   : > { %4244 = vmatmul.msk.bf16.gmra.mxu2 %vm921_vm0, %v2369_v36 }
 0x6af   : > { %4246 = vmatmul.msk.bf16.gmra.mxu3 %vm921_vm0, %v6046_v24 }
 0x6b1   : > { %4261 = vmatmul.msk.bf16.vlgmr.msra.gmra.mxu2 %vm921_vm0, %v6051_v46 }
 0x6bc   : > { %v2020_v7 = vpop.f32.mrf.mxu3 }
 0x6bd   : > { %v2040_v62 = vadd.f32 %v2020_v7, %v7120_v10 }
 0x6bf   : > { %4247 = vmatmul.msk.bf16.gmra.mxu3 %vm921_vm0, %v6061_v45 }
 0x6c1   : > { %4262 = vmatmul.msk.bf16.gmra.mxu2 %vm921_vm0, %v6044_v42 }
 0x6c4   : > { %v2399_v19 = vpop.f32.mrf.mxu2  ;;  %v6098_v61 = vpop.f32.mrf.mxu3 }
 0x6c5   : > { %v6096_v56 = vadd.f32 %v2399_v19, %v2040_v62 }
 0x6cc   : > { %v2025_v24 = vpop.f32.mrf.mxu3  ;;  %v6109_v42 = vpop.f32.mrf.mxu2 }
 0x6cd   : > { %v2042_v9 = vadd.f32 %v2025_v24, %v7121_v32 }
 0x6cf   : > { %4248 = vmatmul.msk.bf16.gmra.mxu3 %vm921_vm0, %v6059_v28 }
 0x6d1   : > { %4263 = vmatmul.msk.bf16.gmra.mxu2 %vm921_vm0, %v6055_v13 }
 0x6d4   : > { %v6105_v46 = vpop.f32.mrf.mxu3 }
 0x6dc   : > { %v2030_v45 = vpop.f32.mrf.mxu3 }
 0x6dd   : > { %v2044_v63 = vadd.f32 %v2030_v45, %v1665_v29 }
 0x6e1   : > { %4264 = vmatmul.msk.bf16.gmra.mxu2 %vm921_vm0, %v6067_v17 }
 0x6e4   : > { %v6113_v43 = vpop.f32.mrf.mxu3 }
 0x704   : > { %v2404_v35 = vpop.f32.mrf.mxu2 }
 0x705   : > { %v6111_v26 = vadd.f32 %v2404_v35, %v2042_v9 }
 0x70c   : > { %v6115_v50 = vpop.f32.mrf.mxu2 }
 0x712   : > { %v2035_v28 = vpop.f32.mrf.mxu3 }
 0x713   : > { %v2046_v55 = vadd.f32 %v2035_v28, %v1667_v44 }
 0x714   : > { %v2409_v57 = vpop.f32.mrf.mxu2 }
 0x715   : > { %v6117_v13 = vadd.f32 %v2409_v57, %v2044_v63 }
 0x71a   : > { %v6119_v38 = vpop.f32.mrf.mxu3 }
 0x71b   : > { %7122 = vst [vmem:[#allocation23_spill] sm:$0xff] %v6119_v38 }
 0x71c   : > { %v6121_v29 = vpop.f32.mrf.mxu2 }
 0x722   : > { %v2476_v58 = vpop.f32.mrf.mxu3 }
 0x723   : > { %v2496_v17 = vsel %vm975_vm1, %v2476_v58, -inf }
 0x724   : > { %2497 = vmax.xlane.f32.xlu2 %v2496_v17  ;;  %v2414_v25 = vpop.f32.mrf.mxu2 }
 0x725   : > { %v6124_v37 = vadd.f32 %v2414_v25, %v2046_v55 }
 0x72a   : > { %v2478_v39 = vpop.f32.mrf.mxu3 }
 0x72b   : > { %v2499_v59 = vsel %vm975_vm1, %v2478_v39, -inf }
 0x72c   : > { %2500 = vmax.xlane.f32.xlu0 %v2499_v59  ;;  %v6127_v14 = vpop.f32.mrf.mxu2 }
 0x72d   : > { %7123 = vst [vmem:[#allocation24_spill] sm:$0xff] %v6127_v14 }
 0x732   : > { %v2481_v44 = vpop.f32.mrf.mxu3 }
 0x733   : > { %v2502_v33 = vsel %vm975_vm1, %v2481_v44, -inf }
 0x734   : > { %2503 = vmax.xlane.f32.xlu0 %v2502_v33  ;;  %v6130_v51 = vpop.f32.mrf.mxu2 }
 0x735   : > { %v2875_v9 = vsel %vm975_vm1, %v6130_v51, -inf }
 0x73a   : > { %v2483_v27 = vpop.f32.mrf.mxu3 }
 0x73b   : > { %v2505_v6 = vsel %vm975_vm1, %v2483_v27, -inf }
 0x73c   : > { %2506 = vmax.xlane.f32.xlu2 %v2505_v6  ;;  %v6133_v47 = vpop.f32.mrf.mxu2 }
 0x73d   : > { %v2878_v36 = vsel %vm975_vm1, %v6133_v47, -inf }
 0x742   : > { %v6135_v54 = vpop.f32.mrf.mxu3 }
 0x743   : > { %v2508_v30 = vsel %vm975_vm1, %v6135_v54, -inf }
 0x744   : > { %2509 = vmax.xlane.f32.xlu2 %v2508_v30  ;;  %v6139_v22 = vpop.f32.mrf.mxu2 }
 0x745   : > { %v2881_v35 = vsel %vm975_vm1, %v6139_v22, -inf }
 0x74a   : > { %v6141_v20 = vpop.f32.mrf.mxu3 }
 0x74b   : > { %v2511_v7 = vsel %vm975_vm1, %v6141_v20, -inf }
 0x74c   : > { %2879 = vmax.xlane.f32.xlu2 %v2878_v36  ;;  %2512 = vmax.xlane.f32.xlu1 %v2511_v7  ;;  %v6147_v10 = vpop.f32.mrf.mxu2 }
 0x74d   : > { %v2884_v28 = vsel %vm975_vm1, %v6147_v10, -inf }
 0x752   : > { %v6149_v62 = vpop.f32.mrf.mxu3 }
 0x753   : > { %v2514_v19 = vsel %vm975_vm1, %v6149_v62, -inf }
 0x754   : > { %2515 = vmax.xlane.f32.xlu1 %v2514_v19  ;;  %v6153_v24 = vpop.f32.mrf.mxu2 }
 0x755   : > { %v2887_v57 = vsel %vm975_vm1, %v6153_v24, -inf }
 0x75a   : > { %v6155_v32 = vpop.f32.mrf.mxu3 }
 0x75b   : > { %v2517_v45 = vsel %vm975_vm1, %v6155_v32, -inf }
 0x75c   : > { %2876 = vmax.xlane.f32.xlu1 %v2875_v9  ;;  %2518 = vmax.xlane.f32.xlu0 %v2517_v45  ;;  %v6161_v63 = vpop.f32.mrf.mxu2 }
 0x75d   : > { %v2890_v59 = vsel %vm975_vm1, %v6161_v63, -inf }
 0x764   : > { %3073 = vrot.lane.b32.xlu2 %v5195_v3, %s4952_s9  ;;  %2882 = vmax.xlane.f32.xlu1 %v2881_v35  ;;  %v6169_v55 = vpop.f32.mrf.mxu2 }
 0x765   : > { %2885 = vmax.xlane.f32.xlu0 %v2884_v28  ;;  %v2893_v33 = vsel %vm975_vm1, %v6169_v55, -inf }
 0x76c   : > { %v6173_v17 = vpop.f32.mrf.mxu2 }
 0x76d   : > { %2888 = vmax.xlane.f32.xlu0 %v2887_v57  ;;  %v2896_v25 = vsel %vm975_vm1, %v6173_v17, -inf }
 0x76e   : > { %2897 = vmax.xlane.f32.xlu1 %v2896_v25 }
 0x78d   : > { %2891 = vmax.xlane.f32.xlu2 %v2890_v59 }
 0x795   : > { %2894 = vmax.xlane.f32.xlu2 %v2893_v33 }
 0x797   : > { %v2498_v6 = vpop.xlane.xlu2 %2497 }
 0x798   : > { %v2520_v30 = vsub.f32 %v2476_v58, %v2498_v6 }
 0x79a   : > { %v2528_v36 = vmul.f32 1.442695, %v2520_v30 }
 0x79c   : > { %4584 = vpow2.f32 %v2528_v36 }
 0x79f   : > { %v2501_v7 = vpop.xlane.xlu0 %2500 }
 0x7a0   : > { %v2521_v19 = vsub.f32 %v2478_v39, %v2501_v7 }
 0x7a2   : > { %v6181_v9 = vpop.eup %4584  ;;  %v2530_v45 = vmul.f32 1.442695, %v2521_v19 }
 0x7a3   : > { %v2544_v35 = vsel %vm975_vm1, %v6181_v9, 0.0 }
 0x7a4   : > { %4586 = vpow2.f32 %v2530_v45  ;;  %2545 = vadd.xlane.f32.xlu0 %v2544_v35 }
 0x7a7   : > { %v2504_v28 = vpop.xlane.xlu0 %2503 }
 0x7a8   : > { %v2522_v57 = vsub.f32 %v2481_v44, %v2504_v28 }
 0x7aa   : > { %v6185_v25 = vpop.eup %4586  ;;  %v2532_v59 = vmul.f32 1.442695, %v2522_v57 }
 0x7ab   : > { %v2547_v58 = vsel %vm975_vm1, %v6185_v25, 0.0 }
 0x7ac   : > { %4588 = vpow2.f32 %v2532_v59  ;;  %2548 = vadd.xlane.f32.xlu2 %v2547_v58 }
 0x7af   : > { %v2507_v33 = vpop.xlane.xlu2 %2506 }
 0x7b0   : > { %v2523_v39 = vsub.f32 %v2483_v27, %v2507_v33 }
 0x7b2   : > { %v6189_v6 = vpop.eup %4588  ;;  %v2534_v30 = vmul.f32 1.442695, %v2523_v39 }
 0x7b3   : > { %v2550_v36 = vsel %vm975_vm1, %v6189_v6, 0.0 }
 0x7b4   : > { %4590 = vpow2.f32 %v2534_v30  ;;  %2551 = vadd.xlane.f32.xlu1 %v2550_v36 }
 0x7b7   : > { %v2510_v7 = vpop.xlane.xlu2 %2509 }
 0x7ba   : > { %v6193_v44 = vpop.eup %4590 }
 0x7bb   : > { %v2553_v19 = vsel %vm975_vm1, %v6193_v44, 0.0 }
 0x7bc   : > { %2554 = vadd.xlane.f32.xlu0 %v2553_v19 }
 0x7bf   : > { %v2513_v45 = vpop.xlane.xlu1 %2512  ;;  %v2880_v35 = vpop.xlane.xlu2 %2879 }
 0x7c0   : > { %v2900_v28 = vsub.f32 %v6133_v47, %v2880_v35 }
 0x7c2   : > { %v2909_v27 = vmul.f32 1.442695, %v2900_v28 }
 0x7c4   : > { %4592 = vpow2.f32 %v2909_v27 }
 0x7c7   : > { %v6198_v57 = vpop.xlane.xlu1 %2515  ;;  %v3074_v59 = vpop.permute.xlu2 %3073 }
 0x7c8   : > { %3101 = vmatpush.bf16.msra.mxu3 %v3074_v59  ;;  %v2524_v59 = vsub.f32 %v6135_v54, %v2510_v7 }
 0x7ca   : > { %v6200_v58 = vpop.eup %4592 }
 0x7cb   : > { %v2926_v33 = vsel %vm975_vm1, %v6200_v58, 0.0 }
 0x7cc   : > { %2927 = vadd.xlane.f32.xlu0 %v2926_v33 }
 0x7cf   : > { %v2877_v39 = vpop.xlane.xlu1 %2876  ;;  %v2519_v30 = vpop.xlane.xlu0 %2518 }
 0x7d0   : > { %v2899_v36 = vsub.f32 %v6130_v51, %v2877_v39  ;;  %v2536_v51 = vmul.f32 1.442695, %v2524_v59  ;;  %v2527_v39 = vsub.f32 %v6155_v32, %v2519_v30 }
 0x7d2   : > { %v2907_v19 = vmul.f32 1.442695, %v2899_v36 }
 0x7d4   : > { %4594 = vpow2.f32 %v2907_v19 }
 0x7d7   : > { %v2883_v3 = vpop.xlane.xlu1 %2882 }
 0x7d8   : > { %v2901_v47 = vsub.f32 %v6139_v22, %v2883_v3  ;;  %v2886_v35 = vpop.xlane.xlu0 %2885  ;;  %v2525_v22 = vsub.f32 %v6141_v20, %v2513_v45  ;;  %v2542_v20 = vmul.f32 1.442695, %v2527_v39 }
 0x7d9   : > { %v2902_v28 = vsub.f32 %v6147_v10, %v2886_v35 }
 0x7da   : > { %v6207_v27 = vpop.eup %4594  ;;  %v2911_v14 = vmul.f32 1.442695, %v2901_v47 }
 0x7db   : > { %v2913_v38 = vmul.f32 1.442695, %v2902_v28  ;;  %v2923_v33 = vsel %vm975_vm1, %v6207_v27, 0.0 }
 0x7dc   : > { %4596 = vpow2.f32 %v2911_v14  ;;  %2924 = vadd.xlane.f32.xlu1 %v2923_v33 }
 0x7dd   : > { %4598 = vpow2.f32 %v2913_v38  ;;  %v2538_v38 = vmul.f32 1.442695, %v2525_v22 }
 0x7de   : > { %4600 = vpow2.f32 %v2536_v51 }
 0x7df   : > { %4602 = vpow2.f32 %v2538_v38 }
 0x7e0   : > { %2692 = vrot.lane.b32.xlu0 %v5206_v8, %s4951_s8  ;;  %4604 = vpow2.f32 %v2542_v20  ;;  %v2889_v47 = vpop.xlane.xlu0 %2888 }
 0x7e1   : > { %v2903_v28 = vsub.f32 %v6153_v24, %v2889_v47 }
 0x7e2   : > { %v6214_v3 = vpop.eup %4596 }
 0x7e3   : > { %v6217_v10 = vpop.eup %4598  ;;  %v2929_v54 = vsel %vm975_vm1, %v6214_v3, 0.0  ;;  %v2915_v30 = vmul.f32 1.442695, %v2903_v28  ;;  %v2526_v28 = vsub.f32 %v6149_v62, %v6198_v57 }
 0x7e4   : > { %2930 = vadd.xlane.f32.xlu2 %v2929_v54  ;;  %v2932_v14 = vsel %vm975_vm1, %v6217_v10, 0.0  ;;  %v6223_v7 = vpop.eup %4600  ;;  %v2898_v54 = vpop.xlane.xlu1 %2897 }
 0x7e5   : > { %2933 = vadd.xlane.f32.xlu1 %v2932_v14  ;;  %v2556_v36 = vsel %vm975_vm1, %v6223_v7, 0.0  ;;  %v6228_v45 = vpop.eup %4602  ;;  %4606 = vpow2.f32 %v2915_v30 }
 0x7e6   : > { %v2559_v19 = vsel %vm975_vm1, %v6228_v45, 0.0  ;;  %v6232_v35 = vpop.eup %4604 }
 0x7e7   : > { %v2565_v32 = vsel %vm975_vm1, %v6232_v35, 0.0 }
 0x7eb   : > { %v6240_v22 = vpop.eup %4606 }
 0x7ec   : > { %2557 = vadd.xlane.f32.xlu2 %v2556_v36  ;;  %v2935_v38 = vsel %vm975_vm1, %v6240_v22, 0.0  ;;  %v2906_v36 = vsub.f32 %v6173_v17, %v2898_v54  ;;  %v2540_v17 = vmul.f32 1.442695, %v2526_v28 }
 0x7f4   : > { %2560 = vadd.xlane.f32.xlu2 %v2559_v19  ;;  %v2921_v19 = vmul.f32 1.442695, %v2906_v36 }
 0x7fc   : > { %2566 = vadd.xlane.f32.xlu2 %v2565_v32 }
 0x7fe   : > { %3071 = vrot.lane.b32.xlu1 %v5206_v8, %s4952_s9 }
 0x800   : > { %v2892_v59 = vpop.xlane.xlu2 %2891 }
 0x801   : > { %v2904_v33 = vsub.f32 %v6161_v63, %v2892_v59 }
 0x803   : > { %v2917_v51 = vmul.f32 1.442695, %v2904_v33 }
 0x805   : > { %4608 = vpow2.f32 %v2917_v51 }
 0x808   : > { %v2895_v14 = vpop.xlane.xlu2 %2894 }
 0x809   : > { %v2905_v24 = vsub.f32 %v6169_v55, %v2895_v14 }
 0x80a   : > { %2936 = vadd.xlane.f32.xlu0 %v2935_v38 }
 0x80b   : > { %v6245_v39 = vpop.eup %4608  ;;  %v2919_v20 = vmul.f32 1.442695, %v2905_v24 }
 0x80c   : > { %v2938_v63 = vsel %vm975_vm1, %v6245_v39, 0.0 }
 0x80d   : > { %4610 = vpow2.f32 %v2919_v20  ;;  %2939 = vadd.xlane.f32.xlu2 %v2938_v63 }
 0x80e   : > { %4612 = vpow2.f32 %v2921_v19 }
 0x80f   : > { %4614 = vpow2.f32 %v2540_v17 }
 0x813   : > { %v6250_v47 = vpop.eup %4610 }
 0x814   : > { %v2941_v55 = vsel %vm975_vm1, %v6250_v47, 0.0  ;;  %v6256_v32 = vpop.eup %4612 }
 0x815   : > { %2942 = vadd.xlane.f32.xlu2 %v2941_v55  ;;  %v2944_v30 = vsel %vm975_vm1, %v6256_v32, 0.0  ;;  %v6262_v59 = vpop.eup %4614 }
 0x816   : > { %v2562_v62 = vsel %vm975_vm1, %v6262_v59, 0.0 }
 0x817   : > { %v2546_v33 = vpop.xlane.xlu0 %2545 }
 0x818   : > { %vm2573_vm8 = vweird.f32 %v2546_v33 }
 0x81d   : > { %2945 = vadd.xlane.f32.xlu2 %v2944_v30 }
 0x81e   : > { %3197 = vrot.lane.b32.xlu0 %v5192_v0, %s4953_s14 }
 0x81f   : > { %v2549_v57 = vpop.xlane.xlu2 %2548 }
 0x820   : > { %4616 = vrcp.f32 %v2549_v57  ;;  %v2593_v28 = vand.u32 2147483648, %v2549_v57  ;;  %vm2587_vm6 = vweird.f32 %v2549_v57 }
 0x821   : > { %4618 = vrcp.f32 %v2546_v33 }
 0x826   : > { %3576 = vrot.lane.b32.xlu0 %v5192_v0, %s4954_s15  ;;  %v4617_v51 = vpop.eup %4616 }
 0x827   : > { %v4619_v54 = vpop.eup %4618  ;;  %v2583_v0 = vmul.f32 %v4617_v51, %v2549_v57  ;;  %v6280_v20 = vpop.xlane.xlu1 %2551  ;;  %vm2588_vm4 = vweird.f32 %v4617_v51 }
 0x828   : > { %2563 = vadd.xlane.f32.xlu1 %v2562_v62  ;;  %v2569_v14 = vmul.f32 %v4619_v54, %v2546_v33  ;;  %vm2574_vm5 = vweird.f32 %v4619_v54  ;;  %v2579_v62 = vand.u32 2147483648, %v2546_v33  ;;  %vm2589_vm7 = vmor %vm2587_vm6, %vm2588_vm4  ;;  %vm2601_vm2 = vweird.f32 %v6280_v20 }
 0x829   : > { %v2584_v24 = vsub.f32 1.0, %v2583_v0  ;;  %v2577_v0 = vand.u32 2147483647, %v2546_v33  ;;  %vm2575_vm9 = vmor %vm2573_vm8, %vm2574_vm5 }
 0x82a   : > { %v2570_v36 = vsub.f32 1.0, %v2569_v14 }
 0x82b   : > { %v2585_v63 = vmul.f32 %v4617_v51, %v2584_v24  ;;  %vm2578_vm11 = vcmp.eq.f32.partialorder %v2577_v0, 8.507059e+37 }
 0x82c   : > { %v2571_v19 = vmul.f32 %v4619_v54, %v2570_v36 }
 0x82e   : > { %3574 = vrot.lane.b32.xlu0 %v5177_v31, %s4954_s15  ;;  %v2572_v17 = vadd.f32 %v4619_v54, %v2571_v19 }
 0x82f   : > { %v6276_v38 = vpop.xlane.xlu0 %2554 }
 0x830   : > { %4620 = vrcp.f32 %v6276_v38  ;;  %v2576_v19 = vsel %vm2575_vm9, %v4619_v54, %v2572_v17  ;;  %vm2615_vm14 = vweird.f32 %v6276_v38 }
 0x831   : > { %4622 = vrcp.f32 %v6280_v20 }
 0x835   : > { %3199 = vrot.lane.b32.xlu2 %v5181_v52, %s4953_s14 }
 0x836   : > { %3564 = vrot.lane.b32.xlu0 %v5167_v12, %s4954_s15  ;;  %v6290_v55 = vpop.eup %4620 }
 0x837   : > { %v6294_v30 = vpop.eup %4622  ;;  %v2611_v24 = vmul.f32 %v6290_v55, %v6276_v38  ;;  %vm2616_vm12 = vweird.f32 %v6290_v55 }
 0x838   : > { %vm2602_vm13 = vweird.f32 %v6294_v30  ;;  %vm2617_vm15 = vmor %vm2615_vm14, %vm2616_vm12 }
 0x839   : > { %v2612_v33 = vsub.f32 1.0, %v2611_v24  ;;  %vm6340_vm3 = vmor %vm2601_vm2, %vm2602_vm13 }
 0x83d   : > { %3195 = vrot.lane.b32.xlu2 %v5177_v31, %s4953_s14  ;;  %v2586_v31 = vadd.f32 %v4617_v51, %v2585_v63  ;;  %v2594_v63 = vor.u32 1.1754944e-38, %v2593_v28 }
 0x83e   : > { %3189 = vrot.lane.b32.xlu0 %v5219_v16, %s4953_s14 }
 0x83f   : > { %v2590_v14 = vsel %vm2589_vm7, %v4617_v51, %v2586_v31  ;;  %v6298_v36 = vpop.xlane.xlu0 %2927 }
 0x840   : > { %4624 = vrcp.f32 %v6298_v36  ;;  %vm2966_vm9 = vweird.f32 %v6298_v36 }
 0x841   : > { %3578 = vrot.lane.b32.xlu1 %v5181_v52, %s4954_s15  ;;  %v2591_v52 = vand.u32 2147483647, %v2549_v57  ;;  %v2597_v57 = vmul.f32 %v6294_v30, %v6280_v20 }
 0x843   : > { %vm2592_vm10 = vcmp.eq.f32.partialorder %v2591_v52, 8.507059e+37  ;;  %v2598_v28 = vsub.f32 1.0, %v2597_v57 }
 0x844   : > { %v2595_v8 = vsel %vm2592_vm10, %v2594_v63, %v2590_v14 }
 0x845   : > { %3193 = vrot.lane.b32.xlu2 %v5197_v5, %s4953_s14  ;;  %v2681_v54 = vmul.f32 %v6185_v25, %v2595_v8  ;;  %v2599_v14 = vmul.f32 %v6294_v30, %v2598_v28  ;;  %v2621_v25 = vand.u32 2147483648, %v6276_v38 }
 0x846   : > { %3570 = vrot.lane.b32.xlu0 %v5223_v21, %s4954_s15 }
 0x849   : > { %3185 = vrot.lane.b32.xlu1 %v5167_v12, %s4953_s14  ;;  %v2580_v12 = vor.u32 1.1754944e-38, %v2579_v62  ;;  %v6313_v62 = vpop.eup %4624 }
 0x84a   : > { %v2962_v57 = vmul.f32 %v6313_v62, %v6298_v36  ;;  %vm2967_vm7 = vweird.f32 %v6313_v62 }
 0x84b   : > { %v2581_v31 = vsel %vm2578_vm11, %v2580_v12, %v2576_v19  ;;  %v2600_v19 = vadd.f32 %v6294_v30, %v2599_v14  ;;  %v2607_v12 = vand.u32 2147483648, %v6280_v20  ;;  %vm2968_vm11 = vmor %vm2966_vm9, %vm2967_vm7 }
 0x84c   : > { %v2680_v17 = vmul.f32 %v6181_v9, %v2581_v31 }
 0x84d   : > { %3572 = vrot.lane.b32.xlu2 %v5197_v5, %s4954_s15  ;;  %v2613_v5 = vmul.f32 %v6290_v55, %v2612_v33  ;;  %v2605_v33 = vand.u32 2147483647, %v6280_v20  ;;  %v2608_v20 = vor.u32 1.1754944e-38, %v2607_v12 }
 0x84e   : > { %v2688_v0 = vpack.c.bf16 %v2681_v54, %v2680_v17 }
 0x84f   : > { %v6305_v51 = vpop.xlane.xlu1 %2924  ;;  %v2614_v8 = vadd.f32 %v6290_v55, %v2613_v5  ;;  %v2963_v5 = vsub.f32 1.0, %v2962_v57  ;;  %vm2606_vm5 = vcmp.eq.f32.partialorder %v2605_v33, 8.507059e+37 }
 0x850   : > { %4626 = vrcp.f32 %v6305_v51  ;;  %v2958_v57 = vand.u32 2147483648, %v6305_v51  ;;  %vm2952_vm8 = vweird.f32 %v6305_v51  ;;  %v2956_v33 = vand.u32 2147483647, %v6305_v51 }
 0x851   : > { %3187 = vrot.lane.b32.xlu1 %v5171_v23, %s4953_s14  ;;  %v2618_v31 = vsel %vm2617_vm15, %v6290_v55, %v2614_v8 }
 0x852   : > { %v2693_v52 = vpop.permute.xlu0 %2692  ;;  %vm2957_vm12 = vcmp.eq.f32.partialorder %v2956_v33, 8.507059e+37 }
 0x853   : > { %2723 = vmatpush.bf16.msrb.mxu0 %v2693_v52 }
 0x855   : > { %3566 = vrot.lane.b32.xlu2 %v5171_v23, %s4954_s15  ;;  %v2619_v23 = vand.u32 2147483647, %v6276_v38  ;;  %v2622_v38 = vor.u32 1.1754944e-38, %v2621_v25 }
 0x856   : > { %v6318_v24 = vpop.eup %4626  ;;  %4249 = vmatmul.msk.bf16.vlgmr.msrb.gmra.mxu0 %vm975_vm1, %v2688_v0 }
 0x857   : > { %v6323_v9 = vpop.xlane.xlu2 %2930  ;;  %v2948_v63 = vmul.f32 %v6318_v24, %v6305_v51  ;;  %vm2620_vm4 = vcmp.eq.f32.partialorder %v2619_v23, 8.507059e+37  ;;  %vm2953_vm6 = vweird.f32 %v6318_v24 }
 0x858   : > { %v6344_v17 = vpop.xlane.xlu1 %2933  ;;  %4628 = vrcp.f32 %v6323_v9  ;;  %v2623_v55 = vsel %vm2620_vm4, %v2622_v38, %v2618_v31  ;;  %v2970_v31 = vand.u32 2147483647, %v6298_v36  ;;  %vm6380_vm10 = vmor %vm2952_vm8, %vm2953_vm6  ;;  %vm2980_vm15 = vweird.f32 %v6323_v9 }
 0x859   : > { %3568 = vrot.lane.b32.xlu1 %v5219_v16, %s4954_s15  ;;  %v2949_v28 = vsub.f32 1.0, %v2948_v63  ;;  %v2604_v16 = vsel %vm6340_vm3, %v6294_v30, %v2600_v19  ;;  %4630 = vrcp.f32 %v6344_v17  ;;  %v2964_v30 = vmul.f32 %v6313_v62, %v2963_v5 }
 0x85a   : > { %v2609_v14 = vsel %vm2606_vm5, %v2608_v20, %v2604_v16  ;;  %v2959_v20 = vor.u32 1.1754944e-38, %v2958_v57  ;;  %vm2971_vm13 = vcmp.eq.f32.partialorder %v2970_v31, 8.507059e+37  ;;  %v2984_v31 = vand.u32 2147483647, %v6323_v9 }
 0x85b   : > { %v2950_v0 = vmul.f32 %v6318_v24, %v2949_v28  ;;  %v2682_v8 = vmul.f32 %v6189_v6, %v2609_v14  ;;  %v2965_v23 = vadd.f32 %v6313_v62, %v2964_v30  ;;  %v2972_v6 = vand.u32 2147483648, %v6298_v36 }
 0x85d   : > { %3191 = vrot.lane.b32.xlu2 %v5223_v21, %s4953_s14  ;;  %v2683_v21 = vmul.f32 %v6193_v44, %v2623_v55  ;;  %v2951_v63 = vadd.f32 %v6318_v24, %v2950_v0  ;;  %v2969_v5 = vsel %vm2968_vm11, %v6313_v62, %v2965_v23  ;;  %v2973_v0 = vor.u32 1.1754944e-38, %v2972_v6 }
 0x85e   : > { %v6362_v25 = vpop.eup %4628 }
 0x85f   : > { %v6353_v52 = vpop.xlane.xlu2 %2557  ;;  %v6366_v19 = vpop.eup %4630  ;;  %v2689_v44 = vpack.c.bf16 %v2683_v21, %v2682_v8  ;;  %v2955_v16 = vsel %vm6380_vm10, %v6318_v24, %v2951_v63  ;;  %v2976_v36 = vmul.f32 %v6362_v25, %v6323_v9  ;;  %v2974_v21 = vsel %vm2971_vm13, %v2973_v0, %v2969_v5 }
 0x860   : > { %4632 = vrcp.f32 %v6353_v52  ;;  %v2990_v51 = vmul.f32 %v6366_v19, %v6344_v17  ;;  %v2960_v14 = vsel %vm2957_vm12, %v2959_v20, %v2955_v16  ;;  %v3060_v54 = vmul.f32 %v6200_v58, %v2974_v21 }
 0x861   : > { %3456 = vrot.lane.b32.xlu1 %v5183_v53, %s4953_s14  ;;  %v2977_v24 = vsub.f32 1.0, %v2976_v36  ;;  %v2635_v6 = vand.u32 2147483648, %v6353_v52  ;;  %vm2629_vm2 = vweird.f32 %v6353_v52  ;;  %v2633_v58 = vand.u32 2147483647, %v6353_v52 }
 0x862   : > { %v2991_v8 = vsub.f32 1.0, %v2990_v51  ;;  %vm2981_vm3 = vweird.f32 %v6362_v25  ;;  %v2986_v16 = vand.u32 2147483648, %v6323_v9  ;;  %vm2995_vm6 = vweird.f32 %v6366_v19 }
 0x863   : > { %v2978_v57 = vmul.f32 %v6362_v25, %v2977_v24  ;;  %vm6425_vm7 = vmor %vm2980_vm15, %vm2981_vm3  ;;  %vm2634_vm8 = vcmp.eq.f32.partialorder %v2633_v58, 8.507059e+37  ;;  %vm2994_vm10 = vweird.f32 %v6344_v17  ;;  %vm2985_vm15 = vcmp.eq.f32.partialorder %v2984_v31, 8.507059e+37 }
 0x864   : > { %v2992_v23 = vmul.f32 %v6366_v19, %v2991_v8  ;;  %vm6431_vm12 = vmor %vm2994_vm10, %vm2995_vm6 }
 0x865   : > { %3454 = vrot.lane.b32.xlu2 %v5190_v60, %s4953_s14  ;;  %v2979_v0 = vadd.f32 %v6362_v25, %v2978_v57  ;;  %v2987_v57 = vor.u32 1.1754944e-38, %v2986_v16 }
 0x866   : > { %v6373_v12 = vpop.eup %4632  ;;  %4250 = vmatmul.msk.bf16.gmra.mxu0 %vm975_vm1, %v2689_v44  ;;  %v3059_v44 = vmul.f32 %v6207_v27, %v2960_v14  ;;  %v2636_v14 = vor.u32 1.1754944e-38, %v2635_v6 }
 0x867   : > { %v2625_v38 = vmul.f32 %v6373_v12, %v6353_v52  ;;  %v2561_v28 = vpop.xlane.xlu2 %2560  ;;  %vm2630_vm14 = vweird.f32 %v6373_v12 }
 0x868   : > { %4634 = vrcp.f32 %v2561_v28  ;;  %vm6411_vm4 = vmor %vm2629_vm2, %vm2630_vm14  ;;  %v2649_v36 = vand.u32 2147483648, %v2561_v28  ;;  %v2647_v52 = vand.u32 2147483647, %v2561_v28  ;;  %vm2643_vm9 = vweird.f32 %v2561_v28 }
 0x869   : > { %v2626_v55 = vsub.f32 1.0, %v2625_v38  ;;  %v3067_v38 = vpack.c.bf16 %v3060_v54, %v3059_v44 }
 0x86a   : > { %v2650_v8 = vor.u32 1.1754944e-38, %v2649_v36  ;;  %vm2648_vm13 = vcmp.eq.f32.partialorder %v2647_v52, 8.507059e+37 }
 0x86b   : > { %v2627_v30 = vmul.f32 %v6373_v12, %v2626_v55  ;;  %v2993_v55 = vadd.f32 %v6366_v19, %v2992_v23 }
 0x86d   : > { %v2628_v60 = vadd.f32 %v6373_v12, %v2627_v30  ;;  %v3000_v30 = vand.u32 2147483648, %v6344_v17  ;;  %v2997_v9 = vsel %vm6431_vm12, %v6366_v19, %v2993_v55 }
 0x86e   : > { %v4635_v63 = vpop.eup %4634 }
 0x86f   : > { %v2639_v62 = vmul.f32 %v4635_v63, %v2561_v28  ;;  %v2632_v5 = vsel %vm6411_vm4, %v6373_v12, %v2628_v60  ;;  %vm2644_vm5 = vweird.f32 %v4635_v63  ;;  %v2998_v12 = vand.u32 2147483647, %v6344_v17 }
 0x870   : > { %v3072_v33 = vpop.permute.xlu1 %3071  ;;  %vm2645_vm11 = vmor %vm2643_vm9, %vm2644_vm5  ;;  %v2637_v24 = vsel %vm2634_vm8, %v2636_v14, %v2632_v5  ;;  %v2983_v28 = vsel %vm6425_vm7, %v6362_v25, %v2979_v0  ;;  %v3001_v23 = vor.u32 1.1754944e-38, %v3000_v30 }
 0x871   : > { %v2640_v27 = vsub.f32 1.0, %v2639_v62  ;;  %3102 = vmatpush.bf16.msra.mxu3 %v3072_v33  ;;  %v6441_v62 = vpop.xlane.xlu2 %2566  ;;  %v2684_v6 = vmul.f32 %v6223_v7, %v2637_v24  ;;  %vm2999_vm14 = vcmp.eq.f32.partialorder %v2998_v12, 8.507059e+37 }
 0x873   : > { %v2641_v20 = vmul.f32 %v4635_v63, %v2640_v27  ;;  %v2988_v27 = vsel %vm2985_vm15, %v2987_v57, %v2983_v28 }
 0x874   : > { %4265 = vmatmul.msk.bf16.vlgmr.msra.gmra.mxu3 %vm975_vm1, %v3067_v38  ;;  %v3002_v38 = vsel %vm2999_vm14, %v3001_v23, %v2997_v9  ;;  %v3061_v25 = vmul.f32 %v6214_v3, %v2988_v27 }
 0x875   : > { %v2642_v60 = vadd.f32 %v4635_v63, %v2641_v20  ;;  %v3062_v51 = vmul.f32 %v6217_v10, %v3002_v38  ;;  %v4344_v38 = vld [vmem:[#allocation6 + $0x28] sm:$0xff] }
 0x876   : > { %3155 = vmatpush.bf16.msra.mxu0 %v4344_v38 }
 0x877   : > { %v2646_v54 = vsel %vm2645_vm11, %v4635_v63, %v2642_v60  ;;  %v4343_v63 = vld [vmem:[#allocation6 + $0x20] sm:$0xff]  ;;  %v3068_v7 = vpack.c.bf16 %v3062_v51, %v3061_v25 }
 0x878   : > { %v2651_v17 = vsel %vm2648_vm13, %v2650_v8, %v2646_v54  ;;  %2776 = vmatpush.bf16.msra.mxu1 %v4343_v63 }
 0x879   : > { %v2685_v33 = vmul.f32 %v6228_v45, %v2651_v17 }
 0x87b   : > { %v2690_v58 = vpack.c.bf16 %v2685_v33, %v2684_v6 }
 0x87d   : > { %4251 = vmatmul.msk.bf16.gmra.mxu0 %vm975_vm1, %v2690_v58  ;;  %v2937_v19 = vpop.xlane.xlu0 %2936 }
 0x87e   : > { %4636 = vrcp.f32 %v2937_v19  ;;  %v3014_v0 = vand.u32 2147483648, %v2937_v19  ;;  %vm3008_vm3 = vweird.f32 %v2937_v19  ;;  %v3012_v3 = vand.u32 2147483647, %v2937_v19 }
 0x880   : > { %v2940_v16 = vpop.xlane.xlu2 %2939  ;;  %v3015_v8 = vor.u32 1.1754944e-38, %v3014_v0  ;;  %vm3013_vm7 = vcmp.eq.f32.partialorder %v3012_v3, 8.507059e+37 }
 0x881   : > { %4638 = vrcp.f32 %v2940_v16  ;;  %v3028_v21 = vand.u32 2147483648, %v2940_v16  ;;  %v3026_v60 = vand.u32 2147483647, %v2940_v16  ;;  %vm3022_vm6 = vweird.f32 %v2940_v16 }
 0x883   : > { %v3029_v9 = vor.u32 1.1754944e-38, %v3028_v21  ;;  %vm3027_vm9 = vcmp.eq.f32.partialorder %v3026_v60, 8.507059e+37 }
 0x884   : > { %4266 = vmatmul.msk.bf16.gmra.mxu3 %vm975_vm1, %v3068_v7  ;;  %v4637_v45 = vpop.eup %4636 }
 0x885   : > { %v3004_v31 = vmul.f32 %v4637_v45, %v2937_v19  ;;  %vm3009_vm2 = vweird.f32 %v4637_v45 }
 0x886   : > { %vm3010_vm5 = vmor %vm3008_vm3, %vm3009_vm2 }
 0x887   : > { %v4639_v36 = vpop.eup %4638  ;;  %v3005_v5 = vsub.f32 1.0, %v3004_v31 }
 0x888   : > { %v3018_v20 = vmul.f32 %v4639_v36, %v2940_v16  ;;  %v2943_v52 = vpop.xlane.xlu2 %2942  ;;  %vm3023_vm4 = vweird.f32 %v4639_v36 }
 0x889   : > { %4640 = vrcp.f32 %v2943_v52  ;;  %v3006_v55 = vmul.f32 %v4637_v45, %v3005_v5  ;;  %vm3024_vm8 = vmor %vm3022_vm6, %vm3023_vm4  ;;  %v3042_v31 = vand.u32 2147483648, %v2943_v52  ;;  %vm3036_vm11 = vweird.f32 %v2943_v52 }
 0x88a   : > { %v3019_v14 = vsub.f32 1.0, %v3018_v20  ;;  %4642 = vrcp.f32 %v6441_v62 }
 0x88b   : > { %v3007_v10 = vadd.f32 %v4637_v45, %v3006_v55 }
 0x88c   : > { %v3020_v30 = vmul.f32 %v4639_v36, %v3019_v14 }
 0x88d   : > { %v3011_v12 = vsel %vm3010_vm5, %v4637_v45, %v3007_v10  ;;  %vm2671_vm5 = vweird.f32 %v6441_v62 }
 0x88e   : > { %v3021_v24 = vadd.f32 %v4639_v36, %v3020_v30  ;;  %v3016_v23 = vsel %vm3013_vm7, %v3015_v8, %v3011_v12  ;;  %v3043_v30 = vor.u32 1.1754944e-38, %v3042_v31 }
 0x88f   : > { %v4641_v44 = vpop.eup %4640  ;;  %v3063_v63 = vmul.f32 %v6240_v22, %v3016_v23  ;;  %v3040_v22 = vand.u32 2147483647, %v2943_v52 }
 0x890   : > { %v3025_v54 = vsel %vm3024_vm8, %v4639_v36, %v3021_v24  ;;  %v3032_v28 = vmul.f32 %v4641_v44, %v2943_v52  ;;  %v2946_v17 = vpop.xlane.xlu2 %2945  ;;  %v6450_v33 = vpop.eup %4642  ;;  %vm3037_vm10 = vweird.f32 %v4641_v44 }
 0x891   : > { %4644 = vrcp.f32 %v2946_v17  ;;  %v3030_v6 = vsel %vm3027_vm9, %v3029_v9, %v3025_v54  ;;  %v2667_v51 = vmul.f32 %v6450_v33, %v6441_v62  ;;  %vm6458_vm12 = vmor %vm3036_vm11, %vm3037_vm10  ;;  %v3054_v55 = vand.u32 2147483647, %v2946_v17  ;;  %v3198_v21 = vpop.permute.xlu0 %3197 }
 0x892   : > { %v3033_v57 = vsub.f32 1.0, %v3032_v28  ;;  %v3064_v58 = vmul.f32 %v6245_v39, %v3030_v6  ;;  %v3056_v0 = vand.u32 2147483648, %v2946_v17  ;;  %vm3041_vm14 = vcmp.eq.f32.partialorder %v3040_v22, 8.507059e+37 }
 0x893   : > { %v2668_v5 = vsub.f32 1.0, %v2667_v51  ;;  %vm3050_vm15 = vweird.f32 %v2946_v17  ;;  %vm3055_vm3 = vcmp.eq.f32.partialorder %v3054_v55, 8.507059e+37  ;;  %v3220_v54 = vsel %vm921_vm0, %v3198_v21, 0 }
 0x894   : > { %v3034_v27 = vmul.f32 %v4641_v44, %v3033_v57  ;;  %v3069_v19 = vpack.c.bf16 %v3064_v58, %v3063_v63  ;;  %v3057_v12 = vor.u32 1.1754944e-38, %v3056_v0  ;;  %vm2672_vm4 = vweird.f32 %v6450_v33 }
 0x895   : > { %v2669_v60 = vmul.f32 %v6450_v33, %v2668_v5  ;;  %v2677_v6 = vand.u32 2147483648, %v6441_v62  ;;  %vm6473_vm6 = vmor %vm2671_vm5, %vm2672_vm4 }
 0x896   : > { %4267 = vmatmul.msk.bf16.gmra.mxu3 %vm975_vm1, %v3069_v19  ;;  %v3035_v16 = vadd.f32 %v4641_v44, %v3034_v27  ;;  %v2675_v27 = vand.u32 2147483647, %v6441_v62 }
 0x897   : > { %v4645_v25 = vpop.eup %4644  ;;  %v2670_v57 = vadd.f32 %v6450_v33, %v2669_v60 }
 0x898   : > { %v3046_v7 = vmul.f32 %v4645_v25, %v2946_v17  ;;  %v3200_v45 = vpop.permute.xlu2 %3199  ;;  %v3039_v3 = vsel %vm6458_vm12, %v4641_v44, %v3035_v16  ;;  %vm3051_vm13 = vweird.f32 %v4645_v25  ;;  %v2678_v16 = vor.u32 1.1754944e-38, %v2677_v6 }
 0x899   : > { %v3223_v36 = vsel %vm921_vm0, %v3200_v45, 0  ;;  %vm3052_vm2 = vmor %vm3050_vm15, %vm3051_vm13  ;;  %v3044_v8 = vsel %vm3041_vm14, %v3043_v30, %v3039_v3  ;;  %vm2676_vm8 = vcmp.eq.f32.partialorder %v2675_v27, 8.507059e+37  ;;  %v3577_v3 = vpop.permute.xlu0 %3576 }
 0x89a   : > { %v3047_v39 = vsub.f32 1.0, %v3046_v7  ;;  %3229 = vmatpush.bf16.xpose.msrb.mxu1 %v3223_v36  ;;  %v3065_v44 = vmul.f32 %v6250_v47, %v3044_v8  ;;  %v3599_v21 = vsel %vm921_vm0, %v3577_v3, 0 }
 0x89b   : > { %v2564_v14 = vpop.xlane.xlu1 %2563 }
 0x89c   : > { %v3048_v10 = vmul.f32 %v4645_v25, %v3047_v39  ;;  %4646 = vrcp.f32 %v2564_v14  ;;  %v2663_v47 = vand.u32 2147483648, %v2564_v14  ;;  %v2661_v51 = vand.u32 2147483647, %v2564_v14 }
 0x89d   : > { %vm2657_vm9 = vweird.f32 %v2564_v14 }
 0x89e   : > { %v3049_v52 = vadd.f32 %v4645_v25, %v3048_v10  ;;  %v2664_v45 = vor.u32 1.1754944e-38, %v2663_v47  ;;  %vm2662_vm11 = vcmp.eq.f32.partialorder %v2661_v51, 8.507059e+37 }
 0x8a0   : > { %v3053_v24 = vsel %vm3052_vm2, %v4645_v25, %v3049_v52  ;;  %v3196_v63 = vpop.permute.xlu2 %3195 }
 0x8a1   : > { %v3058_v9 = vsel %vm3055_vm3, %v3057_v12, %v3053_v24  ;;  %v3217_v62 = vsel %vm921_vm0, %v3196_v63, 0 }
 0x8a2   : > { %v4647_v28 = vpop.eup %4646  ;;  %3230 = vmatpush.bf16.xpose.msrb.mxu1 %v3220_v54  ;;  %v3066_v23 = vmul.f32 %v6256_v32, %v3058_v9  ;;  %v2674_v32 = vsel %vm6473_vm6, %v6450_v33, %v2670_v57 }
 0x8a3   : > { %v2653_v17 = vmul.f32 %v4647_v28, %v2564_v14  ;;  %vm2658_vm7 = vweird.f32 %v4647_v28  ;;  %v2679_v31 = vsel %vm2676_vm8, %v2678_v16, %v2674_v32 }
 0x8a4   : > { %v3070_v58 = vpack.c.bf16 %v3066_v23, %v3065_v44  ;;  %vm2659_vm10 = vmor %vm2657_vm9, %vm2658_vm7  ;;  %v2687_v39 = vmul.f32 %v6232_v35, %v2679_v31 }
 0x8a5   : > { %v2654_v38 = vsub.f32 1.0, %v2653_v17 }
 0x8a6   : > { %4268 = vmatmul.msk.bf16.gmra.mxu3 %vm975_vm1, %v3070_v58 }
 0x8a7   : > { %v2655_v25 = vmul.f32 %v4647_v28, %v2654_v38 }
 0x8a8   : > { %v3194_v5 = vpop.permute.xlu2 %3193 }
 0x8a9   : > { %v2656_v7 = vadd.f32 %v4647_v28, %v2655_v25  ;;  %v3214_v55 = vsel %vm921_vm0, %v3194_v5, 0 }
 0x8aa   : > { %3231 = vmatpush.bf16.xpose.msrb.mxu1 %v3217_v62 }
 0x8ab   : > { %v2660_v36 = vsel %vm2659_vm10, %v4647_v28, %v2656_v7 }
 0x8ac   : > { %v2665_v22 = vsel %vm2662_vm11, %v2664_v45, %v2660_v36 }
 0x8ad   : > { %v2686_v33 = vmul.f32 %v6262_v59, %v2665_v22  ;;  %v3575_v59 = vpop.permute.xlu0 %3574 }
 0x8ae   : > { %v3596_v60 = vsel %vm921_vm0, %v3575_v59, 0 }
 0x8af   : > { %v2691_v20 = vpack.c.bf16 %v2687_v39, %v2686_v33 }
 0x8b0   : > { %v3573_v10 = vpop.permute.xlu2 %3572 }
 0x8b1   : > { %4252 = vmatmul.msk.bf16.gmra.mxu0 %vm975_vm1, %v2691_v20  ;;  %v3593_v8 = vsel %vm921_vm0, %v3573_v10, 0  ;;  %v4717_v20 = vld [vmem:[#allocation2 + $0x10] sm:$0xff] }
 0x8b2   : > { %3232 = vmatpush.bf16.xpose.msrb.mxu1 %v3214_v55  ;;  %v659_v55 = vmul.f32 %v4717_v20, %v5454_v48  ;;  %v4719_v10 = vld [vmem:[#allocation2 + $0x12] sm:$0xff] }
 0x8b3   : > { %v3579_v0 = vpop.permute.xlu1 %3578 }
 0x8b4   : > { %v3602_v14 = vsel %vm921_vm0, %v3579_v0, 0  ;;  %v4718_v0 = vld [vmem:[#allocation2 + $0x11] sm:$0xff] }
 0x8b5   : > { %3608 = vmatpush.bf16.xpose.msrb.mxu0 %v3602_v14  ;;  %v3565_v5 = vpop.permute.xlu0 %3564  ;;  %v676_v14 = vmul.f32 %v4718_v0, %v7106_v49  ;;  %v4729_v0 = vld [vmem:[#allocation2 + $0x42] sm:$0xff] }
 0x8b7   : > { %v684_v3 = vadd.f32 %v676_v14, %v659_v55  ;;  %v778_v14 = vmul.f32 %v4729_v0, %v7114_v15  ;;  %v7140_v0 = vld [vmem:[#allocation22_spill] sm:$0xff] }
 0x8b8   : > { %v3567_v52 = vpop.permute.xlu2 %3566 }
 0x8bb   : > { %v3186_v30 = vpop.permute.xlu1 %3185 }
 0x8bd   : > { %3609 = vmatpush.bf16.xpose.msrb.mxu0 %v3599_v21  ;;  %v701_v21 = vmul.f32 %v4719_v10, %v7111_v11 }
 0x8c0   : > { %v6490_v24 = vpop.permute.xlu2 %3191 }
 0x8c3   : > { %v3188_v35 = vpop.permute.xlu1 %3187 }
 0x8c5   : > { %3610 = vmatpush.bf16.xpose.msrb.mxu0 %v3596_v60 }
 0x8c8   : > { %v3455_v28 = vpop.permute.xlu2 %3454 }
 0x8cb   : > { %v3569_v12 = vpop.permute.xlu1 %3568 }
 0x8cd   : > { %3611 = vmatpush.bf16.xpose.msrb.mxu0 %v3593_v8  ;;  %v709_v8 = vadd.f32 %v701_v21, %v684_v3  ;;  %v4730_v3 = vld [vmem:[#allocation2 + $0x50] sm:$0xff] }
 0x8ce   : > { %v663_v10 = vmul.f32 %v4730_v3, %v5454_v48  ;;  %v4731_v21 = vld [vmem:[#allocation2 + $0x51] sm:$0xff] }
 0x8d3   : > { %v3457_v54 = vpop.permute.xlu1 %3456  ;;  %v2725_v9 = vpop.f32.mrf.mxu0 }
 0x8d4   : > { %3478 = vmatpush.bf16.msrb.mxu2 %v3457_v54  ;;  %v4720_v54 = vld [vmem:[#allocation2 + $0x20] sm:$0xff] }
 0x8d8   : > { %3479 = vmatpush.bf16.msrb.mxu2 %v3455_v28 }
 0x8db   : > { %v2727_v44 = vpop.f32.mrf.mxu0 }
 0x8dc   : > { %v2745_v23 = vpack.c.bf16 %v2727_v44, %v2725_v9  ;;  %v4721_v9 = vld [vmem:[#allocation2 + $0x21] sm:$0xff] }
 0x8dd   : > { %v751_v28 = vmul.f32 %v4721_v9, %v7113_v41 }
 0x8de   : > { %4257 = vmatmul.msk.bf16.vlgmr.msra.gmra.mxu1 %vm921_vm0, %v2745_v23  ;;  %v4722_v23 = vld [vmem:[#allocation2 + $0x22] sm:$0xff] }
 0x8e3   : > { %v2730_v57 = vpop.f32.mrf.mxu0 }
 0x8eb   : > { %v2732_v17 = vpop.f32.mrf.mxu0 }
 0x8ec   : > { %v2746_v6 = vpack.c.bf16 %v2732_v17, %v2730_v57  ;;  %v776_v57 = vmul.f32 %v4722_v23, %v7114_v15  ;;  %v4723_v17 = vld [vmem:[#allocation2 + $0x30] sm:$0xff] }
 0x8ed   : > { %v7138_v23 = vld [vmem:[#allocation21_spill] sm:$0xff] }
 0x8ee   : > { %4258 = vmatmul.msk.bf16.gmra.mxu1 %vm921_vm0, %v2746_v6  ;;  %v661_v6 = vmul.f32 %v4723_v17, %v5454_v48 }
 0x8f7   : > { %v3104_v63 = vpop.f32.mrf.mxu3 }
 0x8fa   : > { %v2735_v58 = vpop.f32.mrf.mxu0 }
 0x8ff   : > { %v3106_v27 = vpop.f32.mrf.mxu3 }
 0x900   : > { %v3124_v38 = vpack.c.bf16 %v3106_v27, %v3104_v63 }
 0x902   : > { %4273 = vmatmul.msk.bf16.vlgmr.msra.gmra.mxu0 %vm921_vm0, %v3124_v38  ;;  %v2737_v19 = vpop.f32.mrf.mxu0  ;;  %v802_v38 = vmul.f32 %v4723_v17, %v7115_v4 }
 0x903   : > { %v2747_v47 = vpack.c.bf16 %v2737_v19, %v2735_v58  ;;  %v3190_v58 = vpop.permute.xlu0 %3189 }
 0x905   : > { %4259 = vmatmul.msk.bf16.gmra.mxu1 %vm921_vm0, %v2747_v47  ;;  %v4725_v47 = vld [vmem:[#allocation2 + $0x32] sm:$0xff] }
 0x907   : > { %v3109_v32 = vpop.f32.mrf.mxu3 }
 0x90b   : > { %v3571_v20 = vpop.permute.xlu0 %3570 }
 0x90f   : > { %v3111_v25 = vpop.f32.mrf.mxu3 }
 0x910   : > { %v3125_v51 = vpack.c.bf16 %v3111_v25, %v3109_v32 }
 0x912   : > { %4274 = vmatmul.msk.bf16.gmra.mxu0 %vm921_vm0, %v3125_v51 }
 0x919   : > { %v3114_v16 = vpop.f32.mrf.mxu3 }
 0x921   : > { %v3116_v7 = vpop.f32.mrf.mxu3 }
 0x922   : > { %v3126_v62 = vpack.c.bf16 %v3116_v7, %v3114_v16 }
 0x924   : > { %4275 = vmatmul.msk.bf16.gmra.mxu0 %vm921_vm0, %v3126_v62  ;;  %v4726_v62 = vld [vmem:[#allocation2 + $0x40] sm:$0xff] }
 0x929   : > { %v3119_v45 = vpop.f32.mrf.mxu3 }
 0x92e   : > { %v2740_v31 = vpop.f32.mrf.mxu0 }
 0x931   : > { %v3121_v36 = vpop.f32.mrf.mxu3 }
 0x932   : > { %v3127_v22 = vpack.c.bf16 %v3121_v36, %v3119_v45  ;;  %v728_v45 = vmul.f32 %v4726_v62, %v7112_v18  ;;  %v6524_v36 = vld [vmem:[#allocation8 + $0x8] ss:$0 sm:$0xff] }
 0x934   : > { %4276 = vmatmul.msk.bf16.gmra.mxu0 %vm921_vm0, %v3127_v22  ;;  %v852_v22 = vmul.f32 %v6524_v36, %v4725_v47 }
 0x936   : > { %v2742_v33 = vpop.f32.mrf.mxu0 }
 0x937   : > { %v2748_v39 = vpack.c.bf16 %v2742_v33, %v2740_v31 }
 0x939   : > { %4260 = vmatmul.msk.bf16.gmra.mxu1 %vm921_vm0, %v2748_v39  ;;  %v4728_v39 = vld [vmem:[#allocation2 + $0x41] sm:$0xff] }
 0x944   : > { %4293 = vmatmul.msk.bf16.vlgmr.msrb.gmra.mxu0 %vm921_vm0, %v3565_v5  ;;  %v753_v5 = vmul.f32 %v4728_v39, %v7113_v41 }
 0x949   : > { %4277 = vmatmul.msk.bf16.vlgmr.msrb.gmra.mxu1 %vm921_vm0, %v3186_v30  ;;  %v726_v30 = vmul.f32 %v4720_v54, %v7112_v18 }
 0x954   : > { %4294 = vmatmul.msk.bf16.gmra.mxu0 %vm921_vm0, %v3567_v52  ;;  %v734_v52 = vadd.f32 %v726_v30, %v709_v8  ;;  %v804_v30 = vmul.f32 %v4730_v3, %v7115_v4 }
 0x959   : > { %4278 = vmatmul.msk.bf16.gmra.mxu1 %vm921_vm0, %v3188_v35  ;;  %v759_v35 = vadd.f32 %v751_v28, %v734_v52  ;;  %v4732_v28 = vld [vmem:[#allocation2 + $0x52] sm:$0xff] }
 0x95b   : > { %v2778_v59 = vpop.f32.mrf.mxu1  ;;  %v784_v27 = vadd.f32 %v776_v57, %v759_v35  ;;  %v705_v35 = vmul.f32 %v4732_v28, %v7111_v11 }
 0x95c   : > { %v2798_v60 = vadd.f32 %v2778_v59, %v6096_v56  ;;  %v4724_v56 = vld [vmem:[#allocation2 + $0x31] sm:$0xff]  ;;  %v680_v59 = vmul.f32 %v4731_v21, %v7106_v49 }
 0x95d   : > { %v678_v63 = vmul.f32 %v4724_v56, %v7106_v49  ;;  %v810_v51 = vadd.f32 %v802_v38, %v784_v27  ;;  %v827_v16 = vmul.f32 %v4724_v56, %v7116_v1  ;;  %v4733_v38 = vld [vmem:[#allocation2 + $0x60] sm:$0xff] }
 0x95e   : > { %v688_v9 = vadd.f32 %v680_v59, %v663_v10  ;;  %v4737_v10 = vld [vmem:[#allocation2 + $0x71] sm:$0xff] }
 0x95f   : > { %v686_v19 = vadd.f32 %v678_v63, %v661_v6  ;;  %v835_v31 = vadd.f32 %v827_v16, %v810_v51  ;;  %v829_v6 = vmul.f32 %v4731_v21, %v7116_v1  ;;  %v7139_v63 = vld [vmem:[#allocation36_spill] sm:$0xff]  ;;  %v7141_v59 = vld [vmem:[#allocation38_spill] sm:$0xff] }
 0x963   : > { %v6510_v44 = vpop.f32.mrf.mxu1 }
 0x964   : > { %4295 = vmatmul.msk.bf16.gmra.mxu0 %vm921_vm0, %v3569_v12  ;;  %v703_v12 = vmul.f32 %v4725_v47, %v7111_v11 }
 0x966   : > { %v711_v7 = vadd.f32 %v703_v12, %v686_v19  ;;  %v730_v19 = vmul.f32 %v4733_v38, %v7112_v18  ;;  %v854_v12 = vmul.f32 %v4732_v28, %v6524_v36 }
 0x968   : > { %v736_v33 = vadd.f32 %v728_v45, %v711_v7  ;;  %v4734_v45 = vld [vmem:[#allocation2 + $0x61] sm:$0xff] }
 0x969   : > { %4279 = vmatmul.msk.bf16.gmra.mxu1 %vm921_vm0, %v3190_v58 }
 0x96a   : > { %v761_v55 = vadd.f32 %v753_v5, %v736_v33 }
 0x96b   : > { %v2783_v32 = vpop.f32.mrf.mxu1 }
 0x96c   : > { %v6520_v25 = vadd.f32 %v2783_v32, %v6111_v26  ;;  %v860_v26 = vadd.f32 %v852_v22, %v835_v31  ;;  %v786_v54 = vadd.f32 %v778_v14, %v761_v55  ;;  %v755_v31 = vmul.f32 %v4734_v45, %v7113_v41  ;;  %v4742_v45 = vld [vmem:[#allocation2] sm:$0xff] }
 0x96e   : > { %v874_v8 = vadd.f32 %v7117_v40, %v860_v26  ;;  %v812_v17 = vadd.f32 %v804_v30, %v786_v54 }
 0x970   : > { %v1283_v57 = vadd.f32 %v7138_v23, %v874_v8  ;;  %v837_v47 = vadd.f32 %v829_v6, %v812_v17  ;;  %v4738_v23 = vld [vmem:[#allocation2 + $0x72] sm:$0xff] }
 0x972   : > { %v1662_v58 = vadd.f32 %v7139_v63, %v1283_v57  ;;  %v707_v57 = vmul.f32 %v4738_v23, %v7111_v11  ;;  %v4739_v63 = vld [vmem:[#allocation2 + $0x80] sm:$0xff] }
 0x973   : > { %v2785_v52 = vpop.f32.mrf.mxu1 }
 0x974   : > { %4296 = vmatmul.msk.bf16.gmra.mxu0 %vm921_vm0, %v3571_v20  ;;  %v2041_v32 = vadd.f32 %v6098_v61, %v1662_v58  ;;  %v4735_v20 = vld [vmem:[#allocation2 + $0x62] sm:$0xff] }
 0x975   : > { %v780_v26 = vmul.f32 %v4735_v20, %v7114_v15 }
 0x976   : > { %v2420_v7 = vadd.f32 %v6109_v42, %v2041_v32 }
 0x978   : > { %v2799_v22 = vadd.f32 %v6510_v44, %v2420_v7  ;;  %v682_v44 = vmul.f32 %v4737_v10, %v7106_v49  ;;  %v856_v49 = vmul.f32 %v4738_v23, %v6524_v36 }
 0x979   : > { %4280 = vmatmul.msk.bf16.gmra.mxu1 %vm921_vm0, %v6490_v24  ;;  %v713_v24 = vadd.f32 %v705_v35, %v688_v9  ;;  %v831_v9 = vmul.f32 %v4737_v10, %v7116_v1 }
 0x97b   : > { %v738_v62 = vadd.f32 %v730_v19, %v713_v24 }
 0x97d   : > { %v763_v5 = vadd.f32 %v755_v31, %v738_v62 }
 0x97f   : > { %v3157_v56 = vpop.f32.mrf.mxu0  ;;  %v788_v55 = vadd.f32 %v780_v26, %v763_v5  ;;  %v849_v26 = vld [vmem:[#allocation2 + $0x92] sm:$0xff] }
 0x980   : > { %v6540_v27 = vadd.f32 %v3157_v56, %v2798_v60  ;;  %v862_v60 = vadd.f32 %v854_v12, %v837_v47 }
 0x982   : > { %v2788_v51 = vpop.f32.mrf.mxu1  ;;  %v876_v61 = vadd.f32 %v7117_v40, %v862_v60 }
 0x983   : > { %v2802_v16 = vadd.f32 %v2788_v51, %v6117_v13  ;;  %v4736_v13 = vld [vmem:[#allocation2 + $0x70] sm:$0xff]  ;;  %v7142_v51 = vld [vmem:[#allocation28_spill] sm:$0xff] }
 0x984   : > { %v806_v42 = vmul.f32 %v4736_v13, %v7115_v4  ;;  %v1285_v14 = vadd.f32 %v7140_v0, %v876_v61  ;;  %v665_v3 = vmul.f32 %v4736_v13, %v5454_v48 }
 0x986   : > { %v1664_v8 = vadd.f32 %v7141_v59, %v1285_v14  ;;  %v814_v30 = vadd.f32 %v806_v42, %v788_v55  ;;  %v690_v35 = vadd.f32 %v682_v44, %v665_v3  ;;  %v858_v42 = vmul.f32 %v6524_v36, %v849_v26  ;;  %v7144_v44 = vld [vmem:[#allocation23_spill] sm:$0xff]  ;;  %v7145_v59 = vld [vmem:[#allocation24_spill] sm:$0xff] }
 0x987   : > { %v3159_v33 = vpop.f32.mrf.mxu0 }
 0x988   : > { %v6549_v39 = vadd.f32 %v3159_v33, %v2799_v22  ;;  %v2043_v28 = vadd.f32 %v6105_v46, %v1664_v8  ;;  %v839_v17 = vadd.f32 %v831_v9, %v814_v30  ;;  %v715_v56 = vadd.f32 %v707_v57, %v690_v35  ;;  %v4740_v46 = vld [vmem:[#allocation2 + $0x81] sm:$0xff]  ;;  %v824_v22 = vld [vmem:[#allocation2 + $0x91] sm:$0xff] }
 0x989   : > { %v757_v47 = vmul.f32 %v4740_v46, %v7113_v41  ;;  %v833_v20 = vmul.f32 %v7116_v1, %v824_v22  ;;  %v7148_v22 = vld [vmem:[#allocation18_spill] sm:$0xff] }
 0x98a   : > { %v2422_v48 = vadd.f32 %v6115_v50, %v2043_v28  ;;  %v864_v38 = vadd.f32 %v856_v49, %v839_v17  ;;  %v4741_v50 = vld [vmem:[#allocation2 + $0x82] sm:$0xff]  ;;  %v2790_v33 = vpop.f32.mrf.mxu1 }
 0x98b   : > { %v782_v32 = vmul.f32 %v4741_v50, %v7114_v15 }
 0x98c   : > { %v2801_v6 = vadd.f32 %v2785_v52, %v2422_v48  ;;  %v878_v11 = vadd.f32 %v7117_v40, %v864_v38 }
 0x98e   : > { %v1287_v52 = vadd.f32 %v7142_v51, %v878_v11  ;;  %v7146_v51 = vld [vmem:[#allocation19_spill] sm:$0xff] }
 0x98f   : > { %v3162_v21 = vpop.f32.mrf.mxu0 }
 0x990   : > { %v6559_v54 = vadd.f32 %v3162_v21, %v6520_v25  ;;  %v732_v25 = vmul.f32 %v4739_v63, %v7112_v18  ;;  %v808_v18 = vmul.f32 %v4742_v45, %v7115_v4  ;;  %v1666_v31 = vadd.f32 %v6072_v34, %v1287_v52 }
 0x992   : > { %v740_v19 = vadd.f32 %v732_v25, %v715_v56  ;;  %v2045_v41 = vadd.f32 %v6113_v43, %v1666_v31  ;;  %v7143_v43 = vld [vmem:[#allocation33_spill] sm:$0xff]  ;;  %v7147_v31 = vld [vmem:[#allocation20_spill] sm:$0xff] }
 0x994   : > { %v765_v12 = vadd.f32 %v757_v47, %v740_v19  ;;  %v2424_v15 = vadd.f32 %v6121_v29, %v2045_v41 }
 0x996   : > { %v790_v62 = vadd.f32 %v782_v32, %v765_v12  ;;  %v2803_v61 = vadd.f32 %v2790_v33, %v2424_v15 }
 0x997   : > { %v3164_v58 = vpop.f32.mrf.mxu0 }
 0x998   : > { %v6567_v24 = vadd.f32 %v3164_v58, %v2801_v6  ;;  %v816_v5 = vadd.f32 %v808_v18, %v790_v62 }
 0x99a   : > { %v841_v13 = vadd.f32 %v833_v20, %v816_v5 }
 0x99c   : > { %v866_v34 = vadd.f32 %v858_v42, %v841_v13 }
 0x9a1   : > { %v3167_v7 = vpop.f32.mrf.mxu0 }
 0x9a2   : > { %v6575_v60 = vadd.f32 %v3167_v7, %v2802_v16  ;;  %v880_v16 = vadd.f32 %v7117_v40, %v866_v34 }
 0x9a4   : > { %v1289_v3 = vadd.f32 %v7143_v43, %v880_v16 }
 0x9a6   : > { %v1668_v1 = vadd.f32 %v6089_v2, %v1289_v3 }
 0x9a8   : > { %v2047_v21 = vadd.f32 %v7144_v44, %v1668_v1 }
 0x9a9   : > { %v3169_v55 = vpop.f32.mrf.mxu0 }
 0x9aa   : > { %v6581_v4 = vadd.f32 %v3169_v55, %v2803_v61  ;;  %v2426_v8 = vadd.f32 %v7145_v59, %v2047_v21 }
 0x9b1   : > { %v3172_v0 = vpop.f32.mrf.mxu0 }
 0x9b6   : > { %v2793_v14 = vpop.f32.mrf.mxu1 }
 0x9b7   : > { %v2804_v10 = vadd.f32 %v2793_v14, %v6124_v37 }
 0x9b9   : > { %v6587_v29 = vadd.f32 %v3172_v0, %v2804_v10  ;;  %v3174_v9 = vpop.f32.mrf.mxu0 }
 0x9be   : > { %v2795_v36 = vpop.f32.mrf.mxu1 }
 0x9bf   : > { %v2805_v30 = vadd.f32 %v2795_v36, %v2426_v8 }
 0x9c1   : > { %v6591_v28 = vadd.f32 %v3174_v9, %v2805_v30  ;;  %v6596_v48 = vpop.f32.mrf.mxu0 }
 0x9c2   : > { %v3633_v19 = vsel %vm975_vm1, %v6596_v48, -inf }
 0x9c6   : > { %v3234_v40 = vpop.f32.mrf.mxu1 }
 0x9c7   : > { %v3254_v35 = vsel %vm975_vm1, %v3234_v40, -inf }
 0x9c8   : > { %3255 = vmax.xlane.f32.xlu1 %v3254_v35 }
 0x9c9   : > { %v6599_v6 = vpop.f32.mrf.mxu0 }
 0x9ca   : > { %v3636_v61 = vsel %vm975_vm1, %v6599_v6, -inf }
 0x9ce   : > { %v3236_v23 = vpop.f32.mrf.mxu1 }
 0x9cf   : > { %v3257_v37 = vsel %vm975_vm1, %v3236_v23, -inf }
 0x9d0   : > { %3258 = vmax.xlane.f32.xlu2 %v3257_v37 }
 0x9d1   : > { %v6605_v25 = vpop.f32.mrf.mxu0 }
 0x9d2   : > { %v3639_v0 = vsel %vm975_vm1, %v6605_v25, -inf }
 0x9d6   : > { %v3239_v2 = vpop.f32.mrf.mxu1 }
 0x9d7   : > { %v3260_v57 = vsel %vm975_vm1, %v3239_v2, -inf }
 0x9d8   : > { %3261 = vmax.xlane.f32.xlu2 %v3260_v57 }
 0x9d9   : > { %v6613_v46 = vpop.f32.mrf.mxu0 }
 0x9da   : > { %v3642_v52 = vsel %vm975_vm1, %v6613_v46, -inf }
 0x9de   : > { %v3241_v17 = vpop.f32.mrf.mxu1 }
 0x9df   : > { %v3263_v49 = vsel %vm975_vm1, %v3241_v17, -inf }
 0x9e0   : > { %3264 = vmax.xlane.f32.xlu0 %v3263_v49 }
 0x9e1   : > { %v6623_v32 = vpop.f32.mrf.mxu0 }
 0x9e2   : > { %v3645_v62 = vsel %vm975_vm1, %v6623_v32, -inf }
 0x9e6   : > { %v6601_v56 = vpop.f32.mrf.mxu1 }
 0x9e7   : > { %v3266_v63 = vsel %vm975_vm1, %v6601_v56, -inf }
 0x9e8   : > { %3267 = vmax.xlane.f32.xlu0 %v3266_v63 }
 0x9e9   : > { %v6629_v7 = vpop.f32.mrf.mxu0 }
 0x9ea   : > { %v3648_v16 = vsel %vm975_vm1, %v6629_v7, -inf }
 0x9ee   : > { %v6607_v58 = vpop.f32.mrf.mxu1 }
 0x9ef   : > { %v3269_v38 = vsel %vm975_vm1, %v6607_v58, -inf }
 0x9f0   : > { %3270 = vmax.xlane.f32.xlu1 %v3269_v38  ;;  %3634 = vmax.xlane.f32.xlu0 %v3633_v19 }
 0x9f1   : > { %v6635_v45 = vpop.f32.mrf.mxu0 }
 0x9f2   : > { %v3651_v18 = vsel %vm975_vm1, %v6635_v45, -inf }
 0x9f6   : > { %v6615_v47 = vpop.f32.mrf.mxu1 }
 0x9f7   : > { %v3272_v11 = vsel %vm975_vm1, %v6615_v47, -inf }
 0x9f8   : > { %3273 = vmax.xlane.f32.xlu1 %v3272_v11 }
 0x9f9   : > { %v6661_v8 = vpop.f32.mrf.mxu0 }
 0x9fa   : > { %v3654_v30 = vsel %vm975_vm1, %v6661_v8, -inf }
 0x9fe   : > { %v6619_v12 = vpop.f32.mrf.mxu1 }
 0x9ff   : > { %v3275_v50 = vsel %vm975_vm1, %v6619_v12, -inf }
 0xa00   : > { %3276 = vmax.xlane.f32.xlu2 %v3275_v50 }
 0xa04   : > { %3452 = vrot.lane.b32.xlu0 %v7146_v51, %s4953_s14 }
 0xa08   : > { %3643 = vmax.xlane.f32.xlu2 %v3642_v52 }
 0xa10   : > { %3646 = vmax.xlane.f32.xlu2 %v3645_v62 }
 0xa11   : > { %3835 = vrot.lane.b32.xlu1 %v5183_v53, %s4954_s15 }
 0xa18   : > { %3652 = vmax.xlane.f32.xlu2 %v3651_v18 }
 0xa19   : > { %3450 = vrot.lane.b32.xlu1 %v7147_v31, %s4953_s14 }
 0xa21   : > { %3833 = vrot.lane.b32.xlu1 %v7148_v22, %s4954_s15 }
 0xa3b   : > { %v3256_v41 = vpop.xlane.xlu1 %3255 }
 0xa3c   : > { %v3278_v33 = vsub.f32 %v3234_v40, %v3256_v41 }
 0xa3e   : > { %v3286_v5 = vmul.f32 1.442695, %v3278_v33 }
 0xa40   : > { %4648 = vpow2.f32 %v3286_v5 }
 0xa43   : > { %v3259_v20 = vpop.xlane.xlu2 %3258 }
 0xa44   : > { %v3279_v26 = vsub.f32 %v3236_v23, %v3259_v20 }
 0xa46   : > { %v6643_v15 = vpop.eup %4648  ;;  %v3288_v42 = vmul.f32 1.442695, %v3279_v26 }
 0xa47   : > { %v3302_v53 = vsel %vm975_vm1, %v6643_v15, 0.0 }
 0xa48   : > { %3303 = vadd.xlane.f32.xlu0 %v3302_v53 }
 0xa4b   : > { %3637 = vmax.xlane.f32.xlu1 %v3636_v61  ;;  %v3262_v55 = vpop.xlane.xlu2 %3261 }
 0xa4c   : > { %v3280_v13 = vsub.f32 %v3239_v2, %v3262_v55 }
 0xa4e   : > { %v3290_v34 = vmul.f32 1.442695, %v3280_v13 }
 0xa50   : > { %4650 = vpow2.f32 %v3290_v34  ;;  %3649 = vmax.xlane.f32.xlu0 %v3648_v16 }
 0xa51   : > { %4652 = vpow2.f32 %v3288_v42 }
 0xa53   : > { %v3265_v14 = vpop.xlane.xlu0 %3264  ;;  %3640 = vmax.xlane.f32.xlu1 %v3639_v0 }
 0xa54   : > { %v3281_v43 = vsub.f32 %v3241_v17, %v3265_v14 }
 0xa56   : > { %v6653_v3 = vpop.eup %4650  ;;  %v3292_v10 = vmul.f32 1.442695, %v3281_v43 }
 0xa57   : > { %v6655_v1 = vpop.eup %4652  ;;  %v3308_v44 = vsel %vm975_vm1, %v6653_v3, 0.0 }
 0xa58   : > { %4654 = vpow2.f32 %v3292_v10  ;;  %3309 = vadd.xlane.f32.xlu0 %v3308_v44  ;;  %v3305_v21 = vsel %vm975_vm1, %v6655_v1, 0.0 }
 0xa5b   : > { %v3268_v59 = vpop.xlane.xlu0 %3267  ;;  %3306 = vadd.xlane.f32.xlu1 %v3305_v21 }
 0xa5c   : > { %v3282_v62 = vsub.f32 %v6601_v56, %v3268_v59 }
 0xa5e   : > { %v6663_v36 = vpop.eup %4654  ;;  %v3294_v33 = vmul.f32 1.442695, %v3282_v62 }
 0xa5f   : > { %v3311_v9 = vsel %vm975_vm1, %v6663_v36, 0.0 }
 0xa60   : > { %3312 = vadd.xlane.f32.xlu2 %v3311_v9  ;;  %3655 = vmax.xlane.f32.xlu0 %v3654_v30 }
 0xa63   : > { %v3635_v40 = vpop.xlane.xlu0 %3634  ;;  %v3271_v57 = vpop.xlane.xlu1 %3270 }
 0xa64   : > { %v3657_v35 = vsub.f32 %v6596_v48, %v3635_v40  ;;  %v3283_v43 = vsub.f32 %v6607_v58, %v3271_v57 }
 0xa66   : > { %v3665_v23 = vmul.f32 1.442695, %v3657_v35  ;;  %v3296_v9 = vmul.f32 1.442695, %v3283_v43 }
 0xa68   : > { %4656 = vpow2.f32 %v3665_v23 }
 0xa6b   : > { %v3274_v49 = vpop.xlane.xlu1 %3273 }
 0xa6c   : > { %v3284_v20 = vsub.f32 %v6615_v47, %v3274_v49 }
 0xa6e   : > { %v6670_v37 = vpop.eup %4656 }
 0xa6f   : > { %v3681_v2 = vsel %vm975_vm1, %v6670_v37, 0.0 }
 0xa70   : > { %3682 = vadd.xlane.f32.xlu2 %v3681_v2 }
 0xa73   : > { %v6678_v19 = vpop.xlane.xlu2 %3276 }
 0xa74   : > { %3831 = vrot.lane.b32.xlu1 %v7146_v51, %s4954_s15 }
 0xa76   : > { %v3453_v17 = vpop.permute.xlu0 %3452 }
 0xa77   : > { %3480 = vmatpush.bf16.msrb.mxu2 %v3453_v17 }
 0xa7b   : > { %v3644_v11 = vpop.xlane.xlu2 %3643 }
 0xa7c   : > { %v3660_v61 = vsub.f32 %v6613_v46, %v3644_v11 }
 0xa7e   : > { %v3671_v47 = vmul.f32 1.442695, %v3660_v61 }
 0xa83   : > { %v3836_v63 = vpop.permute.xlu1 %3835  ;;  %v6685_v18 = vpop.xlane.xlu2 %3646 }
 0xa84   : > { %3857 = vmatpush.bf16.msra.mxu1 %v3836_v63 }
 0xa88   : > { %3829 = vrot.lane.b32.xlu2 %v7147_v31, %s4954_s15 }
 0xa8b   : > { %v3451_v48 = vpop.permute.xlu1 %3450  ;;  %v3653_v34 = vpop.xlane.xlu2 %3652 }
 0xa8c   : > { %3481 = vmatpush.bf16.msrb.mxu2 %v3451_v48  ;;  %v3663_v21 = vsub.f32 %v6635_v45, %v3653_v34  ;;  %v3661_v48 = vsub.f32 %v6623_v32, %v6685_v18 }
 0xa8e   : > { %v3677_v23 = vmul.f32 1.442695, %v3663_v21 }
 0xa93   : > { %v3834_v38 = vpop.permute.xlu1 %3833 }
 0xa94   : > { %3858 = vmatpush.bf16.msra.mxu1 %v3834_v38 }
 0xabb   : > { %v6680_v50 = vpop.xlane.xlu0 %3303 }
 0xabc   : > { %4658 = vrcp.f32 %v6680_v50  ;;  %vm3331_vm13 = vweird.f32 %v6680_v50  ;;  %v3337_v63 = vand.u32 2147483648, %v6680_v50  ;;  %v3335_v11 = vand.u32 2147483647, %v6680_v50 }
 0xabe   : > { %v3638_v52 = vpop.xlane.xlu1 %3637  ;;  %vm3336_vm2 = vcmp.eq.f32.partialorder %v3335_v11, 8.507059e+37 }
 0xabf   : > { %v3658_v51 = vsub.f32 %v6599_v6, %v3638_v52 }
 0xac1   : > { %v3667_v22 = vmul.f32 1.442695, %v3658_v51 }
 0xac2   : > { %v6688_v5 = vpop.eup %4658 }
 0xac3   : > { %4660 = vpow2.f32 %v3667_v22  ;;  %v3650_v31 = vpop.xlane.xlu0 %3649  ;;  %v3327_v55 = vmul.f32 %v6688_v5, %v6680_v50  ;;  %vm3332_vm12 = vweird.f32 %v6688_v5 }
 0xac4   : > { %v3662_v41 = vsub.f32 %v6629_v7, %v3650_v31  ;;  %v3298_v7 = vmul.f32 1.442695, %v3284_v20  ;;  %vm6732_vm14 = vmor %vm3331_vm13, %vm3332_vm12 }
 0xac5   : > { %v3328_v16 = vsub.f32 1.0, %v3327_v55 }
 0xac6   : > { %v3675_v53 = vmul.f32 1.442695, %v3662_v41  ;;  %v3641_v26 = vpop.xlane.xlu1 %3640 }
 0xac7   : > { %v3659_v6 = vsub.f32 %v6605_v25, %v3641_v26  ;;  %v3329_v59 = vmul.f32 %v6688_v5, %v3328_v16  ;;  %v3673_v26 = vmul.f32 1.442695, %v3661_v48 }
 0xac8   : > { %4662 = vpow2.f32 %v3675_v53 }
 0xac9   : > { %v6693_v56 = vpop.eup %4660  ;;  %4664 = vpow2.f32 %v3294_v33  ;;  %v3669_v13 = vmul.f32 1.442695, %v3659_v6  ;;  %v3330_v2 = vadd.f32 %v6688_v5, %v3329_v59  ;;  %v3338_v33 = vor.u32 1.1754944e-38, %v3337_v63 }
 0xaca   : > { %v3684_v42 = vsel %vm975_vm1, %v6693_v56, 0.0 }
 0xacb   : > { %4666 = vpow2.f32 %v3669_v13  ;;  %3685 = vadd.xlane.f32.xlu0 %v3684_v42  ;;  %v6701_v46 = vpop.xlane.xlu0 %3309  ;;  %v3334_v62 = vsel %vm6732_vm14, %v6688_v5, %v3330_v2 }
 0xacc   : > { %4668 = vpow2.f32 %v3298_v7  ;;  %v3339_v6 = vsel %vm3336_vm2, %v3338_v33, %v3334_v62  ;;  %vm3359_vm10 = vweird.f32 %v6701_v46  ;;  %v3363_v63 = vand.u32 2147483647, %v6701_v46 }
 0xace   : > { %v6699_v25 = vpop.eup %4662  ;;  %v3307_v0 = vpop.xlane.xlu1 %3306  ;;  %vm3364_vm13 = vcmp.eq.f32.partialorder %v3363_v63, 8.507059e+37 }
 0xacf   : > { %v6703_v14 = vpop.eup %4664  ;;  %4670 = vrcp.f32 %v3307_v0  ;;  %v3696_v10 = vsel %vm975_vm1, %v6699_v25, 0.0  ;;  %v3351_v22 = vand.u32 2147483648, %v3307_v0  ;;  %v3349_v50 = vand.u32 2147483647, %v3307_v0 }
 0xad0   : > { %4672 = vpow2.f32 %v3671_v47  ;;  %3697 = vadd.xlane.f32.xlu2 %v3696_v10  ;;  %v3314_v58 = vsel %vm975_vm1, %v6703_v14, 0.0  ;;  %vm3345_vm3 = vweird.f32 %v3307_v0  ;;  %v3438_v47 = vmul.f32 %v6643_v15, %v3339_v6 }
 0xad1   : > { %v6708_v44 = vpop.eup %4666  ;;  %4674 = vrcp.f32 %v6701_v46  ;;  %v3352_v61 = vor.u32 1.1754944e-38, %v3351_v22  ;;  %vm3350_vm5 = vcmp.eq.f32.partialorder %v3349_v50, 8.507059e+37 }
 0xad2   : > { %v3687_v30 = vsel %vm975_vm1, %v6708_v44, 0.0  ;;  %v6719_v35 = vpop.eup %4668 }
 0xad3   : > { %3688 = vadd.xlane.f32.xlu1 %v3687_v30  ;;  %3315 = vadd.xlane.f32.xlu0 %v3314_v58  ;;  %v6717_v40 = vpop.xlane.xlu2 %3312  ;;  %v3320_v51 = vsel %vm975_vm1, %v6719_v35, 0.0 }
 0xad4   : > { %4676 = vrcp.f32 %v6717_v40  ;;  %vm3373_vm8 = vweird.f32 %v6717_v40 }
 0xad5   : > { %v4671_v45 = vpop.eup %4670  ;;  %4678 = vpow2.f32 %v3296_v9  ;;  %v3656_v9 = vpop.xlane.xlu0 %3655 }
 0xad6   : > { %v6724_v57 = vpop.eup %4672  ;;  %v3341_v17 = vmul.f32 %v4671_v45, %v3307_v0  ;;  %4680 = vpow2.f32 %v3677_v23  ;;  %vm3346_vm15 = vweird.f32 %v4671_v45  ;;  %v3285_v0 = vsub.f32 %v6619_v12, %v6678_v19 }
 0xad7   : > { %v6726_v49 = vpop.eup %4674  ;;  %v3690_v31 = vsel %vm975_vm1, %v6724_v57, 0.0  ;;  %vm3347_vm4 = vmor %vm3345_vm3, %vm3346_vm15  ;;  %4682 = vpow2.f32 %v3673_v26  ;;  %v3379_v19 = vand.u32 2147483648, %v6717_v40  ;;  %v3664_v38 = vsub.f32 %v6661_v8, %v3656_v9 }
 0xad8   : > { %v3342_v52 = vsub.f32 1.0, %v3341_v17  ;;  %v3355_v18 = vmul.f32 %v6726_v49, %v6701_v46  ;;  %v3300_v12 = vmul.f32 1.442695, %v3285_v0  ;;  %vm3360_vm7 = vweird.f32 %v6726_v49 }
 0xad9   : > { %v3365_v17 = vand.u32 2147483648, %v6701_v46  ;;  %vm3361_vm11 = vmor %vm3359_vm10, %vm3360_vm7  ;;  %v3380_v11 = vor.u32 1.1754944e-38, %v3379_v19 }
 0xada   : > { %v6744_v32 = vpop.eup %4676  ;;  %v3343_v41 = vmul.f32 %v4671_v45, %v3342_v52  ;;  %v3356_v13 = vsub.f32 1.0, %v3355_v18  ;;  %4684 = vpow2.f32 %v3300_v12 }
 0xadb   : > { %v3369_v20 = vmul.f32 %v6744_v32, %v6717_v40  ;;  %3321 = vadd.xlane.f32.xlu1 %v3320_v51  ;;  %3691 = vadd.xlane.f32.xlu0 %v3690_v31  ;;  %v6750_v53 = vpop.eup %4678  ;;  %vm3374_vm6 = vweird.f32 %v6744_v32  ;;  %v3366_v51 = vor.u32 1.1754944e-38, %v3365_v17  ;;  %v3679_v31 = vmul.f32 1.442695, %v3664_v38 }
 0xadc   : > { %v3344_v5 = vadd.f32 %v4671_v45, %v3343_v41  ;;  %v6752_v42 = vpop.eup %4680  ;;  %v3357_v10 = vmul.f32 %v6726_v49, %v3356_v13  ;;  %v3317_v59 = vsel %vm975_vm1, %v6750_v53, 0.0  ;;  %vm3375_vm9 = vmor %vm3373_vm8, %vm3374_vm6 }
 0xadd   : > { %v3370_v55 = vsub.f32 1.0, %v3369_v20  ;;  %v3699_v30 = vsel %vm975_vm1, %v6752_v42, 0.0  ;;  %v6774_v2 = vpop.eup %4682  ;;  %4686 = vpow2.f32 %v3679_v31 }
 0xade   : > { %v3348_v7 = vsel %vm3347_vm4, %v4671_v45, %v3344_v5  ;;  %v3358_v58 = vadd.f32 %v6726_v49, %v3357_v10  ;;  %v3377_v45 = vand.u32 2147483647, %v6717_v40  ;;  %v3693_v52 = vsel %vm975_vm1, %v6774_v2, 0.0 }
 0xadf   : > { %v3353_v34 = vsel %vm3350_vm5, %v3352_v61, %v3348_v7  ;;  %v3371_v43 = vmul.f32 %v6744_v32, %v3370_v55 }
 0xae0   : > { %v3439_v16 = vmul.f32 %v6655_v1, %v3353_v34  ;;  %v3362_v40 = vsel %vm3361_vm11, %v6726_v49, %v3358_v58  ;;  %vm3378_vm12 = vcmp.eq.f32.partialorder %v3377_v45, 8.507059e+37  ;;  %v6785_v18 = vpop.eup %4684 }
 0xae1   : > { %v3372_v15 = vadd.f32 %v6744_v32, %v3371_v43  ;;  %v3367_v46 = vsel %vm3364_vm13, %v3366_v51, %v3362_v40  ;;  %v3323_v49 = vsel %vm975_vm1, %v6785_v18, 0.0  ;;  %v4345_v40 = vld [vmem:[#allocation6 + $0x30] sm:$0xff] }
 0xae2   : > { %v3446_v21 = vpack.c.bf16 %v3439_v16, %v3438_v47  ;;  %v3440_v8 = vmul.f32 %v6653_v3, %v3367_v46  ;;  %3534 = vmatpush.bf16.msrb.mxu3 %v4345_v40 }
 0xae3   : > { %3318 = vadd.xlane.f32.xlu0 %v3317_v59  ;;  %3700 = vadd.xlane.f32.xlu1 %v3699_v30  ;;  %v6766_v1 = vpop.xlane.xlu2 %3682  ;;  %v3376_v48 = vsel %vm3375_vm9, %v6744_v32, %v3372_v15  ;;  %v6791_v50 = vpop.eup %4686 }
 0xae4   : > { %4281 = vmatmul.msk.bf16.vlgmr.msrb.gmra.mxu2 %vm975_vm1, %v3446_v21  ;;  %v3381_v62 = vsel %vm3378_vm12, %v3380_v11, %v3376_v48  ;;  %v3702_v33 = vsel %vm975_vm1, %v6791_v50, 0.0  ;;  %4688 = vrcp.f32 %v6766_v1  ;;  %vm3710_vm15 = vweird.f32 %v6766_v1 }
 0xae5   : > { %v3441_v32 = vmul.f32 %v6663_v36, %v3381_v62  ;;  %v3716_v34 = vand.u32 2147483648, %v6766_v1  ;;  %v3714_v47 = vand.u32 2147483647, %v6766_v1 }
 0xae6   : > { %v3832_v23 = vpop.permute.xlu1 %3831 }
 0xae7   : > { %3859 = vmatpush.bf16.msra.mxu1 %v3832_v23  ;;  %v3447_v41 = vpack.c.bf16 %v3441_v32, %v3440_v8  ;;  %v3717_v59 = vor.u32 1.1754944e-38, %v3716_v34  ;;  %vm3715_vm4 = vcmp.eq.f32.partialorder %v3714_v47, 8.507059e+37 }
 0xaea   : > { %v4689_v36 = vpop.eup %4688 }
 0xaeb   : > { %3694 = vadd.xlane.f32.xlu0 %v3693_v52  ;;  %v3830_v22 = vpop.permute.xlu2 %3829  ;;  %v3706_v20 = vmul.f32 %v4689_v36, %v6766_v1  ;;  %vm3711_vm14 = vweird.f32 %v4689_v36 }
 0xaec   : > { %3860 = vmatpush.bf16.msra.mxu1 %v3830_v22  ;;  %vm3712_vm2 = vmor %vm3710_vm15, %vm3711_vm14 }
 0xaed   : > { %v3707_v3 = vsub.f32 1.0, %v3706_v20 }
 0xaef   : > { %v3708_v26 = vmul.f32 %v4689_v36, %v3707_v3 }
 0xaf1   : > { %v3709_v61 = vadd.f32 %v4689_v36, %v3708_v26 }
 0xaf3   : > { %3324 = vadd.xlane.f32.xlu0 %v3323_v49  ;;  %v3713_v43 = vsel %vm3712_vm2, %v4689_v36, %v3709_v61 }
 0xaf4   : > { %4282 = vmatmul.msk.bf16.gmra.mxu2 %vm975_vm1, %v3447_v41  ;;  %v3718_v12 = vsel %vm3715_vm4, %v3717_v59, %v3713_v43 }
 0xaf5   : > { %v3817_v63 = vmul.f32 %v6670_v37, %v3718_v12 }
 0xafb   : > { %3703 = vadd.xlane.f32.xlu0 %v3702_v33 }
 0xb3e   : > { %v3686_v5 = vpop.xlane.xlu0 %3685 }
 0xb3f   : > { %4690 = vrcp.f32 %v3686_v5  ;;  %v3730_v0 = vand.u32 2147483648, %v3686_v5  ;;  %v3728_v21 = vand.u32 2147483647, %v3686_v5  ;;  %vm3724_vm5 = vweird.f32 %v3686_v5 }
 0xb41   : > { %v3731_v19 = vor.u32 1.1754944e-38, %v3730_v0  ;;  %vm3729_vm7 = vcmp.eq.f32.partialorder %v3728_v21, 8.507059e+37 }
 0xb43   : > { %v6808_v58 = vpop.xlane.xlu2 %3697 }
 0xb44   : > { %v3786_v36 = vand.u32 2147483648, %v6808_v58 }
 0xb45   : > { %v4691_v6 = vpop.eup %4690 }
 0xb46   : > { %v3720_v55 = vmul.f32 %v4691_v6, %v3686_v5  ;;  %v6797_v13 = vpop.xlane.xlu1 %3688  ;;  %v6799_v7 = vpop.xlane.xlu0 %3315  ;;  %vm3725_vm3 = vweird.f32 %v4691_v6 }
 0xb47   : > { %4692 = vrcp.f32 %v6797_v13  ;;  %vm3726_vm6 = vmor %vm3724_vm5, %vm3725_vm3  ;;  %v3742_v49 = vand.u32 2147483647, %v6797_v13  ;;  %v3744_v41 = vand.u32 2147483648, %v6797_v13  ;;  %vm3738_vm9 = vweird.f32 %v6797_v13 }
 0xb48   : > { %v3721_v16 = vsub.f32 1.0, %v3720_v55  ;;  %4694 = vrcp.f32 %v6799_v7  ;;  %vm3387_vm11 = vweird.f32 %v6799_v7  ;;  %v3391_v3 = vand.u32 2147483647, %v6799_v7 }
 0xb49   : > { %4696 = vrcp.f32 %v6808_v58  ;;  %vm3743_vm13 = vcmp.eq.f32.partialorder %v3742_v49, 8.507059e+37  ;;  %v3745_v34 = vor.u32 1.1754944e-38, %v3744_v41  ;;  %v3393_v47 = vand.u32 2147483648, %v6799_v7 }
 0xb4a   : > { %v3722_v10 = vmul.f32 %v4691_v6, %v3721_v16 }
 0xb4c   : > { %v3723_v30 = vadd.f32 %v4691_v6, %v3722_v10 }
 0xb4d   : > { %v6806_v15 = vpop.eup %4692 }
 0xb4e   : > { %v3727_v1 = vsel %vm3726_vm6, %v4691_v6, %v3723_v30  ;;  %v3734_v9 = vmul.f32 %v6806_v15, %v6797_v13  ;;  %v3692_v45 = vpop.xlane.xlu0 %3691  ;;  %v6812_v17 = vpop.eup %4694  ;;  %vm3739_vm8 = vweird.f32 %v6806_v15 }
 0xb4f   : > { %v3732_v23 = vsel %vm3729_vm7, %v3731_v19, %v3727_v1  ;;  %4698 = vrcp.f32 %v3692_v45  ;;  %v3383_v52 = vmul.f32 %v6812_v17, %v6799_v7  ;;  %v6819_v51 = vpop.xlane.xlu1 %3321  ;;  %v6823_v22 = vpop.eup %4696  ;;  %vm6836_vm10 = vmor %vm3738_vm9, %vm3739_vm8  ;;  %v3758_v5 = vand.u32 2147483648, %v3692_v45 }
 0xb50   : > { %v3818_v48 = vmul.f32 %v6693_v56, %v3732_v23  ;;  %v3735_v38 = vsub.f32 1.0, %v3734_v9  ;;  %v3776_v8 = vmul.f32 %v6823_v22, %v6808_v58  ;;  %v3756_v61 = vand.u32 2147483647, %v3692_v45 }
 0xb51   : > { %v3384_v31 = vsub.f32 1.0, %v3383_v52  ;;  %vm3388_vm14 = vweird.f32 %v6812_v17  ;;  %vm3752_vm15 = vweird.f32 %v3692_v45  ;;  %v3759_v30 = vor.u32 1.1754944e-38, %v3758_v5 }
 0xb52   : > { %v3825_v11 = vpack.c.bf16 %v3818_v48, %v3817_v63  ;;  %v3736_v62 = vmul.f32 %v6806_v15, %v3735_v38  ;;  %v3777_v13 = vsub.f32 1.0, %v3776_v8  ;;  %vm3757_vm3 = vcmp.eq.f32.partialorder %v3756_v61, 8.507059e+37  ;;  %vm6867_vm4 = vmor %vm3387_vm11, %vm3388_vm14 }
 0xb53   : > { %v3385_v20 = vmul.f32 %v6812_v17, %v3384_v31  ;;  %vm3781_vm7 = vweird.f32 %v6823_v22  ;;  %vm3392_vm8 = vcmp.eq.f32.partialorder %v3391_v3, 8.507059e+37  ;;  %v3784_v5 = vand.u32 2147483647, %v6808_v58 }
 0xb54   : > { %4297 = vmatmul.msk.bf16.vlgmr.msra.gmra.mxu1 %vm975_vm1, %v3825_v11  ;;  %v3737_v46 = vadd.f32 %v6806_v15, %v3736_v62  ;;  %v3778_v1 = vmul.f32 %v6823_v22, %v3777_v13  ;;  %v3394_v62 = vor.u32 1.1754944e-38, %v3393_v47 }
 0xb55   : > { %v4699_v56 = vpop.eup %4698  ;;  %v3386_v59 = vadd.f32 %v6812_v17, %v3385_v20  ;;  %vm3785_vm14 = vcmp.eq.f32.partialorder %v3784_v5, 8.507059e+37 }
 0xb56   : > { %v6825_v37 = vpop.xlane.xlu0 %3318  ;;  %v3748_v32 = vmul.f32 %v4699_v56, %v3692_v45  ;;  %v3741_v26 = vsel %vm6836_vm10, %v6806_v15, %v3737_v46  ;;  %vm3753_vm12 = vweird.f32 %v4699_v56  ;;  %v3779_v46 = vadd.f32 %v6823_v22, %v3778_v1 }
 0xb57   : > { %4700 = vrcp.f32 %v6825_v37  ;;  %v6847_v16 = vpop.xlane.xlu1 %3700  ;;  %vm3754_vm2 = vmor %vm3752_vm15, %vm3753_vm12  ;;  %v3746_v15 = vsel %vm3743_vm13, %v3745_v34, %v3741_v26  ;;  %v3407_v45 = vand.u32 2147483648, %v6825_v37  ;;  %v3390_v40 = vsel %vm6867_vm4, %v6812_v17, %v3386_v59 }
 0xb58   : > { %4702 = vrcp.f32 %v6819_v51  ;;  %v3749_v33 = vsub.f32 1.0, %v3748_v32  ;;  %v3819_v38 = vmul.f32 %v6708_v44, %v3746_v15  ;;  %v3405_v52 = vand.u32 2147483647, %v6825_v37 }
 0xb59   : > { %vm3401_vm6 = vweird.f32 %v6825_v37  ;;  %v3408_v8 = vor.u32 1.1754944e-38, %v3407_v45  ;;  %v3395_v41 = vsel %vm3392_vm8, %v3394_v62, %v3390_v40  ;;  %vm3780_vm10 = vweird.f32 %v6808_v58 }
 0xb5a   : > { %v3750_v6 = vmul.f32 %v4699_v56, %v3749_v33  ;;  %v4346_v33 = vld [vmem:[#allocation6 + $0x38] sm:$0xff]  ;;  %vm3406_vm11 = vcmp.eq.f32.partialorder %v3405_v52, 8.507059e+37  ;;  %vm6897_vm12 = vmor %vm3780_vm10, %vm3781_vm7  ;;  %v3442_v13 = vmul.f32 %v6703_v14, %v3395_v41  ;;  %vm3415_vm4 = vweird.f32 %v6819_v51 }
 0xb5b   : > { %3913 = vmatpush.bf16.msra.mxu2 %v4346_v33  ;;  %v3783_v61 = vsel %vm6897_vm12, %v6823_v22, %v3779_v46  ;;  %v3798_v5 = vand.u32 2147483647, %v6847_v16 }
 0xb5c   : > { %v3751_v0 = vadd.f32 %v4699_v56, %v3750_v6 }
 0xb5d   : > { %v4701_v55 = vpop.eup %4700 }
 0xb5e   : > { %v6849_v43 = vpop.eup %4702  ;;  %v3397_v10 = vmul.f32 %v4701_v55, %v6825_v37  ;;  %v6853_v21 = vpop.xlane.xlu0 %3694  ;;  %v3755_v12 = vsel %vm3754_vm2, %v4699_v56, %v3751_v0  ;;  %vm3402_vm5 = vweird.f32 %v4701_v55 }
 0xb5f   : > { %4704 = vrcp.f32 %v6853_v21  ;;  %v3411_v9 = vmul.f32 %v6849_v43, %v6819_v51  ;;  %v3760_v23 = vsel %vm3757_vm3, %v3759_v30, %v3755_v12  ;;  %vm6880_vm9 = vmor %vm3401_vm6, %vm3402_vm5  ;;  %v3772_v58 = vand.u32 2147483648, %v6853_v21 }
 0xb60   : > { %v3398_v19 = vsub.f32 1.0, %v3397_v10  ;;  %4706 = vrcp.f32 %v6847_v16  ;;  %v3820_v11 = vmul.f32 %v6724_v57, %v3760_v23  ;;  %v3787_v10 = vor.u32 1.1754944e-38, %v3786_v36 }
 0xb61   : > { %v3412_v44 = vsub.f32 1.0, %v3411_v9  ;;  %v3770_v59 = vand.u32 2147483647, %v6853_v21  ;;  %vm3766_vm15 = vweird.f32 %v6853_v21  ;;  %vm3416_vm2 = vweird.f32 %v6849_v43 }
 0xb62   : > { %v3399_v48 = vmul.f32 %v4701_v55, %v3398_v19  ;;  %v3826_v7 = vpack.c.bf16 %v3820_v11, %v3819_v38  ;;  %v3788_v12 = vsel %vm3785_vm14, %v3787_v10, %v3783_v61  ;;  %v3773_v9 = vor.u32 1.1754944e-38, %v3772_v58  ;;  %vm6928_vm6 = vmor %vm3415_vm4, %vm3416_vm2 }
 0xb63   : > { %v3413_v47 = vmul.f32 %v6849_v43, %v3412_v44  ;;  %v3421_v23 = vand.u32 2147483648, %v6819_v51  ;;  %vm3771_vm5 = vcmp.eq.f32.partialorder %v3770_v59, 8.507059e+37  ;;  %v3800_v36 = vand.u32 2147483648, %v6847_v16 }
 0xb64   : > { %v3400_v56 = vadd.f32 %v4701_v55, %v3399_v48  ;;  %4298 = vmatmul.msk.bf16.gmra.mxu1 %vm975_vm1, %v3826_v7  ;;  %v3419_v48 = vand.u32 2147483647, %v6819_v51  ;;  %vm3799_vm2 = vcmp.eq.f32.partialorder %v3798_v5, 8.507059e+37 }
 0xb65   : > { %v4705_v31 = vpop.eup %4704  ;;  %v3414_v19 = vadd.f32 %v6849_v43, %v3413_v47  ;;  %v3422_v57 = vor.u32 1.1754944e-38, %v3421_v23  ;;  %v3801_v58 = vor.u32 1.1754944e-38, %v3800_v36 }
 0xb66   : > { %v6884_v32 = vpop.eup %4706  ;;  %v3404_v17 = vsel %vm6880_vm9, %v4701_v55, %v3400_v56  ;;  %v3762_v37 = vmul.f32 %v4705_v31, %v6853_v21  ;;  %v6890_v49 = vpop.xlane.xlu0 %3324  ;;  %vm3767_vm13 = vweird.f32 %v4705_v31  ;;  %vm3420_vm8 = vcmp.eq.f32.partialorder %v3419_v48, 8.507059e+37 }
 0xb67   : > { %4708 = vrcp.f32 %v6890_v49  ;;  %v3483_v20 = vpop.f32.mrf.mxu2  ;;  %v3409_v6 = vsel %vm3406_vm11, %v3408_v8, %v3404_v17  ;;  %v3790_v55 = vmul.f32 %v6884_v32, %v6847_v16  ;;  %vm6914_vm3 = vmor %vm3766_vm15, %vm3767_vm13  ;;  %v3435_v56 = vand.u32 2147483648, %v6890_v49 }
 0xb68   : > { %v3763_v26 = vsub.f32 1.0, %v3762_v37  ;;  %v3443_v34 = vmul.f32 %v6750_v53, %v3409_v6  ;;  %v3418_v51 = vsel %vm6928_vm6, %v6849_v43, %v3414_v19  ;;  %v3433_v44 = vand.u32 2147483647, %v6890_v49 }
 0xb69   : > { %v3791_v14 = vsub.f32 1.0, %v3790_v55  ;;  %vm3429_vm9 = vweird.f32 %v6890_v49  ;;  %vm3795_vm10 = vweird.f32 %v6884_v32  ;;  %v3423_v43 = vsel %vm3420_vm8, %v3422_v57, %v3418_v51 }
 0xb6a   : > { %v3764_v0 = vmul.f32 %v4705_v31, %v3763_v26  ;;  %v3448_v30 = vpack.c.bf16 %v3443_v34, %v3442_v13  ;;  %vm3434_vm12 = vcmp.eq.f32.partialorder %v3433_v44, 8.507059e+37  ;;  %vm3794_vm13 = vweird.f32 %v6847_v16 }
 0xb6b   : > { %v3792_v62 = vmul.f32 %v6884_v32, %v3791_v14  ;;  %vm6947_vm14 = vmor %vm3794_vm13, %vm3795_vm10  ;;  %v3444_v6 = vmul.f32 %v6719_v35, %v3423_v43 }
 0xb6c   : > { %v3765_v15 = vadd.f32 %v4705_v31, %v3764_v0  ;;  %4283 = vmatmul.msk.bf16.gmra.mxu2 %vm975_vm1, %v3448_v30 }
 0xb6d   : > { %v4709_v22 = vpop.eup %4708 }
 0xb6e   : > { %v3769_v1 = vsel %vm6914_vm3, %v4705_v31, %v3765_v15  ;;  %v3425_v45 = vmul.f32 %v4709_v22, %v6890_v49  ;;  %v3704_v21 = vpop.xlane.xlu0 %3703  ;;  %v3822_v31 = vmul.f32 %v6699_v25, %v3788_v12  ;;  %vm3430_vm7 = vweird.f32 %v4709_v22 }
 0xb6f   : > { %4710 = vrcp.f32 %v3704_v21  ;;  %v3485_v63 = vpop.f32.mrf.mxu2  ;;  %v3774_v40 = vsel %vm3771_vm5, %v3773_v9, %v3769_v1  ;;  %vm3431_vm11 = vmor %vm3429_vm9, %vm3430_vm7  ;;  %v3436_v25 = vor.u32 1.1754944e-38, %v3435_v56  ;;  %v3814_v13 = vand.u32 2147483648, %v3704_v21 }
 0xb70   : > { %v3426_v38 = vsub.f32 1.0, %v3425_v45  ;;  %v3503_v11 = vpack.c.bf16 %v3485_v63, %v3483_v20  ;;  %v3821_v7 = vmul.f32 %v6774_v2, %v3774_v40  ;;  %v3793_v2 = vadd.f32 %v6884_v32, %v3792_v62 }
 0xb71   : > { %v3812_v47 = vand.u32 2147483647, %v3704_v21  ;;  %vm3808_vm3 = vweird.f32 %v3704_v21  ;;  %v3815_v16 = vor.u32 1.1754944e-38, %v3814_v13 }
 0xb72   : > { %v3427_v46 = vmul.f32 %v4709_v22, %v3426_v38  ;;  %4289 = vmatmul.msk.bf16.vlgmr.msrb.gmra.mxu3 %vm921_vm0, %v3503_v11  ;;  %v3827_v17 = vpack.c.bf16 %v3822_v31, %v3821_v7  ;;  %v3797_v55 = vsel %vm6947_vm14, %v6884_v32, %v3793_v2 }
 0xb73   : > { %v3802_v59 = vsel %vm3799_vm2, %v3801_v58, %v3797_v55  ;;  %vm3813_vm5 = vcmp.eq.f32.partialorder %v3812_v47, 8.507059e+37 }
 0xb74   : > { %v3428_v8 = vadd.f32 %v4709_v22, %v3427_v46  ;;  %4299 = vmatmul.msk.bf16.gmra.mxu1 %vm975_vm1, %v3827_v17  ;;  %v3823_v32 = vmul.f32 %v6752_v42, %v3802_v59 }
 0xb75   : > { %v4711_v37 = vpop.eup %4710 }
 0xb76   : > { %v3432_v41 = vsel %vm3431_vm11, %v4709_v22, %v3428_v8  ;;  %v3804_v33 = vmul.f32 %v4711_v37, %v3704_v21  ;;  %vm3809_vm15 = vweird.f32 %v4711_v37 }
 0xb77   : > { %v3488_v20 = vpop.f32.mrf.mxu2  ;;  %v3437_v3 = vsel %vm3434_vm12, %v3436_v25, %v3432_v41  ;;  %vm3810_vm4 = vmor %vm3808_vm3, %vm3809_vm15 }
 0xb78   : > { %v3805_v26 = vsub.f32 1.0, %v3804_v33  ;;  %v3445_v61 = vmul.f32 %v6785_v18, %v3437_v3 }
 0xb7a   : > { %v3806_v34 = vmul.f32 %v4711_v37, %v3805_v26  ;;  %v3449_v0 = vpack.c.bf16 %v3445_v61, %v3444_v6 }
 0xb7c   : > { %v3807_v10 = vadd.f32 %v4711_v37, %v3806_v34  ;;  %4284 = vmatmul.msk.bf16.gmra.mxu2 %vm975_vm1, %v3449_v0 }
 0xb7e   : > { %v3811_v35 = vsel %vm3810_vm4, %v4711_v37, %v3807_v10 }
 0xb7f   : > { %v3816_v18 = vsel %vm3813_vm5, %v3815_v16, %v3811_v35  ;;  %v3490_v30 = vpop.f32.mrf.mxu2 }
 0xb80   : > { %v3504_v15 = vpack.c.bf16 %v3490_v30, %v3488_v20  ;;  %v3824_v22 = vmul.f32 %v6791_v50, %v3816_v18 }
 0xb82   : > { %4290 = vmatmul.msk.bf16.gmra.mxu3 %vm921_vm0, %v3504_v15  ;;  %v3828_v12 = vpack.c.bf16 %v3824_v22, %v3823_v32 }
 0xb84   : > { %4300 = vmatmul.msk.bf16.gmra.mxu1 %vm975_vm1, %v3828_v12 }
 0xbd1   : > { %v3862_v14 = vpop.f32.mrf.mxu1 }
 0xbd9   : > { %v3864_v53 = vpop.f32.mrf.mxu1 }
 0xbda   : > { %v3882_v19 = vpack.c.bf16 %v3864_v53, %v3862_v14 }
 0xbdc   : > { %4305 = vmatmul.msk.bf16.vlgmr.msra.gmra.mxu2 %vm921_vm0, %v3882_v19 }
 0xbe1   : > { %v3867_v1 = vpop.f32.mrf.mxu1 }
 0xbe9   : > { %v3869_v9 = vpop.f32.mrf.mxu1 }
 0xbea   : > { %v3883_v45 = vpack.c.bf16 %v3869_v9, %v3867_v1 }
 0xbec   : > { %4306 = vmatmul.msk.bf16.gmra.mxu2 %vm921_vm0, %v3883_v45 }
 0xbef   : > { %v3493_v21 = vpop.f32.mrf.mxu2 }
 0xbf1   : > { %v3872_v23 = vpop.f32.mrf.mxu1 }
 0xbf5   : > { %v3536_v7 = vpop.f32.mrf.mxu3 }
 0xbf6   : > { %v3556_v31 = vadd.f32 %v3536_v7, %v6540_v27 }
 0xbf7   : > { %v3495_v42 = vpop.f32.mrf.mxu2 }
 0xbf8   : > { %v3505_v50 = vpack.c.bf16 %v3495_v42, %v3493_v21 }
 0xbf9   : > { %v3874_v63 = vpop.f32.mrf.mxu1 }
 0xbfa   : > { %4291 = vmatmul.msk.bf16.gmra.mxu3 %vm921_vm0, %v3505_v50  ;;  %v3884_v48 = vpack.c.bf16 %v3874_v63, %v3872_v23 }
 0xbfc   : > { %4307 = vmatmul.msk.bf16.gmra.mxu2 %vm921_vm0, %v3884_v48 }
 0xbfd   : > { %v3538_v44 = vpop.f32.mrf.mxu3 }
 0xbfe   : > { %v3557_v57 = vadd.f32 %v3538_v44, %v6549_v39 }
 0xbff   : > { %v3498_v38 = vpop.f32.mrf.mxu2 }
 0xc01   : > { %v3877_v11 = vpop.f32.mrf.mxu1 }
 0xc05   : > { %v3541_v37 = vpop.f32.mrf.mxu3 }
 0xc06   : > { %v3558_v2 = vadd.f32 %v3541_v37, %v6559_v54 }
 0xc07   : > { %v3500_v40 = vpop.f32.mrf.mxu2 }
 0xc08   : > { %v3506_v52 = vpack.c.bf16 %v3500_v40, %v3498_v38 }
 0xc09   : > { %v3879_v62 = vpop.f32.mrf.mxu1 }
 0xc0a   : > { %4292 = vmatmul.msk.bf16.gmra.mxu3 %vm921_vm0, %v3506_v52  ;;  %v3885_v56 = vpack.c.bf16 %v3879_v62, %v3877_v11 }
 0xc0c   : > { %4308 = vmatmul.msk.bf16.gmra.mxu2 %vm921_vm0, %v3885_v56 }
 0xc0d   : > { %v3543_v43 = vpop.f32.mrf.mxu3 }
 0xc0e   : > { %v3559_v41 = vadd.f32 %v3543_v43, %v6567_v24 }
 0xc5f   : > { %v3915_v51 = vpop.f32.mrf.mxu2 }
 0xc60   : > { %v3935_v46 = vadd.f32 %v3915_v51, %v3556_v31 }
 0xc62   : > { %3943 = vst [vmem:[%s6972_s21] sm:$0xff] %v3935_v46 }
 0xc67   : > { %v3917_v17 = vpop.f32.mrf.mxu2 }
 0xc68   : > { %v3936_v8 = vadd.f32 %v3917_v17, %v3557_v57 }
 0xc6a   : > { %3944 = vst [vmem:[%s6972_s21 + $0x8] sm:$0xff] %v3936_v8 }
 0xc6f   : > { %v3920_v27 = vpop.f32.mrf.mxu2 }
 0xc70   : > { %v3937_v25 = vadd.f32 %v3920_v27, %v3558_v2 }
 0xc72   : > { %3945 = vst [vmem:[%s6972_s21 + $0x10] sm:$0xff] %v3937_v25 }
 0xc77   : > { %v3922_v33 = vpop.f32.mrf.mxu2 }
 0xc78   : > { %v3938_v36 = vadd.f32 %v3922_v33, %v3559_v41 }
 0xc7a   : > { %3946 = vst [vmem:[%s6972_s21 + $0x18] sm:$0xff] %v3938_v36 }
 0xc7d   : > { %v3546_v39 = vpop.f32.mrf.mxu3 }
 0xc7e   : > { %v3560_v20 = vadd.f32 %v3546_v39, %v6575_v60 }
 0xc7f   : > { %v3925_v3 = vpop.f32.mrf.mxu2 }
 0xc80   : > { %v3939_v49 = vadd.f32 %v3925_v3, %v3560_v20 }
 0xc82   : > { %3947 = vst [vmem:[%s6972_s21 + $0x20] sm:$0xff] %v3939_v49 }
 0xc85   : > { %v3548_v54 = vpop.f32.mrf.mxu3 }
 0xc86   : > { %v3561_v5 = vadd.f32 %v3548_v54, %v6581_v4 }
 0xc87   : > { %v3927_v26 = vpop.f32.mrf.mxu2 }
 0xc88   : > { %v3940_v6 = vadd.f32 %v3927_v26, %v3561_v5 }
 0xc8a   : > { %3948 = vst [vmem:[%s6972_s21 + $0x28] sm:$0xff] %v3940_v6 }
 0xc8d   : > { %v3551_v24 = vpop.f32.mrf.mxu3 }
 0xc8e   : > { %v3562_v61 = vadd.f32 %v3551_v24, %v6587_v29 }
 0xc8f   : > { %v3930_v55 = vpop.f32.mrf.mxu2 }
 0xc90   : > { %v3941_v13 = vadd.f32 %v3930_v55, %v3562_v61 }
 0xc92   : > { %3949 = vst [vmem:[%s6972_s21 + $0x30] sm:$0xff] %v3941_v13 }
 0xc95   : > { %v3553_v60 = vpop.f32.mrf.mxu3 }
 0xc96   : > { %v3563_v4 = vadd.f32 %v3553_v60, %v6591_v28 }
 0xc97   : > { %v3932_v34 = vpop.f32.mrf.mxu2 }
 0xc98   : > { %v3942_v47 = vadd.f32 %v3932_v34, %v3563_v4 }
 0xc9a   : > { %3950 = vst [vmem:[%s6972_s21 + $0x38] sm:$0xff] %v3942_v47 }
 0xc9b   : > { %4890 = shalt.err (!%p4887_p8)
}
 0xc9c   : > { %s4955_s14 = smov 128   ;;  %s4956_s15 = smov 8  }
 0xc9d   : > { %4377 = dma.vmem_to_hbm [thread:$0]  (%p5035_p5), %s3965_s3, 1024, %s3967_s26, %s3952_s10, %s4955_s14, %s4955_s14, %s4956_s15  }
 0xc9e PF: > { %p4404_p9 = scmp.ge.s32.totalorder %s4937_s27, 2  ;;  %s3981_s17 = sand.u32 1, %s4925_s24  }
 0xc9f   : > { %s3982_s20 = scalar_lea.sflag [#allocation5], %s3981_s17 }
 0xca0   : > { %p4393_p10 = pnand %p4404_p9, %p5039_p6 }
 0xca2   : > { %p4394_p11 = pneg %p4393_p10 }
 0xca4   : > { %4920 = dma.done.wait (%p4394_p11), %s3982_s20, 1024  }
 0xca5   : > { %4922 = vsyncadd (%p4394_p11), %s3982_s20, 4294966272  ;;  %s7165_s21 = sld [smem:[#allocation16_spill]]  ;;  %p20_p12 = scmp.ge.s32.totalorder %s5022_s30, 4  }
 0xca6   : > { %s7166_s26 = sld [smem:[#allocation17_spill]]  ;;  %s7167_s24 = smov %s4929_s25 }
 0xca7   : > { %s7169_s27 = smov %s5022_s30  ;;  %22 = sbr.rel (!%p20_p12) target bundleno = 9 (0x9), region = 102 }
 0xcab   : > { %s7168_s25 = smov %s7165_s21 }
 0xcac   :  { %3988 = vsyncpa [#allocation4], 1 }
 0xcad   :  { %3990 = vsyncpa [#allocation4 + $0x1], 1 }
 0xcae   :  { %3991 = vsyncpa [#allocation7], 1 }
 0xcaf   :  { %3992 = vsyncpa [#allocation10], 1 }
 0xcb0   :  { %3993 = vsyncpa [#allocation5], 1 }
 0xcb1   :  { %3995 = vsyncpa [#allocation5 + $0x1], 1 }

</bundles_post_ra>
